<compile_context>
chip_gen: v5e
topology: v5e:2x2
jax: 0.10.0
libtpu: 0.0.40
codegen_flags: <defaults>
</compile_context>

<pallas_src>
import jax
import jax.numpy as jnp
from jax import lax
from jax.experimental import pallas as pl
from jax.experimental.pallas import tpu as pltpu

EPS = 1e-3          # BatchNorm2d(eps=0.001) from the module spec
_ROW_CHUNK = 128    # per-chunk Cout rows processed inside one grid step


def _fused_add_conv_bn_kernel(x1_ref, x2_ref, w_ref, g_ref, b_ref, o_ref):
    # x1_ref, x2_ref : (Cin, P)      f32   (native NCHW-flattened layout)
    # w_ref          : (Cout_t, Cin) bf16  (1x1 conv weight tile, NN form)
    # g_ref, b_ref   : (Cout_t, 1)   f32   (BN gamma / beta)
    # o_ref          : (Cout_t, P)   f32   (native NCHW-flattened layout)
    xb = (x1_ref[...] + x2_ref[...]).astype(jnp.bfloat16)   # add in f32, cast for MXU

    tile, p = o_ref.shape
    inv_p = 1.0 / p

    # BN statistics are per output channel (per row of y), so each 128-row
    # chunk is fully independent: compute, normalize and store chunk-by-chunk
    # to keep only ~16 f32 vregs of the intermediate live at any time.
    for c in range(tile // _ROW_CHUNK):
        lo, hi = c * _ROW_CHUNK, (c + 1) * _ROW_CHUNK
        y = lax.dot_general(
            w_ref[lo:hi, :], xb,
            dimension_numbers=(((1,), (0,)), ((), ())),
            preferred_element_type=jnp.float32,
        )                                                    # (chunk, P) f32
        mean = jnp.sum(y, axis=1, keepdims=True) * inv_p
        d = y - mean
        var = jnp.sum(d * d, axis=1, keepdims=True) * inv_p  # biased var (training BN)
        scale = lax.rsqrt(var + EPS) * g_ref[lo:hi, :]
        o_ref[lo:hi, :] = (d * scale + b_ref[lo:hi, :]).astype(o_ref.dtype)


def fused_add_conv_bn(x702, x687, weight_bf16, gamma, beta, *, cout_tiles=6):
    """x702, x687: (N, Cin, H, W) NCHW f32.
    weight_bf16: (Cout, Cin) 1x1-conv weight, pre-converted to bf16 at init.
    gamma, beta: (Cout,) BN affine params.  Returns (N, Cout, H, W) f32."""
    n, cin, h, w = x702.shape
    p = n * h * w
    cout = weight_bf16.shape[0]
    assert cout % cout_tiles == 0
    tile = cout // cout_tiles
    assert tile % _ROW_CHUNK == 0, "Cout tile must stay lane/chunk aligned"

    if weight_bf16.dtype != jnp.bfloat16:   # hoist this cast to init in practice
        weight_bf16 = weight_bf16.astype(jnp.bfloat16)

    def to_cp(x):                           # NCHW -> (Cin, P)
        if n == 1:
            return x.reshape(cin, p)        # free reshape, no transpose
        return jnp.transpose(x.reshape(n, cin, h * w), (1, 0, 2)).reshape(cin, p)

    x1 = to_cp(x702)
    x2 = to_cp(x687)
    g = gamma.reshape(cout, 1)
    b = beta.reshape(cout, 1)

    out_cp = pl.pallas_call(
        _fused_add_conv_bn_kernel,
        out_shape=jax.ShapeDtypeStruct((cout, p), jnp.float32),
        grid=(cout_tiles,),
        in_specs=[
            pl.BlockSpec((cin, p), lambda j: (0, 0)),      # x1 (block idx fixed -> no re-DMA)
            pl.BlockSpec((cin, p), lambda j: (0, 0)),      # x2
            pl.BlockSpec((tile, cin), lambda j: (j, 0)),   # weight tile (bf16)
            pl.BlockSpec((tile, 1), lambda j: (j, 0)),     # gamma
            pl.BlockSpec((tile, 1), lambda j: (j, 0)),     # beta
        ],
        out_specs=pl.BlockSpec((tile, p), lambda j: (j, 0)),
        compiler_params=pltpu.CompilerParams(
            dimension_semantics=("parallel",)),            # Cout tiles independent
    )(x1, x2, weight_bf16, g, b)

    if n == 1:
        return out_cp.reshape(1, cout, h, w)               # free reshape back to NCHW
    return jnp.transpose(out_cp.reshape(cout, n, h, w), (1, 0, 2, 3))


def reference(x702, x687, weight, gamma, beta, *, quantize=False):
    """Pure-JAX reference (training-mode BN, two-pass variance).
    quantize=True mimics the kernel's bf16 weight/activation path."""
    x = x702 + x687
    n, cin, h, w = x.shape
    cout = weight.shape[0]
    xp = jnp.transpose(x, (0, 2, 3, 1)).reshape(-1, cin)
    wm = weight.astype(jnp.float32)
    if quantize:
        xp = xp.astype(jnp.bfloat16).astype(jnp.float32)
        wm = wm.astype(jnp.bfloat16).astype(jnp.float32)
    y = xp @ wm.T                                          # (P, Cout) f32
    mean = jnp.mean(y, axis=0, keepdims=True)
    var = jnp.mean((y - mean) ** 2, axis=0, keepdims=True)
    out = (y - mean) / jnp.sqrt(var + EPS) * gamma[None, :] + beta[None, :]
    return jnp.transpose(out.reshape(n, h, w, cout), (0, 3, 1, 2))


if __name__ == "__main__":
    key = jax.random.PRNGKey(0)
    k1, k2, k3, k4, k5 = jax.random.split(key, 5)

    N, CIN, H, W = 1, 384, 7, 7
    COUT = 2304

    x702 = jax.random.normal(k1, (N, CIN, H, W), dtype=jnp.float32)
    x687 = jax.random.normal(k2, (N, CIN, H, W), dtype=jnp.float32)
    weight = jax.random.normal(k3, (COUT, CIN), dtype=jnp.float32) * 0.05  # Conv2d 1x1
    gamma = 1.0 + 0.1 * jax.random.normal(k4, (COUT,), dtype=jnp.float32)  # BN weight
    beta = 0.1 * jax.random.normal(k5, (COUT,), dtype=jnp.float32)         # BN bias

    # Weight preprocessing hoisted to parameter-init time (done once, not per call).
    weight_bf16 = weight.astype(jnp.bfloat16)

    out = jax.block_until_ready(
        fused_add_conv_bn(x702, x687, weight_bf16, gamma, beta))
    assert out.shape == (N, COUT, H, W), out.shape

    # Tight check against a reference using the same bf16 weight/activation cast
    # (validates the kernel arithmetic itself).
    ref_q = jax.block_until_ready(
        reference(x702, x687, weight, gamma, beta, quantize=True))
    assert jnp.allclose(out, ref_q, atol=2e-3, rtol=2e-3), \
        float(jnp.max(jnp.abs(out - ref_q)))

    # Looser check against the full-f32 reference: bf16 weight storage only
    # perturbs the normalized output slightly (BN renormalizes per channel).
    ref_f = jax.block_until_ready(
        reference(x702, x687, weight, gamma, beta, quantize=False))
    assert jnp.allclose(out, ref_f, atol=5e-2, rtol=5e-2), \
        float(jnp.max(jnp.abs(out - ref_f)))

    print("KERNEL_OK")
</pallas_src>

<mosaic_0001>
module attributes {stable_mosaic.version = 11 : i64} {
  func.func @_fused_add_conv_bn_kernel(%arg0: i32, %arg1: memref<384x49xf32, #tpu.memory_space<vmem>>, %arg2: memref<384x49xf32, #tpu.memory_space<vmem>>, %arg3: memref<384x384xbf16, #tpu.memory_space<vmem>>, %arg4: memref<384x1xf32, #tpu.memory_space<vmem>>, %arg5: memref<384x1xf32, #tpu.memory_space<vmem>>, %arg6: memref<384x49xf32, #tpu.memory_space<vmem>>) attributes {dimension_semantics = [#tpu.dimension_semantics<parallel>], iteration_bounds = array<i64: 6>, scalar_prefetch = 0 : i64, scratch_operands = 0 : i64, tpu.core_type = #tpu.core_type<tc>, window_params = [{pipeline_mode = #tpu.pipeline_mode<synchronous>, transform_indices = @transform_0, window_bounds = array<i64: 384, 49>}, {pipeline_mode = #tpu.pipeline_mode<synchronous>, transform_indices = @transform_1, window_bounds = array<i64: 384, 49>}, {transform_indices = @transform_2, window_bounds = array<i64: 384, 384>}, {transform_indices = @transform_3, window_bounds = array<i64: 384, 1>}, {transform_indices = @transform_4, window_bounds = array<i64: 384, 1>}, {transform_indices = @transform_5, window_bounds = array<i64: 384, 49>}]} {
    %c0 = arith.constant 0 : index
    %c0_0 = arith.constant 0 : index
    %0 = vector.load %arg1[%c0, %c0_0] : memref<384x49xf32, #tpu.memory_space<vmem>>, vector<384x49xf32>
    %c0_1 = arith.constant 0 : index
    %c0_2 = arith.constant 0 : index
    %1 = vector.load %arg2[%c0_1, %c0_2] : memref<384x49xf32, #tpu.memory_space<vmem>>, vector<384x49xf32>
    %2 = arith.addf %0, %1 : vector<384x49xf32>
    %3 = arith.truncf %2 : vector<384x49xf32> to vector<384x49xbf16>
    %c0_3 = arith.constant 0 : index
    %c0_4 = arith.constant 0 : index
    %4 = vector.load %arg3[%c0_3, %c0_4] : memref<384x384xbf16, #tpu.memory_space<vmem>>, vector<128x384xbf16>
    %cst = arith.constant dense<0.000000e+00> : vector<128x49xf32>
    %5 = tpu.matmul %4, %3, %cst {dimension_numbers = #tpu.dot_dimension_numbers<[1], [0], [0], [1], [0, 0, 1, 1], [], []>} : vector<128x384xbf16>, vector<384x49xbf16>, vector<128x49xf32> -> vector<128x49xf32>
    %cst_5 = arith.constant dense<0.000000e+00> : vector<128xf32>
    %6 = vector.multi_reduction <add>, %5, %cst_5 [1] : vector<128x49xf32> to vector<128xf32>
    %7 = vector.shape_cast %6 : vector<128xf32> to vector<128x1xf32>
    %cst_6 = arith.constant 0.0204081628 : f32
    %8 = vector.broadcast %cst_6 : f32 to vector<128x1xf32>
    %9 = arith.mulf %7, %8 : vector<128x1xf32>
    %10 = vector.broadcast %9 : vector<128x1xf32> to vector<128x49xf32>
    %11 = arith.subf %5, %10 : vector<128x49xf32>
    %12 = arith.mulf %11, %11 : vector<128x49xf32>
    %cst_7 = arith.constant dense<0.000000e+00> : vector<128xf32>
    %13 = vector.multi_reduction <add>, %12, %cst_7 [1] : vector<128x49xf32> to vector<128xf32>
    %14 = vector.shape_cast %13 : vector<128xf32> to vector<128x1xf32>
    %cst_8 = arith.constant 0.0204081628 : f32
    %15 = vector.broadcast %cst_8 : f32 to vector<128x1xf32>
    %16 = arith.mulf %14, %15 : vector<128x1xf32>
    %cst_9 = arith.constant 1.000000e-03 : f32
    %17 = vector.broadcast %cst_9 : f32 to vector<128x1xf32>
    %18 = arith.addf %16, %17 : vector<128x1xf32>
    %19 = math.rsqrt %18 : vector<128x1xf32>
    %c0_10 = arith.constant 0 : index
    %c0_11 = arith.constant 0 : index
    %20 = vector.load %arg4[%c0_10, %c0_11] : memref<384x1xf32, #tpu.memory_space<vmem>>, vector<128x1xf32>
    %21 = arith.mulf %19, %20 : vector<128x1xf32>
    %22 = vector.broadcast %21 : vector<128x1xf32> to vector<128x49xf32>
    %23 = arith.mulf %11, %22 : vector<128x49xf32>
    %c0_12 = arith.constant 0 : index
    %c0_13 = arith.constant 0 : index
    %24 = vector.load %arg5[%c0_12, %c0_13] : memref<384x1xf32, #tpu.memory_space<vmem>>, vector<128x1xf32>
    %25 = vector.broadcast %24 : vector<128x1xf32> to vector<128x49xf32>
    %26 = arith.addf %23, %25 : vector<128x49xf32>
    %c0_14 = arith.constant 0 : index
    %c0_15 = arith.constant 0 : index
    %27 = vector.load %arg6[%c0_14, %c0_15] : memref<384x49xf32, #tpu.memory_space<vmem>>, vector<128x49xf32>
    tpu.vector_store %arg6[%c0_14, %c0_15], %26 {strides = array<i32>} : memref<384x49xf32, #tpu.memory_space<vmem>>, vector<128x49xf32>,
    %c128 = arith.constant 128 : index
    %c0_16 = arith.constant 0 : index
    %28 = vector.load %arg3[%c128, %c0_16] : memref<384x384xbf16, #tpu.memory_space<vmem>>, vector<128x384xbf16>
    %cst_17 = arith.constant dense<0.000000e+00> : vector<128x49xf32>
    %29 = tpu.matmul %28, %3, %cst_17 {dimension_numbers = #tpu.dot_dimension_numbers<[1], [0], [0], [1], [0, 0, 1, 1], [], []>} : vector<128x384xbf16>, vector<384x49xbf16>, vector<128x49xf32> -> vector<128x49xf32>
    %cst_18 = arith.constant dense<0.000000e+00> : vector<128xf32>
    %30 = vector.multi_reduction <add>, %29, %cst_18 [1] : vector<128x49xf32> to vector<128xf32>
    %31 = vector.shape_cast %30 : vector<128xf32> to vector<128x1xf32>
    %cst_19 = arith.constant 0.0204081628 : f32
    %32 = vector.broadcast %cst_19 : f32 to vector<128x1xf32>
    %33 = arith.mulf %31, %32 : vector<128x1xf32>
    %34 = vector.broadcast %33 : vector<128x1xf32> to vector<128x49xf32>
    %35 = arith.subf %29, %34 : vector<128x49xf32>
    %36 = arith.mulf %35, %35 : vector<128x49xf32>
    %cst_20 = arith.constant dense<0.000000e+00> : vector<128xf32>
    %37 = vector.multi_reduction <add>, %36, %cst_20 [1] : vector<128x49xf32> to vector<128xf32>
    %38 = vector.shape_cast %37 : vector<128xf32> to vector<128x1xf32>
    %cst_21 = arith.constant 0.0204081628 : f32
    %39 = vector.broadcast %cst_21 : f32 to vector<128x1xf32>
    %40 = arith.mulf %38, %39 : vector<128x1xf32>
    %cst_22 = arith.constant 1.000000e-03 : f32
    %41 = vector.broadcast %cst_22 : f32 to vector<128x1xf32>
    %42 = arith.addf %40, %41 : vector<128x1xf32>
    %43 = math.rsqrt %42 : vector<128x1xf32>
    %c128_23 = arith.constant 128 : index
    %c0_24 = arith.constant 0 : index
    %44 = vector.load %arg4[%c128_23, %c0_24] : memref<384x1xf32, #tpu.memory_space<vmem>>, vector<128x1xf32>
    %45 = arith.mulf %43, %44 : vector<128x1xf32>
    %46 = vector.broadcast %45 : vector<128x1xf32> to vector<128x49xf32>
    %47 = arith.mulf %35, %46 : vector<128x49xf32>
    %c128_25 = arith.constant 128 : index
    %c0_26 = arith.constant 0 : index
    %48 = vector.load %arg5[%c128_25, %c0_26] : memref<384x1xf32, #tpu.memory_space<vmem>>, vector<128x1xf32>
    %49 = vector.broadcast %48 : vector<128x1xf32> to vector<128x49xf32>
    %50 = arith.addf %47, %49 : vector<128x49xf32>
    %c128_27 = arith.constant 128 : index
    %c0_28 = arith.constant 0 : index
    %51 = vector.load %arg6[%c128_27, %c0_28] : memref<384x49xf32, #tpu.memory_space<vmem>>, vector<128x49xf32>
    tpu.vector_store %arg6[%c128_27, %c0_28], %50 {strides = array<i32>} : memref<384x49xf32, #tpu.memory_space<vmem>>, vector<128x49xf32>,
    %c256 = arith.constant 256 : index
    %c0_29 = arith.constant 0 : index
    %52 = vector.load %arg3[%c256, %c0_29] : memref<384x384xbf16, #tpu.memory_space<vmem>>, vector<128x384xbf16>
    %cst_30 = arith.constant dense<0.000000e+00> : vector<128x49xf32>
    %53 = tpu.matmul %52, %3, %cst_30 {dimension_numbers = #tpu.dot_dimension_numbers<[1], [0], [0], [1], [0, 0, 1, 1], [], []>} : vector<128x384xbf16>, vector<384x49xbf16>, vector<128x49xf32> -> vector<128x49xf32>
    %cst_31 = arith.constant dense<0.000000e+00> : vector<128xf32>
    %54 = vector.multi_reduction <add>, %53, %cst_31 [1] : vector<128x49xf32> to vector<128xf32>
    %55 = vector.shape_cast %54 : vector<128xf32> to vector<128x1xf32>
    %cst_32 = arith.constant 0.0204081628 : f32
    %56 = vector.broadcast %cst_32 : f32 to vector<128x1xf32>
    %57 = arith.mulf %55, %56 : vector<128x1xf32>
    %58 = vector.broadcast %57 : vector<128x1xf32> to vector<128x49xf32>
    %59 = arith.subf %53, %58 : vector<128x49xf32>
    %60 = arith.mulf %59, %59 : vector<128x49xf32>
    %cst_33 = arith.constant dense<0.000000e+00> : vector<128xf32>
    %61 = vector.multi_reduction <add>, %60, %cst_33 [1] : vector<128x49xf32> to vector<128xf32>
    %62 = vector.shape_cast %61 : vector<128xf32> to vector<128x1xf32>
    %cst_34 = arith.constant 0.0204081628 : f32
    %63 = vector.broadcast %cst_34 : f32 to vector<128x1xf32>
    %64 = arith.mulf %62, %63 : vector<128x1xf32>
    %cst_35 = arith.constant 1.000000e-03 : f32
    %65 = vector.broadcast %cst_35 : f32 to vector<128x1xf32>
    %66 = arith.addf %64, %65 : vector<128x1xf32>
    %67 = math.rsqrt %66 : vector<128x1xf32>
    %c256_36 = arith.constant 256 : index
    %c0_37 = arith.constant 0 : index
    %68 = vector.load %arg4[%c256_36, %c0_37] : memref<384x1xf32, #tpu.memory_space<vmem>>, vector<128x1xf32>
    %69 = arith.mulf %67, %68 : vector<128x1xf32>
    %70 = vector.broadcast %69 : vector<128x1xf32> to vector<128x49xf32>
    %71 = arith.mulf %59, %70 : vector<128x49xf32>
    %c256_38 = arith.constant 256 : index
    %c0_39 = arith.constant 0 : index
    %72 = vector.load %arg5[%c256_38, %c0_39] : memref<384x1xf32, #tpu.memory_space<vmem>>, vector<128x1xf32>
    %73 = vector.broadcast %72 : vector<128x1xf32> to vector<128x49xf32>
    %74 = arith.addf %71, %73 : vector<128x49xf32>
    %c256_40 = arith.constant 256 : index
    %c0_41 = arith.constant 0 : index
    %75 = vector.load %arg6[%c256_40, %c0_41] : memref<384x49xf32, #tpu.memory_space<vmem>>, vector<128x49xf32>
    tpu.vector_store %arg6[%c256_40, %c0_41], %74 {strides = array<i32>} : memref<384x49xf32, #tpu.memory_space<vmem>>, vector<128x49xf32>,
    return
  }
  func.func @transform_0(%arg0: i32) -> (i32, i32) {
    %c0_i32 = arith.constant 0 : i32
    %c0_i32_0 = arith.constant 0 : i32
    %c0_i32_1 = arith.constant 0 : i32
    return %c0_i32, %c0_i32_0 : i32, i32
  }
  func.func @transform_1(%arg0: i32) -> (i32, i32) {
    %c0_i32 = arith.constant 0 : i32
    %c0_i32_0 = arith.constant 0 : i32
    %c0_i32_1 = arith.constant 0 : i32
    return %c0_i32, %c0_i32_0 : i32, i32
  }
  func.func @transform_2(%arg0: i32) -> (i32, i32) {
    %c0_i32 = arith.constant 0 : i32
    %c0_i32_0 = arith.constant 0 : i32
    return %arg0, %c0_i32 : i32, i32
  }
  func.func @transform_3(%arg0: i32) -> (i32, i32) {
    %c0_i32 = arith.constant 0 : i32
    %c0_i32_0 = arith.constant 0 : i32
    return %arg0, %c0_i32 : i32, i32
  }
  func.func @transform_4(%arg0: i32) -> (i32, i32) {
    %c0_i32 = arith.constant 0 : i32
    %c0_i32_0 = arith.constant 0 : i32
    return %arg0, %c0_i32 : i32, i32
  }
  func.func @transform_5(%arg0: i32) -> (i32, i32) {
    %c0_i32 = arith.constant 0 : i32
    %c0_i32_0 = arith.constant 0 : i32
    return %arg0, %c0_i32 : i32, i32
  }
}

</mosaic_0001>

<bundles_post_ra>
// kernel: tpu_custom_call.1
= control target key start
LH: loop header
LB: loop body
LE: loop exit
PB: predicated region body
PF: predicated region fallthrough
CT: control target
= control target key end

     0   :  { %s3764_s18 = smov 0   ;;  %s5885_s0 = inlined_call_operand.vmem [shape: f32[384,49], index: 0, kind: input, shape index: {}]   ;;  %s5886_s1 = inlined_call_operand.vmem [shape: f32[384,49], index: 1, kind: input, shape index: {}]   ;;  %s5887_s2 = inlined_call_operand.vmem [shape: bf16[2304,384], index: 2, kind: input, shape index: {}]   ;;  %s5888_s3 = inlined_call_operand.vmem [shape: f32[2304,1], index: 3, kind: input, shape index: {}]   ;;  %s5889_s4 = inlined_call_operand.vmem [shape: f32[2304,1], index: 4, kind: input, shape index: {}]   ;;  %s5890_s5 = inlined_call_operand.vmem [shape: f32[2304,49], index: 5, kind: output, shape index: {}]  }
   0x1 LB: > { %s3221_s19 = sadd.s32 4294967295, %s3731_s18   ;;  %p3225_p0 = scmp.ge.s32.totalorder %s3731_s18, 1  ;;  %s3731_s18 = sphi %s3764_s18, %s15_s18  }
   0x2   : > { %p211_p1 = scmp.lt.s32.totalorder %s3731_s18, 7 }
   0x4   : > { %p212_p2 = pnand %p3225_p0, %p211_p1 }
   0x6   : > { %215 = sbr.rel (%p212_p2) target bundleno = 1161 (0x489), region = 40 }
   0xb   : > { %v289_v0 = vld [vmem:[%s5885_s0 + $0x70] sm:$0xff]  ;;  %v290_v1 = vld [vmem:[%s5885_s0 + $0x78] sm:$0xff]  ;;  %s250_s26 = smul.u32 48, %s3221_s19  ;;  %v3733_v5 = vmov 0   ;;  %v287_v6 = vld [vmem:[%s5885_s0 + $0x60] sm:$0xff]  ;;  %vm750_vm0 = vcmask 400384  }
   0xc   : > { %v337_v2 = vld [vmem:[%s5886_s1 + $0x70] sm:$0xff]  ;;  %v338_v3 = vld [vmem:[%s5886_s1 + $0x78] sm:$0xff]  ;;  %3628 = vset.pattern.permute.xlu2 %v3733_v5  ;;  %3627 = vset.pattern.permute.xlu0 %v3733_v5  ;;  %v288_v7 = vld [vmem:[%s5885_s0 + $0x68] sm:$0xff] }
   0xd   : > { %v385_v4 = vadd.f32 %v337_v2, %v289_v0  ;;  %v386_v8 = vadd.f32 %v338_v3, %v290_v1  ;;  %3626 = vset.pattern.permute.xlu1 %v3733_v5  ;;  %v335_v9 = vld [vmem:[%s5886_s1 + $0x60] sm:$0xff]  ;;  %v336_v10 = vld [vmem:[%s5886_s1 + $0x68] sm:$0xff]  ;;  %p251_p3 = scmp.lt.s32.totalorder %s250_s26, 287  ;;  %v285_v11 = vld [vmem:[%s5885_s0 + $0x50] sm:$0xff] }
   0xe   : > { %v383_v12 = vadd.f32 %v335_v9, %v287_v6  ;;  %v384_v13 = vadd.f32 %v336_v10, %v288_v7  ;;  %v286_v14 = vld [vmem:[%s5885_s0 + $0x58] sm:$0xff]  ;;  %v333_v15 = vld [vmem:[%s5886_s1 + $0x50] sm:$0xff]  ;;  %v283_v21 = vld [vmem:[%s5885_s0 + $0x40] sm:$0xff] }
   0xf   : > { %v334_v16 = vld [vmem:[%s5886_s1 + $0x58] sm:$0xff]  ;;  %v3808_v17 = vpack.c.bf16 %v386_v8, %v385_v4  ;;  %s6084_s26 = smov (!%p251_p3, %s250_s26), 287  ;;  %v381_v19 = vadd.f32 %v333_v15, %v285_v11  ;;  %v284_v22 = vld [vmem:[%s5885_s0 + $0x48] sm:$0xff]  ;;  %v331_v23 = vld [vmem:[%s5886_s1 + $0x40] sm:$0xff] }
  0x10   : > { %v3814_v18 = vpack.c.bf16 %v384_v13, %v383_v12  ;;  %s3817_s21 = sshll.u32 %s6084_s26, 3  ;;  %v382_v20 = vadd.f32 %v334_v16, %v286_v14  ;;  %v332_v24 = vld [vmem:[%s5886_s1 + $0x48] sm:$0xff]  ;;  %v379_v29 = vadd.f32 %v331_v23, %v283_v21  ;;  %v281_v31 = vld [vmem:[%s5885_s0 + $0x30] sm:$0xff]  ;;  %v282_v32 = vld [vmem:[%s5885_s0 + $0x38] sm:$0xff]  ;;  %s3616_s12 = smul.u32 12, %s6084_s26 }
  0x11   : > { %3592 = vmatpush.bf16.msra.mxu1 %v3808_v17  ;;  %3593 = vmatpush.bf16.msra.mxu2 %v3808_v17  ;;  %s3827_s27 = scalar_lea.vmem %s5889_s4, %s3817_s21  ;;  %v380_v30 = vadd.f32 %v332_v24, %v284_v22  ;;  %v329_v33 = vld [vmem:[%s5886_s1 + $0x30] sm:$0xff]  ;;  %v330_v34 = vld [vmem:[%s5886_s1 + $0x38] sm:$0xff]  ;;  %v279_v40 = vld [vmem:[%s5885_s0 + $0x20] sm:$0xff]  ;;  %s4939_s29 = scalar_lea.vmem %s5888_s3, %s3817_s21 }
  0x12   : > { %3594 = vmatpush.bf16.msra.mxu3 %v3808_v17  ;;  %603 = vmatpush.bf16.msra.mxu0 %v3808_v17  ;;  %v1217_v25 = vld [vmem:[%s3827_s27 + $0x10] sm:$0xff]  ;;  %v1216_v26 = vld [vmem:[%s3827_s27 + $0x8] sm:$0xff]  ;;  %v1215_v27 = vld [vmem:[%s3827_s27] sm:$0xff]  ;;  %v3844_v28 = vpack.c.bf16 %v382_v20, %v381_v19  ;;  %v377_v38 = vadd.f32 %v329_v33, %v281_v31  ;;  %v378_v39 = vadd.f32 %v330_v34, %v282_v32  ;;  %s3939_s11 = scalar_lea.vmem %s5887_s2, %s3616_s12  ;;  %s5078_s7 = scalar_lea.vmem %s5890_s5, %s3817_s21 }
  0x13   : > { %1243 = vperm.xlu2 %3628, %v1217_v25   ;;  %1238 = vperm.xlu0 %3627, %v1216_v26   ;;  %v3862_v35 = vpack.c.bf16 %v380_v30, %v379_v29  ;;  %v1220_v36 = vld [vmem:[%s3827_s27 + $0x28] sm:$0xff]  ;;  %v1219_v37 = vld [vmem:[%s3827_s27 + $0x20] sm:$0xff]  ;;  %v1218_v44 = vld [vmem:[%s3827_s27 + $0x18] sm:$0xff] }
  0x14   : > { %1233 = vperm.xlu1 %3626, %v1215_v27   ;;  %v280_v41 = vld [vmem:[%s5885_s0 + $0x28] sm:$0xff]  ;;  %v327_v42 = vld [vmem:[%s5886_s1 + $0x20] sm:$0xff]  ;;  %v3883_v45 = vpack.c.bf16 %v378_v39, %v377_v38  ;;  %v277_v48 = vld [vmem:[%s5885_s0 + $0x10] sm:$0xff] }
  0x15   : > { %3595 = vmatpush.bf16.msra.mxu1 %v3814_v18  ;;  %3596 = vmatpush.bf16.msra.mxu2 %v3814_v18  ;;  %v328_v43 = vld [vmem:[%s5886_s1 + $0x28] sm:$0xff]  ;;  %v375_v46 = vadd.f32 %v327_v42, %v279_v40  ;;  %v278_v49 = vld [vmem:[%s5885_s0 + $0x18] sm:$0xff]  ;;  %v325_v50 = vld [vmem:[%s5886_s1 + $0x10] sm:$0xff] }
  0x16   : > { %3597 = vmatpush.bf16.msra.mxu3 %v3814_v18  ;;  %604 = vmatpush.bf16.msra.mxu0 %v3814_v18  ;;  %v376_v47 = vadd.f32 %v328_v43, %v280_v41  ;;  %v326_v51 = vld [vmem:[%s5886_s1 + $0x18] sm:$0xff]  ;;  %v1223_v52 = vld [vmem:[%s3827_s27 + $0x40] sm:$0xff]  ;;  %v1221_v55 = vld [vmem:[%s3827_s27 + $0x30] sm:$0xff]  ;;  %v373_v56 = vadd.f32 %v325_v50, %v277_v48 }
  0x17   : > { %v1222_v53 = vld [vmem:[%s3827_s27 + $0x38] sm:$0xff]  ;;  %v374_v57 = vadd.f32 %v326_v51, %v278_v49  ;;  %v275_v58 = vld [vmem:[%s5885_s0] sm:$0xff]  ;;  %v276_v59 = vld [vmem:[%s5885_s0 + $0x8] sm:$0xff] }
  0x18   : > { %v3904_v54 = vpack.c.bf16 %v376_v47, %v375_v46  ;;  %v323_v60 = vld [vmem:[%s5886_s1] sm:$0xff]  ;;  %v324_v61 = vld [vmem:[%s5886_s1 + $0x8] sm:$0xff]  ;;  %v305_v62 = vld [vmem:[%s5885_s0 + $0xf0] sm:$0xff] }
  0x19   : > { %3598 = vmatpush.bf16.msra.mxu1 %v3844_v28  ;;  %3599 = vmatpush.bf16.msra.mxu2 %v3844_v28  ;;  %v306_v63 = vld [vmem:[%s5885_s0 + $0xf8] sm:$0xff]  ;;  %v353_v0 = vld [vmem:[%s5886_s1 + $0xf0] sm:$0xff]  ;;  %v3952_v6 = vpack.c.bf16 %v374_v57, %v373_v56  ;;  %v371_v7 = vadd.f32 %v323_v60, %v275_v58  ;;  %v372_v8 = vadd.f32 %v324_v61, %v276_v59  ;;  %v303_v9 = vld [vmem:[%s5885_s0 + $0xe0] sm:$0xff] }
  0x1a   : > { %3600 = vmatpush.bf16.msra.mxu3 %v3844_v28  ;;  %605 = vmatpush.bf16.msra.mxu0 %v3844_v28  ;;  %v354_v1 = vld [vmem:[%s5886_s1 + $0xf8] sm:$0xff]  ;;  %v321_v2 = vld [vmem:[%s5885_s0 + $0x170] sm:$0xff]  ;;  %v304_v10 = vld [vmem:[%s5885_s0 + $0xe8] sm:$0xff]  ;;  %v401_v15 = vadd.f32 %v353_v0, %v305_v62 }
  0x1b   : > { %1258 = vperm.xlu2 %3628, %v1220_v36   ;;  %1253 = vperm.xlu0 %3627, %v1219_v37   ;;  %v322_v3 = vld [vmem:[%s5885_s0 + $0x178] sm:$0xff]  ;;  %v369_v4 = vld [vmem:[%s5886_s1 + $0x170] sm:$0xff]  ;;  %v402_v16 = vadd.f32 %v354_v1, %v306_v63  ;;  %v351_v21 = vld [vmem:[%s5886_s1 + $0xe0] sm:$0xff]  ;;  %v3986_v27 = vpack.c.bf16 %v372_v8, %v371_v7 }
  0x1c   : > { %1248 = vperm.xlu1 %3626, %v1218_v44   ;;  %v370_v5 = vld [vmem:[%s5886_s1 + $0x178] sm:$0xff]  ;;  %v1225_v12 = vld [vmem:[%s3827_s27 + $0x50] sm:$0xff]  ;;  %v417_v19 = vadd.f32 %v369_v4, %v321_v2  ;;  %v352_v22 = vld [vmem:[%s5886_s1 + $0xe8] sm:$0xff]  ;;  %v399_v34 = vadd.f32 %v351_v21, %v303_v9 }
  0x1d   : > { %3601 = vmatpush.bf16.msra.mxu1 %v3862_v35  ;;  %3602 = vmatpush.bf16.msra.mxu2 %v3862_v35  ;;  %v1226_v11 = vld [vmem:[%s3827_s27 + $0x58] sm:$0xff]  ;;  %v3256_v13 = vld [vmem:[%s3939_s11 + $0x30] sm:$0xf]  ;;  %v418_v20 = vadd.f32 %v370_v5, %v322_v3  ;;  %v319_v23 = vld [vmem:[%s5885_s0 + $0x160] sm:$0xff]  ;;  %v400_v36 = vadd.f32 %v352_v22, %v304_v10  ;;  %v4001_v39 = vpack.c.bf16 %v402_v16, %v401_v15 }
  0x1e   : > { %3603 = vmatpush.bf16.msra.mxu3 %v3862_v35  ;;  %606 = vmatpush.bf16.msra.mxu0 %v3862_v35  ;;  %v3527_v14 = vld [vmem:[%s3939_s11 + $0x38] sm:$0xf0]  ;;  %v320_v24 = vld [vmem:[%s5885_s0 + $0x168] sm:$0xff]  ;;  %v367_v25 = vld [vmem:[%s5886_s1 + $0x160] sm:$0xff] }
  0x1f   : > { %v368_v26 = vld [vmem:[%s5886_s1 + $0x168] sm:$0xff]  ;;  %v3280_v30 = vld [vmem:[%s3939_s11 + $0x60] sm:$0xf]  ;;  %v3304_v32 = vld [vmem:[%s3939_s11 + $0x90] sm:$0xf]  ;;  %v4003_v40 = vpack.c.bf16 %v418_v20, %v417_v19  ;;  %v415_v41 = vadd.f32 %v367_v25, %v319_v23  ;;  %v3257_v47 = vor.u32 %v3527_v14, %v3256_v13 }
  0x20   : > { %v1224_v29 = vld [vmem:[%s3827_s27 + $0x48] sm:$0xff]  ;;  %v3539_v33 = vld [vmem:[%s3939_s11 + $0x98] sm:$0xf0]  ;;  %v301_v37 = vld [vmem:[%s5885_s0 + $0xd0] sm:$0xff]  ;;  %v416_v42 = vadd.f32 %v368_v26, %v320_v24 }
  0x21   : > { %3604 = vmatpush.bf16.msra.mxu1 %v3883_v45  ;;  %3605 = vmatpush.bf16.msra.mxu2 %v3883_v45  ;;  %v3533_v31 = vld [vmem:[%s3939_s11 + $0x68] sm:$0xf0]  ;;  %v302_v38 = vld [vmem:[%s5885_s0 + $0xd8] sm:$0xff]  ;;  %v349_v43 = vld [vmem:[%s5886_s1 + $0xd0] sm:$0xff] }
  0x22   : > { %3606 = vmatpush.bf16.msra.mxu3 %v3883_v45  ;;  %607 = vmatpush.bf16.msra.mxu0 %v3883_v45  ;;  %v350_v44 = vld [vmem:[%s5886_s1 + $0xd8] sm:$0xff]  ;;  %v317_v46 = vld [vmem:[%s5885_s0 + $0x150] sm:$0xff]  ;;  %v3281_v48 = vor.u32 %v3533_v31, %v3280_v30  ;;  %v3521_v56 = vld [vmem:[%s3939_s11 + $0x8] sm:$0xf0]  ;;  %v397_v57 = vadd.f32 %v349_v43, %v301_v37  ;;  %v4038_v61 = vpack.c.bf16 %v416_v42, %v415_v41 }
  0x23   : > { %1273 = vperm.xlu2 %3628, %v1223_v52   ;;  %1268 = vperm.xlu0 %3627, %v1222_v53   ;;  %v318_v49 = vld [vmem:[%s5885_s0 + $0x158] sm:$0xff]  ;;  %v365_v50 = vld [vmem:[%s5886_s1 + $0x150] sm:$0xff]  ;;  %v3305_v52 = vor.u32 %v3539_v33, %v3304_v32  ;;  %v3232_v53 = vld [vmem:[%s3939_s11] sm:$0xf]  ;;  %v398_v58 = vadd.f32 %v350_v44, %v302_v38 }
  0x24   : > { %1263 = vperm.xlu1 %3626, %v1221_v55   ;;  %v366_v51 = vld [vmem:[%s5886_s1 + $0x158] sm:$0xff]  ;;  %v4027_v55 = vpack.c.bf16 %v400_v36, %v399_v34  ;;  %v299_v59 = vld [vmem:[%s5885_s0 + $0xc0] sm:$0xff]  ;;  %v300_v60 = vld [vmem:[%s5885_s0 + $0xc8] sm:$0xff]  ;;  %v413_v62 = vadd.f32 %v365_v50, %v317_v46  ;;  %v3233_v9 = vor.u32 %v3521_v56, %v3232_v53 }
  0x25   : > { %3607 = vmatpush.bf16.msra.mxu1 %v3904_v54  ;;  %3608 = vmatpush.bf16.msra.mxu2 %v3904_v54  ;;  %v414_v63 = vadd.f32 %v366_v51, %v318_v49  ;;  %v347_v0 = vld [vmem:[%s5886_s1 + $0xc0] sm:$0xff]  ;;  %v348_v1 = vld [vmem:[%s5886_s1 + $0xc8] sm:$0xff]  ;;  %v1229_v7 = vld [vmem:[%s3827_s27 + $0x70] sm:$0xff] }
  0x26   : > { %3609 = vmatpush.bf16.msra.mxu3 %v3904_v54  ;;  %608 = vmatpush.bf16.msra.mxu0 %v3904_v54  ;;  %v315_v2 = vld [vmem:[%s5885_s0 + $0x140] sm:$0xff]  ;;  %v316_v3 = vld [vmem:[%s5885_s0 + $0x148] sm:$0xff]  ;;  %v396_v13 = vadd.f32 %v348_v1, %v300_v60  ;;  %v297_v14 = vld [vmem:[%s5885_s0 + $0xb0] sm:$0xff] }
  0x27   : > { %v363_v4 = vld [vmem:[%s5886_s1 + $0x140] sm:$0xff]  ;;  %v364_v5 = vld [vmem:[%s5886_s1 + $0x148] sm:$0xff]  ;;  %v298_v15 = vld [vmem:[%s5885_s0 + $0xb8] sm:$0xff]  ;;  %v4074_v16 = vpack.c.bf16 %v414_v63, %v413_v62 }
  0x28   : > { %v1228_v8 = vld [vmem:[%s3827_s27 + $0x68] sm:$0xff]  ;;  %v1227_v10 = vld [vmem:[%s3827_s27 + $0x60] sm:$0xff]  ;;  %v411_v19 = vadd.f32 %v363_v4, %v315_v2  ;;  %v412_v20 = vadd.f32 %v364_v5, %v316_v3  ;;  %v345_v21 = vld [vmem:[%s5886_s1 + $0xb0] sm:$0xff] }
  0x29   : > { %3610 = vmatpush.bf16.msra.mxu1 %v3952_v6  ;;  %3611 = vmatpush.bf16.msra.mxu2 %v3952_v6  ;;  %v346_v22 = vld [vmem:[%s5886_s1 + $0xb8] sm:$0xff]  ;;  %v313_v23 = vld [vmem:[%s5885_s0 + $0x130] sm:$0xff]  ;;  %v393_v30 = vadd.f32 %v345_v21, %v297_v14  ;;  %v295_v32 = vld [vmem:[%s5885_s0 + $0xa0] sm:$0xff] }
  0x2a   : > { %3612 = vmatpush.bf16.msra.mxu3 %v3952_v6  ;;  %609 = vmatpush.bf16.msra.mxu0 %v3952_v6  ;;  %v314_v24 = vld [vmem:[%s5885_s0 + $0x138] sm:$0xff]  ;;  %v361_v25 = vld [vmem:[%s5886_s1 + $0x130] sm:$0xff]  ;;  %v394_v31 = vadd.f32 %v346_v22, %v298_v15  ;;  %v296_v33 = vld [vmem:[%s5885_s0 + $0xa8] sm:$0xff]  ;;  %v4105_v34 = vpack.c.bf16 %v412_v20, %v411_v19 }
  0x2b   : > { %1288 = vperm.xlu2 %3628, %v1226_v11   ;;  %1283 = vperm.xlu0 %3627, %v1225_v12   ;;  %v4064_v11 = vpack.c.bf16 %v398_v58, %v397_v57  ;;  %v395_v12 = vadd.f32 %v347_v0, %v299_v59  ;;  %v362_v26 = vld [vmem:[%s5886_s1 + $0x138] sm:$0xff]  ;;  %v2115_v36 = vld [vmem:[%s3827_s27 + $0x88] sm:$0xff]  ;;  %v2114_v37 = vld [vmem:[%s3827_s27 + $0x80] sm:$0xff]  ;;  %v409_v41 = vadd.f32 %v361_v25, %v313_v23 }
  0x2c   : > { %1278 = vperm.xlu1 %3626, %v1224_v29   ;;  %v3268_v38 = vld [vmem:[%s3939_s11 + $0x48] sm:$0xf]  ;;  %v410_v42 = vadd.f32 %v362_v26, %v314_v24  ;;  %v343_v43 = vld [vmem:[%s5886_s1 + $0xa0] sm:$0xff]  ;;  %v3530_v50 = vld [vmem:[%s3939_s11 + $0x50] sm:$0xf0]  ;;  %v4135_v57 = vpack.c.bf16 %v394_v31, %v393_v30 }
  0x2d   : > { %3613 = vmatpush.bf16.msra.mxu1 %v3986_v27  ;;  %3614 = vmatpush.bf16.msra.mxu2 %v3986_v27  ;;  %v4095_v29 = vpack.c.bf16 %v396_v13, %v395_v12  ;;  %v344_v44 = vld [vmem:[%s5886_s1 + $0xa8] sm:$0xff]  ;;  %v311_v46 = vld [vmem:[%s5885_s0 + $0x120] sm:$0xff]  ;;  %v3292_v51 = vld [vmem:[%s3939_s11 + $0x78] sm:$0xf]  ;;  %v391_v58 = vadd.f32 %v343_v43, %v295_v32  ;;  %v3269_v3 = vor.u32 %v3530_v50, %v3268_v38 }
  0x2e   : > { %3615 = vmatpush.bf16.msra.mxu3 %v3986_v27  ;;  %610 = vmatpush.bf16.msra.mxu0 %v3986_v27  ;;  %v360_v49 = vld [vmem:[%s5886_s1 + $0x128] sm:$0xff]  ;;  %v3542_v56 = vld [vmem:[%s3939_s11 + $0xb0] sm:$0xf0]  ;;  %v392_v59 = vadd.f32 %v344_v44, %v296_v33  ;;  %v1230_v60 = vld [vmem:[%s3827_s27 + $0x78] sm:$0xff]  ;;  %v4140_v62 = vpack.c.bf16 %v410_v42, %v409_v41 }
  0x2f   : > { %v3316_v53 = vld [vmem:[%s3939_s11 + $0xa8] sm:$0xf]  ;;  %v293_v1 = vld [vmem:[%s5885_s0 + $0x90] sm:$0xff]  ;;  %v294_v2 = vld [vmem:[%s5885_s0 + $0x98] sm:$0xff] }
  0x30   : > { %621 = vmatmul.bf16.vlgmr.msra.gmra.mxu1 %v3257_v47  ;;  %631 = vmatmul.bf16.vlgmr.msra.gmra.mxu2 %v3281_v48  ;;  %v312_v47 = vld [vmem:[%s5885_s0 + $0x128] sm:$0xff]  ;;  %v359_v48 = vld [vmem:[%s5886_s1 + $0x120] sm:$0xff]  ;;  %v341_v5 = vld [vmem:[%s5886_s1 + $0x90] sm:$0xff]  ;;  %v4168_v14 = vpack.c.bf16 %v392_v59, %v391_v58 }
  0x31   : > { %652 = vmatpush.bf16.msrb.mxu1 %v4001_v39  ;;  %701 = vmatpush.bf16.msrb.mxu2 %v4003_v40  ;;  %v407_v63 = vadd.f32 %v359_v48, %v311_v46  ;;  %v408_v0 = vadd.f32 %v360_v49, %v312_v47  ;;  %v357_v12 = vld [vmem:[%s5886_s1 + $0x110] sm:$0xff]  ;;  %v358_v13 = vld [vmem:[%s5886_s1 + $0x118] sm:$0xff]  ;;  %v3524_v19 = vld [vmem:[%s3939_s11 + $0x20] sm:$0xf0]  ;;  %v389_v23 = vadd.f32 %v341_v5, %v293_v1 }
  0x32   : > { %641 = vmatmul.bf16.vlgmr.msra.gmra.mxu3 %v3305_v52  ;;  %1552 = vmatpush.bf16.msrb.mxu0 %v4001_v39  ;;  %v3536_v52 = vld [vmem:[%s3939_s11 + $0x80] sm:$0xf0]  ;;  %v3244_v15 = vld [vmem:[%s3939_s11 + $0x18] sm:$0xf]  ;;  %v292_v26 = vld [vmem:[%s5885_s0 + $0x88] sm:$0xff] }
  0x33   : > { %1503 = vmatpush.bf16.msrb.mxu3 %v3808_v17  ;;  %1303 = vperm.xlu2 %3628, %v1229_v7   ;;  %v3293_v4 = vor.u32 %v3536_v52, %v3292_v51  ;;  %v342_v7 = vld [vmem:[%s5886_s1 + $0x98] sm:$0xff]  ;;  %v4174_v20 = vpack.c.bf16 %v408_v0, %v407_v63  ;;  %v2118_v21 = vld [vmem:[%s3827_s27 + $0xa0] sm:$0xff]  ;;  %v340_v33 = vld [vmem:[%s5886_s1 + $0x88] sm:$0xff] }
  0x34   : > { %1298 = vperm.xlu0 %3627, %v1228_v8   ;;  %611 = vmatmul.bf16.vlgmr.msra.gmra.mxu0 %v3233_v9  ;;  %v309_v8 = vld [vmem:[%s5885_s0 + $0x110] sm:$0xff]  ;;  %v3317_v9 = vor.u32 %v3542_v56, %v3316_v53  ;;  %v2117_v22 = vld [vmem:[%s3827_s27 + $0x98] sm:$0xff]  ;;  %v390_v24 = vadd.f32 %v342_v7, %v294_v2  ;;  %v291_v25 = vld [vmem:[%s5885_s0 + $0x80] sm:$0xff]  ;;  %v388_v47 = vadd.f32 %v340_v33, %v292_v26 }
  0x35   : > { %653 = vmatpush.bf16.msrb.mxu1 %v4027_v55  ;;  %702 = vmatpush.bf16.msrb.mxu2 %v4038_v61  ;;  %v405_v30 = vadd.f32 %v357_v12, %v309_v8  ;;  %v339_v32 = vld [vmem:[%s5886_s1 + $0x80] sm:$0xff]  ;;  %v308_v38 = vld [vmem:[%s5885_s0 + $0x108] sm:$0xff]  ;;  %v2116_v43 = vld [vmem:[%s3827_s27 + $0x90] sm:$0xff] }
  0x36   : > { %1293 = vperm.xlu1 %3626, %v1227_v10   ;;  %1553 = vmatpush.bf16.msrb.mxu0 %v4027_v55  ;;  %v310_v10 = vld [vmem:[%s5885_s0 + $0x118] sm:$0xff]  ;;  %v355_v41 = vld [vmem:[%s5886_s1 + $0x100] sm:$0xff]  ;;  %v356_v42 = vld [vmem:[%s5886_s1 + $0x108] sm:$0xff]  ;;  %v4207_v44 = vpack.c.bf16 %v390_v24, %v389_v23  ;;  %v387_v46 = vadd.f32 %v339_v32, %v291_v25 }
  0x37   : > { %1504 = vmatpush.bf16.msrb.mxu3 %v3814_v18  ;;  %v406_v31 = vadd.f32 %v358_v13, %v310_v10  ;;  %v404_v50 = vadd.f32 %v356_v42, %v308_v38  ;;  %v2121_v53 = vld [vmem:[%s3827_s27 + $0xb8] sm:$0xff]  ;;  %v3520_v56 = vld [vmem:[%s3939_s11 + $0x4] sm:$0xf]  ;;  %v3234_v58 = vld [vmem:[%s3939_s11 + $0xc] sm:$0xf0] }
  0x38   : > { %v4214_v51 = vpack.c.bf16 %v388_v47, %v387_v46  ;;  %v3240_v59 = vld [vmem:[%s3939_s11 + $0x8] sm:$0xf]  ;;  %v2120_v63 = vld [vmem:[%s3827_s27 + $0xb0] sm:$0xff]  ;;  %v3328_v0 = vld [vmem:[%s3939_s11 + $0xc0] sm:$0xf] }
  0x39   : > { %654 = vmatpush.bf16.msrb.mxu1 %v4064_v11  ;;  %703 = vmatpush.bf16.msrb.mxu2 %v4074_v16  ;;  %v4209_v48 = vpack.c.bf16 %v406_v31, %v405_v30  ;;  %v3545_v1 = vld [vmem:[%s3939_s11 + $0xc8] sm:$0xf0]  ;;  %v3544_v7 = vld [vmem:[%s3939_s11 + $0xc4] sm:$0xf]  ;;  %v3330_v8 = vld [vmem:[%s3939_s11 + $0xcc] sm:$0xf0] }
  0x3a   : > { %1554 = vmatpush.bf16.msrb.mxu0 %v4064_v11  ;;  %v2119_v2 = vld [vmem:[%s3827_s27 + $0xa8] sm:$0xff]  ;;  %v3329_v5 = vor.u32 %v3545_v1, %v3328_v0  ;;  %v3333_v12 = vor.u32 %v3544_v7, %v3330_v8  ;;  %v2122_v13 = vld [vmem:[%s3827_s27 + $0xc0] sm:$0xff]  ;;  %v2125_v23 = vld [vmem:[%s3827_s27 + $0xd8] sm:$0xff] }
  0x3b   : > { %1505 = vmatpush.bf16.msrb.mxu3 %v3844_v28  ;;  %2137 = vperm.xlu2 %3628, %v2115_v36   ;;  %v307_v36 = vld [vmem:[%s5885_s0 + $0x100] sm:$0xff]  ;;  %v2123_v10 = vld [vmem:[%s3827_s27 + $0xc8] sm:$0xff]  ;;  %v3547_v24 = vld [vmem:[%s3939_s11 + $0xdc] sm:$0xf] }
  0x3c   : > { %2132 = vperm.xlu0 %3627, %v2114_v37   ;;  %v3245_v37 = vor.u32 %v3524_v19, %v3244_v15  ;;  %v403_v49 = vadd.f32 %v355_v41, %v307_v36  ;;  %v3252_v15 = vld [vmem:[%s3939_s11 + $0x20] sm:$0xf]  ;;  %v3525_v19 = vld [vmem:[%s3939_s11 + $0x28] sm:$0xf0]  ;;  %v3342_v25 = vld [vmem:[%s3939_s11 + $0xe4] sm:$0xf0] }
  0x3d   : > { %655 = vmatpush.bf16.msrb.mxu1 %v4095_v29  ;;  %704 = vmatpush.bf16.msrb.mxu2 %v4105_v34  ;;  %v2128_v26 = vld [vmem:[%s3827_s27 + $0xf0] sm:$0xff]  ;;  %v3014_v30 = vld [vmem:[%s3827_s27 + $0x108] sm:$0xff]  ;;  %v3354_v36 = vld [vmem:[%s3939_s11 + $0xfc] sm:$0xf0] }
  0x3e   : > { %1308 = vperm.xlu1 %3626, %v1230_v60   ;;  %1555 = vmatpush.bf16.msrb.mxu0 %v4095_v29  ;;  %v4217_v52 = vpack.c.bf16 %v404_v50, %v403_v49  ;;  %v3522_v60 = vld [vmem:[%s3939_s11 + $0x10] sm:$0xf0]  ;;  %v3352_v31 = vld [vmem:[%s3939_s11 + $0xf0] sm:$0xf]  ;;  %v3018_v41 = vld [vmem:[%s3827_s27 + $0x128] sm:$0xff] }
  0x3f   : > { %1506 = vmatpush.bf16.msrb.mxu3 %v3862_v35  ;;  %v3015_v32 = vld [vmem:[%s3827_s27 + $0x110] sm:$0xff]  ;;  %v3022_v42 = vld [vmem:[%s3827_s27 + $0x148] sm:$0xff]  ;;  %v3531_v47 = vld [vmem:[%s3939_s11 + $0x58] sm:$0xf0] }
  0x40   : > { %626 = vmatmul.bf16.gmra.mxu1 %v3269_v3  ;;  %636 = vmatmul.bf16.gmra.mxu2 %v3293_v4  ;;  %v3237_v3 = vor.u32 %v3520_v56, %v3234_v58  ;;  %v3241_v4 = vor.u32 %v3522_v60, %v3240_v59  ;;  %v3276_v46 = vld [vmem:[%s3939_s11 + $0x50] sm:$0xf]  ;;  %v3364_v49 = vld [vmem:[%s3939_s11 + $0x108] sm:$0xf]  ;;  %v3554_v50 = vld [vmem:[%s3939_s11 + $0x110] sm:$0xf0] }
  0x41   : > { %656 = vmatpush.bf16.msrb.mxu1 %v4135_v57  ;;  %705 = vmatpush.bf16.msrb.mxu2 %v4140_v62  ;;  %v3365_v56 = vor.u32 %v3554_v50, %v3364_v49  ;;  %v3553_v58 = vld [vmem:[%s3939_s11 + $0x10c] sm:$0xf]  ;;  %v3366_v59 = vld [vmem:[%s3939_s11 + $0x114] sm:$0xf0]  ;;  %v3025_v60 = vld [vmem:[%s3827_s27 + $0x160] sm:$0xff] }
  0x42   : > { %646 = vmatmul.bf16.gmra.mxu3 %v3317_v9  ;;  %1556 = vmatpush.bf16.msrb.mxu0 %v4135_v57  ;;  %v2124_v9 = vld [vmem:[%s3827_s27 + $0xd0] sm:$0xff]  ;;  %v3369_v0 = vor.u32 %v3553_v58, %v3366_v59  ;;  %v3024_v1 = vld [vmem:[%s3827_s27 + $0x158] sm:$0xff]  ;;  %v3376_v7 = vld [vmem:[%s3939_s11 + $0x120] sm:$0xf] }
  0x43   : > { %1507 = vmatpush.bf16.msrb.mxu3 %v3883_v45  ;;  %2152 = vperm.xlu2 %3628, %v2118_v21   ;;  %v3340_v21 = vld [vmem:[%s3939_s11 + $0xd8] sm:$0xf]  ;;  %v3557_v8 = vld [vmem:[%s3939_s11 + $0x128] sm:$0xf0] }
  0x44   : > { %2147 = vperm.xlu0 %3627, %v2117_v22   ;;  %616 = vmatmul.bf16.gmra.mxu0 %v3245_v37  ;;  %v3548_v22 = vld [vmem:[%s3939_s11 + $0xe0] sm:$0xf0] }
  0x45   : > { %657 = vmatpush.bf16.msrb.mxu1 %v4168_v14  ;;  %706 = vmatpush.bf16.msrb.mxu2 %v4174_v20  ;;  %v3017_v37 = vld [vmem:[%s3827_s27 + $0x120] sm:$0xff] }
  0x46   : > { %2142 = vperm.xlu1 %3626, %v2116_v43   ;;  %1557 = vmatpush.bf16.msrb.mxu0 %v4168_v14  ;;  %v3529_v43 = vld [vmem:[%s3939_s11 + $0x4c] sm:$0xf] }
  0x47   : > { %1508 = vmatpush.bf16.msrb.mxu3 %v3904_v54 }
  0x49   : > { %658 = vmatpush.bf16.msrb.mxu1 %v4207_v44  ;;  %707 = vmatpush.bf16.msrb.mxu2 %v4209_v48 }
  0x4a   : > { %1558 = vmatpush.bf16.msrb.mxu0 %v4207_v44 }
  0x4b   : > { %1509 = vmatpush.bf16.msrb.mxu3 %v3952_v6  ;;  %2167 = vperm.xlu2 %3628, %v2121_v53   ;;  %v3277_v53 = vor.u32 %v3531_v47, %v3276_v46 }
  0x4c   : > { %2162 = vperm.xlu0 %3627, %v2120_v63   ;;  %v3023_v63 = vld [vmem:[%s3827_s27 + $0x150] sm:$0xff] }
  0x4d   : > { %659 = vmatpush.bf16.msrb.mxu1 %v4214_v51  ;;  %708 = vmatpush.bf16.msrb.mxu2 %v4217_v52 }
  0x4e   : > { %2157 = vperm.xlu1 %3626, %v2119_v2   ;;  %1559 = vmatpush.bf16.msrb.mxu0 %v4214_v51  ;;  %v3532_v2 = vld [vmem:[%s3939_s11 + $0x64] sm:$0xf] }
  0x4f   : > { %1510 = vmatpush.bf16.msrb.mxu3 %v3986_v27 }
  0x50   : > { %660 = vmatmul.bf16.vlgmr.msrb.gmra.mxu1 %v3237_v3  ;;  %709 = vmatmul.bf16.vlgmr.msrb.gmra.mxu2 %v3241_v4  ;;  %v3282_v3 = vld [vmem:[%s3939_s11 + $0x6c] sm:$0xf0]  ;;  %v3288_v4 = vld [vmem:[%s3939_s11 + $0x68] sm:$0xf] }
  0x51   : > { %1601 = vmatpush.bf16.msra.mxu1 %v4003_v40  ;;  %2402 = vmatpush.bf16.msra.mxu2 %v3808_v17  ;;  %v2127_v17 = vld [vmem:[%s3827_s27 + $0xe8] sm:$0xff] }
  0x52   : > { %1511 = vmatmul.bf16.vlgmr.msrb.gmra.mxu3 %v3329_v5  ;;  %2500 = vmatpush.bf16.msra.mxu0 %v4003_v40  ;;  %v2126_v40 = vld [vmem:[%s3827_s27 + $0xe0] sm:$0xff]  ;;  %v3534_v5 = vld [vmem:[%s3939_s11 + $0x70] sm:$0xf0] }
  0x53   : > { %2451 = vmatpush.bf16.msra.mxu3 %v4001_v39  ;;  %2182 = vperm.xlu2 %3628, %v2124_v9   ;;  %v3523_v39 = vld [vmem:[%s3939_s11 + $0x1c] sm:$0xf]  ;;  %v3285_v9 = vor.u32 %v3532_v2, %v3282_v3  ;;  %v3336_v2 = vld [vmem:[%s3939_s11 + $0xc8] sm:$0xf]  ;;  %v3546_v3 = vld [vmem:[%s3939_s11 + $0xd0] sm:$0xf0] }
  0x54   : > { %2177 = vperm.xlu0 %3627, %v2123_v10   ;;  %1560 = vmatmul.bf16.vlgmr.msrb.gmra.mxu0 %v3333_v12  ;;  %v3289_v10 = vor.u32 %v3534_v5, %v3288_v4  ;;  %v3377_v12 = vor.u32 %v3557_v8, %v3376_v7  ;;  %v3424_v4 = vld [vmem:[%s3939_s11 + $0x180] sm:$0xf]  ;;  %v3569_v5 = vld [vmem:[%s3939_s11 + $0x188] sm:$0xf0] }
  0x55   : > { %1602 = vmatpush.bf16.msra.mxu1 %v4038_v61  ;;  %2403 = vmatpush.bf16.msra.mxu2 %v3814_v18  ;;  %v3246_v18 = vld [vmem:[%s3939_s11 + $0x24] sm:$0xf0] }
  0x56   : > { %2172 = vperm.xlu1 %3626, %v2122_v13   ;;  %2501 = vmatpush.bf16.msra.mxu0 %v4038_v61  ;;  %v3341_v61 = vor.u32 %v3548_v22, %v3340_v21  ;;  %v3556_v13 = vld [vmem:[%s3939_s11 + $0x124] sm:$0xf]  ;;  %v3388_v21 = vld [vmem:[%s3939_s11 + $0x138] sm:$0xf] }
  0x57   : > { %2452 = vmatpush.bf16.msra.mxu3 %v4027_v55  ;;  %v3253_v55 = vor.u32 %v3525_v19, %v3252_v15  ;;  %v3294_v15 = vld [vmem:[%s3939_s11 + $0x84] sm:$0xf0]  ;;  %v3300_v19 = vld [vmem:[%s3939_s11 + $0x80] sm:$0xf]  ;;  %v3560_v22 = vld [vmem:[%s3939_s11 + $0x140] sm:$0xf0] }
  0x59   : > { %1603 = vmatpush.bf16.msra.mxu1 %v4074_v16  ;;  %2404 = vmatpush.bf16.msra.mxu2 %v3844_v28  ;;  %v3249_v28 = vor.u32 %v3523_v39, %v3246_v18  ;;  %v3535_v18 = vld [vmem:[%s3939_s11 + $0x7c] sm:$0xf] }
  0x5a   : > { %2502 = vmatpush.bf16.msra.mxu0 %v4074_v16  ;;  %v3345_v16 = vor.u32 %v3547_v24, %v3342_v25  ;;  %v3390_v24 = vld [vmem:[%s3939_s11 + $0x144] sm:$0xf0] }
  0x5b   : > { %2453 = vmatpush.bf16.msra.mxu3 %v4064_v11  ;;  %2197 = vperm.xlu2 %3628, %v2127_v17   ;;  %v2129_v11 = vld [vmem:[%s3827_s27 + $0xf8] sm:$0xff]  ;;  %v3378_v17 = vld [vmem:[%s3939_s11 + $0x12c] sm:$0xf0] }
  0x5c   : > { %2192 = vperm.xlu0 %3627, %v2126_v40   ;;  %v3381_v39 = vor.u32 %v3556_v13, %v3378_v17  ;;  %v3537_v40 = vld [vmem:[%s3939_s11 + $0x88] sm:$0xf0]  ;;  %v3337_v17 = vor.u32 %v3546_v3, %v3336_v2 }
  0x5d   : > { %1604 = vmatpush.bf16.msra.mxu1 %v4105_v34  ;;  %2405 = vmatpush.bf16.msra.mxu2 %v3862_v35  ;;  %v3013_v35 = vld [vmem:[%s3827_s27 + $0x100] sm:$0xff] }
  0x5e   : > { %2187 = vperm.xlu1 %3626, %v2125_v23   ;;  %2503 = vmatpush.bf16.msra.mxu0 %v4105_v34  ;;  %v3258_v34 = vld [vmem:[%s3939_s11 + $0x3c] sm:$0xf0]  ;;  %v3297_v23 = vor.u32 %v3535_v18, %v3294_v15 }
  0x5f   : > { %2454 = vmatpush.bf16.msra.mxu3 %v4095_v29  ;;  %v3526_v29 = vld [vmem:[%s3939_s11 + $0x34] sm:$0xf] }
  0x60   : > { %665 = vmatmul.bf16.gmra.mxu1 %v3249_v28  ;;  %714 = vmatmul.bf16.gmra.mxu2 %v3253_v55  ;;  %v3301_v28 = vor.u32 %v3537_v40, %v3300_v19  ;;  %v3389_v55 = vor.u32 %v3560_v22, %v3388_v21  ;;  %v3432_v19 = vld [vmem:[%s3939_s11 + $0x188] sm:$0xf]  ;;  %v3570_v40 = vld [vmem:[%s3939_s11 + $0x190] sm:$0xf0] }
  0x61   : > { %1605 = vmatpush.bf16.msra.mxu1 %v4140_v62  ;;  %2406 = vmatpush.bf16.msra.mxu2 %v3883_v45  ;;  %v3016_v45 = vld [vmem:[%s3827_s27 + $0x118] sm:$0xff] }
  0x62   : > { %1516 = vmatmul.bf16.gmra.mxu3 %v3341_v61  ;;  %2504 = vmatpush.bf16.msra.mxu0 %v4140_v62  ;;  %v3551_v62 = vld [vmem:[%s3939_s11 + $0xf8] sm:$0xf0] }
  0x63   : > { %2455 = vmatpush.bf16.msra.mxu3 %v4135_v57  ;;  %3031 = vperm.xlu2 %3628, %v3013_v35   ;;  %v3264_v57 = vld [vmem:[%s3939_s11 + $0x38] sm:$0xf]  ;;  %v3353_v33 = vor.u32 %v3551_v62, %v3352_v31  ;;  %v3559_v61 = vld [vmem:[%s3939_s11 + $0x13c] sm:$0xf]  ;;  %v3538_v35 = vld [vmem:[%s3939_s11 + $0x94] sm:$0xf] }
  0x64   : > { %2207 = vperm.xlu0 %3627, %v2129_v11   ;;  %1565 = vmatmul.bf16.gmra.mxu0 %v3345_v16  ;;  %v3393_v25 = vor.u32 %v3559_v61, %v3390_v24  ;;  %v3306_v11 = vld [vmem:[%s3939_s11 + $0x9c] sm:$0xf0]  ;;  %v3312_v16 = vld [vmem:[%s3939_s11 + $0x98] sm:$0xf]  ;;  %v3562_v31 = vld [vmem:[%s3939_s11 + $0x154] sm:$0xf] }
  0x65   : > { %1606 = vmatpush.bf16.msra.mxu1 %v4174_v20  ;;  %2407 = vmatpush.bf16.msra.mxu2 %v3904_v54  ;;  %v3528_v54 = vld [vmem:[%s3939_s11 + $0x40] sm:$0xf0]  ;;  %v3402_v62 = vld [vmem:[%s3939_s11 + $0x15c] sm:$0xf0] }
  0x66   : > { %2202 = vperm.xlu1 %3626, %v2128_v26   ;;  %2505 = vmatpush.bf16.msra.mxu0 %v4174_v20  ;;  %v3550_v20 = vld [vmem:[%s3939_s11 + $0xf4] sm:$0xf]  ;;  %v3540_v26 = vld [vmem:[%s3939_s11 + $0xa0] sm:$0xf0] }
  0x67   : > { %2456 = vmatpush.bf16.msra.mxu3 %v4168_v14  ;;  %v3261_v14 = vor.u32 %v3526_v29, %v3258_v34  ;;  %v3357_v38 = vor.u32 %v3550_v20, %v3354_v36  ;;  %v3563_v29 = vld [vmem:[%s3939_s11 + $0x158] sm:$0xf0]  ;;  %v3309_v34 = vor.u32 %v3538_v35, %v3306_v11 }
  0x69   : > { %1607 = vmatpush.bf16.msra.mxu1 %v4209_v48  ;;  %2408 = vmatpush.bf16.msra.mxu2 %v3952_v6  ;;  %v3265_v6 = vor.u32 %v3528_v54, %v3264_v57  ;;  %v3313_v57 = vor.u32 %v3540_v26, %v3312_v16 }
  0x6a   : > { %2506 = vmatpush.bf16.msra.mxu0 %v4209_v48  ;;  %v3020_v48 = vld [vmem:[%s3827_s27 + $0x138] sm:$0xff] }
  0x6b   : > { %2457 = vmatpush.bf16.msra.mxu3 %v4207_v44  ;;  %3046 = vperm.xlu2 %3628, %v3016_v45   ;;  %v3270_v44 = vld [vmem:[%s3939_s11 + $0x54] sm:$0xf0]  ;;  %v3400_v45 = vld [vmem:[%s3939_s11 + $0x150] sm:$0xf] }
  0x6c   : > { %3036 = vperm.xlu0 %3627, %v3014_v30   ;;  %v3401_v30 = vor.u32 %v3563_v29, %v3400_v45  ;;  %v3348_v45 = vld [vmem:[%s3939_s11 + $0xe0] sm:$0xf]  ;;  %v3549_v29 = vld [vmem:[%s3939_s11 + $0xe8] sm:$0xf0] }
  0x6d   : > { %1608 = vmatpush.bf16.msra.mxu1 %v4217_v52  ;;  %2409 = vmatpush.bf16.msra.mxu2 %v3986_v27  ;;  %v3019_v27 = vld [vmem:[%s3827_s27 + $0x130] sm:$0xff]  ;;  %v4398_v16 = vpop.permute.xlu2 %1243 }
  0x6e   : > { %3041 = vperm.xlu1 %3626, %v3015_v32   ;;  %2507 = vmatpush.bf16.msra.mxu0 %v4217_v52  ;;  %v3273_v52 = vor.u32 %v3529_v43, %v3270_v44  ;;  %v3412_v43 = vld [vmem:[%s3939_s11 + $0x168] sm:$0xf]  ;;  %v3566_v44 = vld [vmem:[%s3939_s11 + $0x170] sm:$0xf0] }
  0x6f   : > { %2458 = vmatpush.bf16.msra.mxu3 %v4214_v51  ;;  %v3021_v51 = vld [vmem:[%s3827_s27 + $0x140] sm:$0xff] }
  0x70   : > { %670 = vmatmul.bf16.gmra.mxu1 %v3261_v14  ;;  %719 = vmatmul.bf16.gmra.mxu2 %v3265_v6  ;;  %v3405_v14 = vor.u32 %v3562_v31, %v3402_v62  ;;  %v3571_v62 = vld [vmem:[%s3939_s11 + $0x19c] sm:$0xf] }
  0x72   : > { %1521 = vmatmul.bf16.gmra.mxu3 %v3353_v33 }
  0x73   : > { %3061 = vperm.xlu2 %3628, %v3019_v27   ;;  %v3541_v27 = vld [vmem:[%s3939_s11 + $0xac] sm:$0xf] }
  0x74   : > { %3051 = vperm.xlu0 %3627, %v3017_v37   ;;  %1570 = vmatmul.bf16.gmra.mxu0 %v3357_v38  ;;  %v3318_v37 = vld [vmem:[%s3939_s11 + $0xb4] sm:$0xf0]  ;;  %v3324_v38 = vld [vmem:[%s3939_s11 + $0xb0] sm:$0xf] }
  0x76   : > { %3056 = vperm.xlu1 %3626, %v3018_v41   ;;  %v3543_v41 = vld [vmem:[%s3939_s11 + $0xb8] sm:$0xf0] }
  0x77   : > { %v3325_v49 = vor.u32 %v3543_v41, %v3324_v38  ;;  %v3349_v41 = vor.u32 %v3549_v29, %v3348_v45 }
  0x7b   : > { %3076 = vperm.xlu2 %3628, %v3022_v42  }
  0x7c   : > { %3066 = vperm.xlu0 %3627, %v3020_v48   ;;  %v3321_v48 = vor.u32 %v3541_v27, %v3318_v37 }
  0x7e   : > { %3071 = vperm.xlu1 %3626, %v3021_v51   ;;  %v3413_v51 = vor.u32 %v3566_v44, %v3412_v43 }
  0x80   : > { %675 = vmatmul.bf16.gmra.mxu1 %v3273_v52  ;;  %724 = vmatmul.bf16.gmra.mxu2 %v3277_v53  ;;  %v3565_v52 = vld [vmem:[%s3939_s11 + $0x16c] sm:$0xf]  ;;  %v3414_v53 = vld [vmem:[%s3939_s11 + $0x174] sm:$0xf0] }
  0x81   : > { %v3417_v59 = vor.u32 %v3565_v52, %v3414_v53  ;;  %v3573_v53 = vld [vmem:[%s3939_s11 + $0x1a8] sm:$0xf0] }
  0x82   : > { %1526 = vmatmul.bf16.gmra.mxu3 %v3365_v56 }
  0x83   : > { %3091 = vperm.xlu2 %3628, %v3025_v60  }
  0x84   : > { %3081 = vperm.xlu0 %3627, %v3023_v63   ;;  %1575 = vmatmul.bf16.gmra.mxu0 %v3369_v0 }
  0x85   : > { %v4346_v36 = vpop.permute.xlu0 %1238 }
  0x86   : > { %3086 = vperm.xlu1 %3626, %v3024_v1   ;;  %v4372_v1 = vpop.permute.xlu1 %1233 }
  0x8d   : > { %v4362_v56 = vpop.permute.xlu0 %1253 }
  0x8e   : > { %5921 = vst [vmem:[#allocation2_spill] sm:$0xff] %v4362_v56  ;;  %v4390_v21 = vpop.permute.xlu1 %1248 }
  0x90   : > { %680 = vmatmul.bf16.gmra.mxu1 %v3285_v9  ;;  %729 = vmatmul.bf16.gmra.mxu2 %v3289_v10  ;;  %v3568_v9 = vld [vmem:[%s3939_s11 + $0x184] sm:$0xf]  ;;  %v3426_v10 = vld [vmem:[%s3939_s11 + $0x18c] sm:$0xf0] }
  0x91   : > { %v3429_v15 = vor.u32 %v3568_v9, %v3426_v10 }
  0x92   : > { %1531 = vmatmul.bf16.gmra.mxu3 %v3377_v12 }
  0x94   : > { %1580 = vmatmul.bf16.gmra.mxu0 %v3381_v39  ;;  %v3425_v39 = vor.u32 %v3569_v5, %v3424_v4 }
  0x95   : > { %v4378_v7 = vpop.permute.xlu0 %1268 }
  0x9d   : > { %v4392_v61 = vpop.permute.xlu0 %1283 }
  0x9e   : > { %5922 = vst [vmem:[#allocation3_spill] sm:$0xff] %v4392_v61 }
  0xa0   : > { %685 = vmatmul.bf16.gmra.mxu1 %v3297_v23  ;;  %734 = vmatmul.bf16.gmra.mxu2 %v3301_v28  ;;  %v3433_v23 = vor.u32 %v3570_v40, %v3432_v19  ;;  %v3360_v19 = vld [vmem:[%s3939_s11 + $0xf8] sm:$0xf]  ;;  %v3552_v40 = vld [vmem:[%s3939_s11 + $0x100] sm:$0xf0] }
  0xa2   : > { %1536 = vmatmul.bf16.gmra.mxu3 %v3389_v55 }
  0xa4   : > { %1585 = vmatmul.bf16.gmra.mxu0 %v3393_v25 }
  0xad   : > { %v4336_v54 = vpop.f32.mrf.mxu1 }
  0xb0   : > { %690 = vmatmul.bf16.gmra.mxu1 %v3309_v34  ;;  %739 = vmatmul.bf16.gmra.mxu2 %v3313_v57  ;;  %v3436_v34 = vld [vmem:[%s3939_s11 + $0x198] sm:$0xf]  ;;  %v3572_v57 = vld [vmem:[%s3939_s11 + $0x1a0] sm:$0xf0] }
  0xb1   : > { %v612_v32 = vpop.f32.mrf.mxu0  ;;  %v3437_v43 = vor.u32 %v3572_v57, %v3436_v34  ;;  %v3361_v57 = vor.u32 %v3552_v40, %v3360_v19  ;;  %v3460_v19 = vld [vmem:[%s3939_s11 + $0x1c8] sm:$0xf]  ;;  %v3578_v40 = vld [vmem:[%s3939_s11 + $0x1d0] sm:$0xf0] }
  0xb2   : > { %1541 = vmatmul.bf16.gmra.mxu3 %v3401_v30  ;;  %v4406_v30 = vpop.permute.xlu1 %1263 }
  0xb3   : > { %v4340_v6 = vpop.f32.mrf.mxu2  ;;  %5923 = vst [vmem:[#allocation4_spill] sm:$0xff] %v4406_v30 }
  0xb4   : > { %1590 = vmatmul.bf16.gmra.mxu0 %v3405_v14 }
  0xb5   : > { %v4342_v33 = vpop.f32.mrf.mxu3  ;;  %v4344_v20 = vpop.f32.mrf.mxu1 }
  0xb9   : > { %v614_v42 = vpop.f32.mrf.mxu0 }
  0xba   : > { %v4423_v9 = vpop.permute.xlu1 %1278 }
  0xbb   : > { %v4354_v46 = vpop.f32.mrf.mxu2  ;;  %5925 = vst [vmem:[#allocation6_spill] sm:$0xff] %v4423_v9 }
  0xbd   : > { %v4356_v47 = vpop.f32.mrf.mxu3  ;;  %v4358_v50 = vpop.f32.mrf.mxu1 }
  0xc0   : > { %695 = vmatmul.bf16.gmra.mxu1 %v3321_v48  ;;  %744 = vmatmul.bf16.gmra.mxu2 %v3325_v49 }
  0xc1   : > { %v4364_v58 = vpop.f32.mrf.mxu0 }
  0xc2   : > { %1546 = vmatmul.bf16.gmra.mxu3 %v3413_v51  ;;  %v4414_v51 = vpop.permute.xlu0 %1298 }
  0xc3   : > { %v4366_v60 = vpop.f32.mrf.mxu2  ;;  %5924 = vst [vmem:[#allocation5_spill] sm:$0xff] %v4414_v51 }
  0xc4   : > { %1595 = vmatmul.bf16.gmra.mxu0 %v3417_v59  ;;  %v4420_v59 = vpop.permute.xlu2 %1258 }
  0xc5   : > { %v4368_v63 = vpop.f32.mrf.mxu3  ;;  %v4370_v0 = vpop.f32.mrf.mxu1 }
  0xc9   : > { %v4380_v8 = vpop.f32.mrf.mxu0 }
  0xcb   : > { %v4384_v12 = vpop.f32.mrf.mxu2 }
  0xcd   : > { %v4386_v13 = vpop.f32.mrf.mxu3  ;;  %v661_v18 = vpop.f32.mrf.mxu1 }
  0xce   : > { %v662_v22 = vadd.f32 %v661_v18, %v612_v32  ;;  %v3438_v32 = vld [vmem:[%s3939_s11 + $0x1a4] sm:$0xf0] }
  0xcf   : > { %v3441_v49 = vor.u32 %v3571_v62, %v3438_v32 }
  0xd0   : > { %1609 = vmatmul.bf16.vlgmr.msra.gmra.mxu1 %v3337_v17  ;;  %2410 = vmatmul.bf16.vlgmr.msra.gmra.mxu2 %v3425_v39 }
  0xd1   : > { %v1561_v55 = vpop.f32.mrf.mxu0 }
  0xd2   : > { %2459 = vmatmul.bf16.vlgmr.msra.gmra.mxu3 %v3429_v15 }
  0xd3   : > { %v710_v28 = vpop.f32.mrf.mxu2 }
  0xd4   : > { %v4394_v24 = vadd.f32 %v710_v28, %v662_v22  ;;  %2508 = vmatmul.bf16.vlgmr.msra.gmra.mxu0 %v3433_v23  ;;  %v3448_v22 = vld [vmem:[%s3939_s11 + $0x1b0] sm:$0xf]  ;;  %v3575_v23 = vld [vmem:[%s3939_s11 + $0x1b8] sm:$0xf0]  ;;  %v4437_v28 = vpop.permute.xlu2 %1273 }
  0xd5   : > { %v1512_v25 = vpop.f32.mrf.mxu3  ;;  %v663_v11 = vpop.f32.mrf.mxu1 }
  0xd6   : > { %v4396_v35 = vadd.f32 %v1561_v55, %v1512_v25  ;;  %v751_v26 = vsel %vm750_vm0, %v4394_v24, 0.0  ;;  %v664_v31 = vadd.f32 %v663_v11, %v614_v42  ;;  %v3444_v42 = vld [vmem:[%s3939_s11 + $0x1a0] sm:$0xf]  ;;  %v3574_v25 = vld [vmem:[%s3939_s11 + $0x1b4] sm:$0xf] }
  0xd7   : > { %752 = vadd.xlane.f32.xlu0 %v751_v26  ;;  %v3445_v3 = vor.u32 %v3573_v53, %v3444_v42  ;;  %v3450_v11 = vld [vmem:[%s3939_s11 + $0x1bc] sm:$0xf0] }
  0xd9   : > { %v1563_v27 = vpop.f32.mrf.mxu0 }
  0xdb   : > { %v712_v14 = vpop.f32.mrf.mxu2 }
  0xdc   : > { %v4410_v37 = vadd.f32 %v712_v14, %v664_v31  ;;  %v3449_v31 = vor.u32 %v3575_v23, %v3448_v22  ;;  %v3453_v14 = vor.u32 %v3574_v25, %v3450_v11  ;;  %v4455_v53 = vpop.permute.xlu2 %1288  ;;  %v3577_v23 = vld [vmem:[%s3939_s11 + $0x1cc] sm:$0xf] }
  0xdd   : > { %v1514_v38 = vpop.f32.mrf.mxu3  ;;  %v666_v48 = vpop.f32.mrf.mxu1  ;;  %5929 = vst [vmem:[#allocation10_spill] sm:$0xff] %v4455_v53 }
  0xde   : > { %v4412_v44 = vadd.f32 %v1563_v27, %v1514_v38  ;;  %v754_v52 = vsel %vm750_vm0, %v4410_v37, 0.0  ;;  %v667_v2 = vadd.f32 %v666_v48, %v4364_v58  ;;  %v4431_v58 = vpop.permute.xlu0 %2132  ;;  %v4446_v27 = vpop.permute.xlu1 %1293 }
  0xdf   : > { %755 = vadd.xlane.f32.xlu0 %v754_v52  ;;  %5926 = vst [vmem:[#allocation7_spill] sm:$0xff] %v4431_v58 }
  0xe0   : > { %1614 = vmatmul.bf16.gmra.mxu1 %v3349_v41  ;;  %2415 = vmatmul.bf16.gmra.mxu2 %v3437_v43  ;;  %5927 = vst [vmem:[#allocation8_spill] sm:$0xff] %v4446_v27  ;;  %v3576_v41 = vld [vmem:[%s3939_s11 + $0x1c0] sm:$0xf0] }
  0xe1   : > { %v1566_v5 = vpop.f32.mrf.mxu0 }
  0xe2   : > { %2464 = vmatmul.bf16.gmra.mxu3 %v3441_v49 }
  0xe3   : > { %v715_v4 = vpop.f32.mrf.mxu2 }
  0xe4   : > { %v4425_v10 = vadd.f32 %v715_v4, %v667_v2  ;;  %2513 = vmatmul.bf16.gmra.mxu0 %v3445_v3 }
  0xe5   : > { %v1517_v17 = vpop.f32.mrf.mxu3  ;;  %v668_v18 = vpop.f32.mrf.mxu1 }
  0xe6   : > { %v4427_v39 = vadd.f32 %v1566_v5, %v1517_v17  ;;  %v757_v15 = vsel %vm750_vm0, %v4425_v10, 0.0  ;;  %v669_v55 = vadd.f32 %v668_v18, %v4380_v8  ;;  %v3456_v8 = vld [vmem:[%s3939_s11 + $0x1b8] sm:$0xf]  ;;  %v4452_v43 = vpop.permute.xlu0 %2147  ;;  %v3372_v18 = vld [vmem:[%s3939_s11 + $0x110] sm:$0xf] }
  0xe7   : > { %758 = vadd.xlane.f32.xlu1 %v757_v15  ;;  %5928 = vst [vmem:[#allocation9_spill] sm:$0xff] %v4452_v43  ;;  %v3457_v49 = vor.u32 %v3576_v41, %v3456_v8  ;;  %v3555_v15 = vld [vmem:[%s3939_s11 + $0x118] sm:$0xf0]  ;;  %v4478_v8 = vpop.permute.xlu2 %1303  ;;  %v3468_v41 = vld [vmem:[%s3939_s11 + $0x1d0] sm:$0xf] }
  0xe8   : > { %5932 = vst [vmem:[#allocation13_spill] sm:$0xff] %v4478_v8 }
  0xe9   : > { %v1568_v45 = vpop.f32.mrf.mxu0 }
  0xeb   : > { %v717_v26 = vpop.f32.mrf.mxu2 }
  0xec   : > { %v4442_v29 = vadd.f32 %v717_v26, %v669_v55  ;;  %v3462_v55 = vld [vmem:[%s3939_s11 + $0x1d4] sm:$0xf0] }
  0xed   : > { %v1519_v34 = vpop.f32.mrf.mxu3  ;;  %v671_v32 = vpop.f32.mrf.mxu1 }
  0xee   : > { %v4444_v62 = vadd.f32 %v1568_v45, %v1519_v34  ;;  %v760_v38 = vsel %vm750_vm0, %v4442_v29, 0.0  ;;  %v672_v48 = vadd.f32 %v671_v32, %v4336_v54  ;;  %v4463_v54 = vpop.permute.xlu1 %1308  ;;  %v4472_v26 = vpop.permute.xlu0 %2162 }
  0xef   : > { %761 = vadd.xlane.f32.xlu1 %v760_v38  ;;  %5930 = vst [vmem:[#allocation11_spill] sm:$0xff] %v4463_v54  ;;  %v3465_v38 = vor.u32 %v3577_v23, %v3462_v55  ;;  %v3384_v23 = vld [vmem:[%s3939_s11 + $0x128] sm:$0xf]  ;;  %v3558_v55 = vld [vmem:[%s3939_s11 + $0x130] sm:$0xf0] }
  0xf0   : > { %1619 = vmatmul.bf16.gmra.mxu1 %v3361_v57  ;;  %2420 = vmatmul.bf16.gmra.mxu2 %v3449_v31  ;;  %5931 = vst [vmem:[#allocation12_spill] sm:$0xff] %v4472_v26  ;;  %v3373_v57 = vor.u32 %v3555_v15, %v3372_v18  ;;  %v3461_v31 = vor.u32 %v3578_v40, %v3460_v19 }
  0xf1   : > { %v1571_v42 = vpop.f32.mrf.mxu0 }
  0xf2   : > { %2469 = vmatmul.bf16.gmra.mxu3 %v3453_v14 }
  0xf3   : > { %v720_v52 = vpop.f32.mrf.mxu2 }
  0xf4   : > { %v4457_v2 = vadd.f32 %v720_v52, %v672_v48  ;;  %2518 = vmatmul.bf16.gmra.mxu0 %v3457_v49  ;;  %v3579_v48 = vld [vmem:[%s3939_s11 + $0x1d8] sm:$0xf0] }
  0xf5   : > { %v1522_v3 = vpop.f32.mrf.mxu3  ;;  %v673_v5 = vpop.f32.mrf.mxu1 }
  0xf6   : > { %v4459_v4 = vadd.f32 %v1571_v42, %v1522_v3  ;;  %v763_v17 = vsel %vm750_vm0, %v4457_v2, 0.0  ;;  %v674_v22 = vadd.f32 %v673_v5, %v4344_v20  ;;  %v4484_v49 = vpop.permute.xlu1 %2142  ;;  %v3469_v42 = vor.u32 %v3579_v48, %v3468_v41  ;;  %v4491_v40 = vpop.permute.xlu0 %2177 }
  0xf7   : > { %764 = vadd.xlane.f32.xlu2 %v763_v17  ;;  %5933 = vst [vmem:[#allocation14_spill] sm:$0xff] %v4484_v49 }
  0xf8   : > { %5934 = vst [vmem:[#allocation15_spill] sm:$0xff] %v4491_v40 }
  0xf9   : > { %v1573_v11 = vpop.f32.mrf.mxu0 }
  0xfb   : > { %v722_v25 = vpop.f32.mrf.mxu2 }
  0xfc   : > { %v4474_v45 = vadd.f32 %v722_v25, %v674_v22  ;;  %v3472_v25 = vld [vmem:[%s3939_s11 + $0x1e0] sm:$0xf] }
  0xfd   : > { %v1524_v34 = vpop.f32.mrf.mxu3  ;;  %v676_v14 = vpop.f32.mrf.mxu1 }
  0xfe   : > { %v4476_v32 = vadd.f32 %v1573_v11, %v1524_v34  ;;  %v766_v20 = vsel %vm750_vm0, %v4474_v45, 0.0  ;;  %v677_v52 = vadd.f32 %v676_v14, %v4358_v50  ;;  %v4495_v50 = vpop.permute.xlu2 %2137  ;;  %v3581_v11 = vld [vmem:[%s3939_s11 + $0x1e8] sm:$0xf0] }
  0xff   : > { %767 = vadd.xlane.f32.xlu2 %v766_v20  ;;  %5935 = vst [vmem:[#allocation16_spill] sm:$0xff] %v4495_v50  ;;  %v4504_v20 = vpop.permute.xlu1 %2157  ;;  %v4514_v50 = vpop.permute.xlu0 %2192 }
 0x100   : > { %1624 = vmatmul.bf16.gmra.mxu1 %v3373_v57  ;;  %2425 = vmatmul.bf16.gmra.mxu2 %v3461_v31  ;;  %v3580_v57 = vld [vmem:[%s3939_s11 + $0x1e4] sm:$0xf]  ;;  %v3474_v31 = vld [vmem:[%s3939_s11 + $0x1ec] sm:$0xf0]  ;;  %5936 = vst [vmem:[#allocation17_spill] sm:$0xff] %v4504_v20 }
 0x101   : > { %v1576_v5 = vpop.f32.mrf.mxu0  ;;  %5937 = vst [vmem:[#allocation18_spill] sm:$0xff] %v4514_v50 }
 0x102   : > { %2474 = vmatmul.bf16.gmra.mxu3 %v3465_v38 }
 0x103   : > { %v725_v3 = vpop.f32.mrf.mxu2 }
 0x104   : > { %v4487_v17 = vadd.f32 %v725_v3, %v677_v52  ;;  %2523 = vmatmul.bf16.gmra.mxu0 %v3469_v42  ;;  %v3385_v52 = vor.u32 %v3558_v55, %v3384_v23  ;;  %v3473_v42 = vor.u32 %v3581_v11, %v3472_v25 }
 0x105   : > { %v1527_v18 = vpop.f32.mrf.mxu3  ;;  %v678_v19 = vpop.f32.mrf.mxu1 }
 0x106   : > { %v4489_v15 = vadd.f32 %v1576_v5, %v1527_v18  ;;  %v769_v22 = vsel %vm750_vm0, %v4487_v17, 0.0  ;;  %v679_v34 = vadd.f32 %v678_v19, %v4370_v0  ;;  %v3477_v18 = vor.u32 %v3580_v57, %v3474_v31  ;;  %v3480_v0 = vld [vmem:[%s3939_s11 + $0x1e8] sm:$0xf]  ;;  %v3582_v19 = vld [vmem:[%s3939_s11 + $0x1f0] sm:$0xf0]  ;;  %v4516_v23 = vpop.permute.xlu2 %2152 }
 0x107   : > { %770 = vadd.xlane.f32.xlu0 %v769_v22  ;;  %5938 = vst [vmem:[#allocation19_spill] sm:$0xff] %v4516_v23  ;;  %v3481_v25 = vor.u32 %v3582_v19, %v3480_v0  ;;  %v3583_v19 = vld [vmem:[%s3939_s11 + $0x1fc] sm:$0xf] }
 0x109   : > { %v1578_v38 = vpop.f32.mrf.mxu0 }
 0x10b   : > { %v727_v14 = vpop.f32.mrf.mxu2 }
 0x10c   : > { %v4506_v41 = vadd.f32 %v727_v14, %v679_v34 }
 0x10d   : > { %v1529_v48 = vpop.f32.mrf.mxu3  ;;  %v681_v5 = vpop.f32.mrf.mxu1 }
 0x10e   : > { %v4508_v3 = vadd.f32 %v1578_v38, %v1529_v48  ;;  %v772_v22 = vsel %vm750_vm0, %v4506_v41, 0.0  ;;  %v682_v55 = vadd.f32 %v681_v5, %v4340_v6  ;;  %v4523_v48 = vpop.permute.xlu1 %2172  ;;  %v3561_v6 = vld [vmem:[%s3939_s11 + $0x148] sm:$0xf0]  ;;  %v3484_v5 = vld [vmem:[%s3939_s11 + $0x1f8] sm:$0xf] }
 0x10f   : > { %773 = vadd.xlane.f32.xlu1 %v772_v22  ;;  %5939 = vst [vmem:[#allocation20_spill] sm:$0xff] %v4523_v48  ;;  %v4531_v22 = vpop.permute.xlu0 %2207 }
 0x110   : > { %1629 = vmatmul.bf16.gmra.mxu1 %v3385_v52  ;;  %2430 = vmatmul.bf16.gmra.mxu2 %v3473_v42  ;;  %v3396_v42 = vld [vmem:[%s3939_s11 + $0x140] sm:$0xf]  ;;  %5940 = vst [vmem:[#allocation21_spill] sm:$0xff] %v4531_v22 }
 0x111   : > { %v1581_v34 = vpop.f32.mrf.mxu0 }
 0x112   : > { %2479 = vmatmul.bf16.gmra.mxu3 %v3477_v18  ;;  %v3584_v18 = vld [vmem:[%s3939_s11 + $0x200] sm:$0xf0] }
 0x113   : > { %v730_v11 = vpop.f32.mrf.mxu2  ;;  %v3485_v20 = vor.u32 %v3584_v18, %v3484_v5 }
 0x114   : > { %v4519_v57 = vadd.f32 %v730_v11, %v682_v55  ;;  %2528 = vmatmul.bf16.gmra.mxu0 %v3481_v25  ;;  %v3486_v55 = vld [vmem:[%s3939_s11 + $0x204] sm:$0xf0] }
 0x115   : > { %v1532_v31 = vpop.f32.mrf.mxu3  ;;  %v683_v38 = vpop.f32.mrf.mxu1  ;;  %v3489_v40 = vor.u32 %v3583_v19, %v3486_v55 }
 0x116   : > { %v4521_v14 = vadd.f32 %v1581_v34, %v1532_v31  ;;  %v775_v52 = vsel %vm750_vm0, %v4519_v57, 0.0  ;;  %v684_v0 = vadd.f32 %v683_v38, %v4354_v46  ;;  %v4536_v31 = vpop.permute.xlu2 %2167  ;;  %v3492_v46 = vld [vmem:[%s3939_s11 + $0x200] sm:$0xf]  ;;  %v3585_v38 = vld [vmem:[%s3939_s11 + $0x208] sm:$0xf0]  ;;  %v4546_v26 = vpop.permute.xlu1 %2187 }
 0x117   : > { %776 = vadd.xlane.f32.xlu2 %v775_v52  ;;  %5941 = vst [vmem:[#allocation22_spill] sm:$0xff] %v4536_v31  ;;  %v3397_v52 = vor.u32 %v3561_v6, %v3396_v42  ;;  %v3493_v6 = vor.u32 %v3585_v38, %v3492_v46  ;;  %v3586_v38 = vld [vmem:[%s3939_s11 + $0x214] sm:$0xf] }
 0x118   : > { %5942 = vst [vmem:[#allocation23_spill] sm:$0xff] %v4546_v26 }
 0x119   : > { %v1583_v34 = vpop.f32.mrf.mxu0 }
 0x11b   : > { %v732_v11 = vpop.f32.mrf.mxu2 }
 0x11c   : > { %v4538_v48 = vadd.f32 %v732_v11, %v684_v0  ;;  %v4549_v0 = vpop.permute.xlu0 %3036 }
 0x11d   : > { %v1534_v25 = vpop.f32.mrf.mxu3  ;;  %v686_v50 = vpop.f32.mrf.mxu1  ;;  %5943 = vst [vmem:[#allocation24_spill] sm:$0xff] %v4549_v0 }
 0x11e   : > { %v4540_v54 = vadd.f32 %v1583_v34, %v1534_v25  ;;  %v778_v22 = vsel %vm750_vm0, %v4538_v48, 0.0  ;;  %v687_v42 = vadd.f32 %v686_v50, %v4366_v60  ;;  %v3408_v60 = vld [vmem:[%s3939_s11 + $0x158] sm:$0xf]  ;;  %v3564_v50 = vld [vmem:[%s3939_s11 + $0x160] sm:$0xf0] }
 0x11f   : > { %779 = vadd.xlane.f32.xlu0 %v778_v22  ;;  %v3496_v34 = vld [vmem:[%s3939_s11 + $0x210] sm:$0xf]  ;;  %v3587_v25 = vld [vmem:[%s3939_s11 + $0x218] sm:$0xf0]  ;;  %v3409_v0 = vor.u32 %v3564_v50, %v3408_v60 }
 0x120   : > { %1634 = vmatmul.bf16.gmra.mxu1 %v3397_v52  ;;  %2435 = vmatmul.bf16.gmra.mxu2 %v3485_v20  ;;  %v4555_v20 = vpop.permute.xlu2 %2182  ;;  %v4563_v52 = vpop.permute.xlu1 %2202 }
 0x121   : > { %v1586_v18 = vpop.f32.mrf.mxu0  ;;  %5944 = vst [vmem:[#allocation25_spill] sm:$0xff] %v4555_v20 }
 0x122   : > { %2484 = vmatmul.bf16.gmra.mxu3 %v3489_v40  ;;  %5945 = vst [vmem:[#allocation26_spill] sm:$0xff] %v4563_v52 }
 0x123   : > { %v735_v5 = vpop.f32.mrf.mxu2 }
 0x124   : > { %v4551_v22 = vadd.f32 %v735_v5, %v687_v42  ;;  %2533 = vmatmul.bf16.gmra.mxu0 %v3493_v6  ;;  %v3498_v42 = vld [vmem:[%s3939_s11 + $0x21c] sm:$0xf0]  ;;  %v3497_v6 = vor.u32 %v3587_v25, %v3496_v34  ;;  %v4572_v43 = vpop.permute.xlu0 %3051 }
 0x125   : > { %v1537_v19 = vpop.f32.mrf.mxu3  ;;  %v688_v11 = vpop.f32.mrf.mxu1  ;;  %v3501_v27 = vor.u32 %v3586_v38, %v3498_v42  ;;  %5946 = vst [vmem:[#allocation27_spill] sm:$0xff] %v4572_v43  ;;  %v3567_v42 = vld [vmem:[%s3939_s11 + $0x178] sm:$0xf0] }
 0x126   : > { %v4553_v55 = vadd.f32 %v1586_v18, %v1537_v19  ;;  %v781_v40 = vsel %vm750_vm0, %v4551_v22, 0.0  ;;  %v689_v46 = vadd.f32 %v688_v11, %v4384_v12  ;;  %v3504_v12 = vld [vmem:[%s3939_s11 + $0x218] sm:$0xf]  ;;  %v3588_v11 = vld [vmem:[%s3939_s11 + $0x220] sm:$0xf0] }
 0x127   : > { %782 = vadd.xlane.f32.xlu1 %v781_v40  ;;  %v3505_v60 = vor.u32 %v3588_v11, %v3504_v12  ;;  %v3589_v11 = vld [vmem:[%s3939_s11 + $0x22c] sm:$0xf] }
 0x128   : > { %v4578_v58 = vpop.permute.xlu2 %2197  ;;  %v4581_v25 = vpop.permute.xlu1 %3041 }
 0x129   : > { %v1588_v18 = vpop.f32.mrf.mxu0  ;;  %5947 = vst [vmem:[#allocation28_spill] sm:$0xff] %v4578_v58 }
 0x12a   : > { %5948 = vst [vmem:[#allocation29_spill] sm:$0xff] %v4581_v25 }
 0x12b   : > { %v737_v5 = vpop.f32.mrf.mxu2 }
 0x12c   : > { %v4568_v19 = vadd.f32 %v737_v5, %v689_v46  ;;  %v3508_v5 = vld [vmem:[%s3939_s11 + $0x228] sm:$0xf] }
 0x12d   : > { %v1539_v26 = vpop.f32.mrf.mxu3  ;;  %v691_v20 = vpop.f32.mrf.mxu1 }
 0x12e   : > { %v4570_v40 = vadd.f32 %v1588_v18, %v1539_v26  ;;  %v784_v52 = vsel %vm750_vm0, %v4568_v19, 0.0  ;;  %v692_v26 = vadd.f32 %v691_v20, %v4342_v33  ;;  %v4589_v33 = vpop.permute.xlu0 %3066  ;;  %v3420_v20 = vld [vmem:[%s3939_s11 + $0x170] sm:$0xf]  ;;  %v3590_v18 = vld [vmem:[%s3939_s11 + $0x230] sm:$0xf0] }
 0x12f   : > { %785 = vadd.xlane.f32.xlu2 %v784_v52  ;;  %5949 = vst [vmem:[#allocation30_spill] sm:$0xff] %v4589_v33  ;;  %v3509_v58 = vor.u32 %v3590_v18, %v3508_v5 }
 0x130   : > { %1639 = vmatmul.bf16.gmra.mxu1 %v3409_v0  ;;  %2440 = vmatmul.bf16.gmra.mxu2 %v3497_v6  ;;  %v4595_v6 = vpop.permute.xlu2 %3031  ;;  %v4604_v31 = vpop.permute.xlu1 %3056 }
 0x131   : > { %v1591_v34 = vpop.f32.mrf.mxu0  ;;  %5950 = vst [vmem:[#allocation31_spill] sm:$0xff] %v4595_v6 }
 0x132   : > { %2489 = vmatmul.bf16.gmra.mxu3 %v3501_v27  ;;  %5951 = vst [vmem:[#allocation32_spill] sm:$0xff] %v4604_v31 }
 0x133   : > { %v740_v50 = vpop.f32.mrf.mxu2 }
 0x134   : > { %v4583_v52 = vadd.f32 %v740_v50, %v692_v26  ;;  %2538 = vmatmul.bf16.gmra.mxu0 %v3505_v60  ;;  %v3510_v26 = vld [vmem:[%s3939_s11 + $0x234] sm:$0xf0] }
 0x135   : > { %v1542_v46 = vpop.f32.mrf.mxu3  ;;  %v693_v0 = vpop.f32.mrf.mxu1  ;;  %v3513_v25 = vor.u32 %v3589_v11, %v3510_v26 }
 0x136   : > { %v4585_v38 = vadd.f32 %v1591_v34, %v1542_v46  ;;  %v787_v27 = vsel %vm750_vm0, %v4583_v52, 0.0  ;;  %v694_v12 = vadd.f32 %v693_v0, %v4356_v47  ;;  %v3516_v47 = vld [vmem:[%s3939_s11 + $0x230] sm:$0xf]  ;;  %v3591_v0 = vld [vmem:[%s3939_s11 + $0x238] sm:$0xf0] }
 0x137   : > { %788 = vadd.xlane.f32.xlu0 %v787_v27  ;;  %v3421_v27 = vor.u32 %v3567_v42, %v3420_v20  ;;  %v3517_v42 = vor.u32 %v3591_v0, %v3516_v47 }
 0x139   : > { %v1593_v34 = vpop.f32.mrf.mxu0 }
 0x13b   : > { %v742_v50 = vpop.f32.mrf.mxu2 }
 0x13c   : > { %v4600_v46 = vadd.f32 %v742_v50, %v694_v12  ;;  %v4610_v12 = vpop.permute.xlu0 %3081  ;;  %v4613_v50 = vpop.permute.xlu2 %3046 }
 0x13d   : > { %v1544_v60 = vpop.f32.mrf.mxu3  ;;  %v696_v43 = vpop.f32.mrf.mxu1  ;;  %5952 = vst [vmem:[#allocation33_spill] sm:$0xff] %v4610_v12 }
 0x13e   : > { %v4602_v33 = vadd.f32 %v1593_v34, %v1544_v60  ;;  %v790_v9 = vsel %vm750_vm0, %v4600_v46, 0.0  ;;  %v697_v20 = vadd.f32 %v696_v43, %v4368_v63  ;;  %5953 = vst [vmem:[#allocation34_spill] sm:$0xff] %v4613_v50 }
 0x13f   : > { %791 = vadd.xlane.f32.xlu1 %v790_v9 }
 0x140   : > { %1644 = vmatmul.bf16.gmra.mxu1 %v3421_v27  ;;  %2445 = vmatmul.bf16.gmra.mxu2 %v3509_v58  ;;  %v4621_v58 = vpop.permute.xlu1 %3071 }
 0x141   : > { %v1596_v18 = vpop.f32.mrf.mxu0  ;;  %5954 = vst [vmem:[#allocation35_spill] sm:$0xff] %v4621_v58 }
 0x142   : > { %2494 = vmatmul.bf16.gmra.mxu3 %v3513_v25 }
 0x143   : > { %v745_v5 = vpop.f32.mrf.mxu2 }
 0x144   : > { %v4615_v11 = vadd.f32 %v745_v5, %v697_v20  ;;  %2543 = vmatmul.bf16.gmra.mxu0 %v3517_v42  ;;  %v4631_v12 = vpop.permute.xlu2 %3061 }
 0x145   : > { %v1547_v26 = vpop.f32.mrf.mxu3  ;;  %v698_v9 = vpop.f32.mrf.mxu1  ;;  %5955 = vst [vmem:[#allocation36_spill] sm:$0xff] %v4631_v12 }
 0x146   : > { %v4617_v34 = vadd.f32 %v1596_v18, %v1547_v26  ;;  %v793_v60 = vsel %vm750_vm0, %v4615_v11, 0.0  ;;  %v699_v63 = vadd.f32 %v698_v9, %v4386_v13 }
 0x147   : > { %794 = vadd.xlane.f32.xlu2 %v793_v60 }
 0x148   : > { %v4638_v60 = vpop.permute.xlu1 %3086 }
 0x149   : > { %v1598_v47 = vpop.f32.mrf.mxu0  ;;  %5956 = vst [vmem:[#allocation37_spill] sm:$0xff] %v4638_v60 }
 0x14a   : > { %v753_v43 = vpop.xlane.xlu0 %752 }
 0x14b   : > { %v799_v25 = vmul.f32 0.020408163, %v753_v43  ;;  %v747_v27 = vpop.f32.mrf.mxu2 }
 0x14c   : > { %v4624_v0 = vadd.f32 %v747_v27, %v699_v63  ;;  %v4648_v58 = vpop.permute.xlu2 %3076 }
 0x14d   : > { %v1549_v20 = vpop.f32.mrf.mxu3  ;;  %v4627_v5 = vsub.f32 %v4394_v24, %v799_v25  ;;  %v1610_v26 = vpop.f32.mrf.mxu1  ;;  %5957 = vst [vmem:[#allocation38_spill] sm:$0xff] %v4648_v58 }
 0x14e   : > { %v4629_v18 = vadd.f32 %v1598_v47, %v1549_v20  ;;  %v796_v42 = vsel %vm750_vm0, %v4624_v0, 0.0  ;;  %v4641_v63 = vadd.f32 %v1610_v26, %v4396_v35 }
 0x14f   : > { %797 = vadd.xlane.f32.xlu0 %v796_v42  ;;  %v831_v13 = vmul.f32 %v4627_v5, %v4627_v5 }
 0x150   : > { %v1650_v42 = vsel %vm750_vm0, %v4641_v63, 0.0 }
 0x151   : > { %v847_v9 = vsel %vm750_vm0, %v831_v13, 0.0  ;;  %v2509_v43 = vpop.f32.mrf.mxu0 }
 0x152   : > { %848 = vadd.xlane.f32.xlu1 %v847_v9  ;;  %v756_v35 = vpop.xlane.xlu0 %755 }
 0x153   : > { %v2411_v24 = vpop.f32.mrf.mxu2 }
 0x155   : > { %v2460_v25 = vpop.f32.mrf.mxu3  ;;  %v1612_v27 = vpop.f32.mrf.mxu1 }
 0x156   : > { %v2461_v47 = vadd.f32 %v2460_v25, %v2411_v24  ;;  %v4644_v20 = vadd.f32 %v1612_v27, %v4412_v44  ;;  %v800_v25 = vmul.f32 0.020408163, %v756_v35 }
 0x157   : > { %1651 = vadd.xlane.f32.xlu0 %v1650_v42 }
 0x158   : > { %v1653_v13 = vsel %vm750_vm0, %v4644_v20, 0.0  ;;  %v4652_v26 = vadd.f32 %v2509_v43, %v2461_v47  ;;  %v4665_v47 = vsub.f32 %v4410_v37, %v800_v25 }
 0x159   : > { %1654 = vadd.xlane.f32.xlu2 %v1653_v13  ;;  %v2511_v24 = vpop.f32.mrf.mxu0 }
 0x15a   : > { %v759_v9 = vpop.xlane.xlu1 %758  ;;  %v2549_v58 = vsel %vm750_vm0, %v4652_v26, 0.0  ;;  %v832_v37 = vmul.f32 %v4665_v47, %v4665_v47 }
 0x15b   : > { %v801_v60 = vmul.f32 0.020408163, %v759_v9  ;;  %v2413_v12 = vpop.f32.mrf.mxu2 }
 0x15d   : > { %v2462_v44 = vpop.f32.mrf.mxu3  ;;  %v4655_v27 = vsub.f32 %v4425_v10, %v801_v60  ;;  %v1615_v31 = vpop.f32.mrf.mxu1 }
 0x15e   : > { %v4658_v42 = vadd.f32 %v1615_v31, %v4427_v39  ;;  %v2463_v13 = vadd.f32 %v2462_v44, %v2413_v12  ;;  %v4670_v60 = vpop.permute.xlu2 %3091 }
 0x15f   : > { %v833_v43 = vmul.f32 %v4655_v27, %v4655_v27  ;;  %5958 = vst [vmem:[#allocation39_spill] sm:$0xff] %v4670_v60 }
 0x160   : > { %v1656_v35 = vsel %vm750_vm0, %v4658_v42, 0.0  ;;  %v4672_v50 = vadd.f32 %v2511_v24, %v2463_v13 }
 0x161   : > { %2550 = vadd.xlane.f32.xlu2 %v2549_v58  ;;  %1657 = vadd.xlane.f32.xlu1 %v1656_v35  ;;  %v853_v10 = vsel %vm750_vm0, %v833_v43, 0.0  ;;  %v2514_v9 = vpop.f32.mrf.mxu0  ;;  %v850_v35 = vsel %vm750_vm0, %v832_v37, 0.0 }
 0x162   : > { %v762_v39 = vpop.xlane.xlu1 %761  ;;  %854 = vadd.xlane.f32.xlu0 %v853_v10  ;;  %v2552_v43 = vsel %vm750_vm0, %v4672_v50, 0.0 }
 0x163   : > { %v2416_v31 = vpop.f32.mrf.mxu2  ;;  %v802_v23 = vmul.f32 0.020408163, %v762_v39 }
 0x165   : > { %v2465_v51 = vpop.f32.mrf.mxu3  ;;  %v1617_v25 = vpop.f32.mrf.mxu1  ;;  %v4679_v58 = vsub.f32 %v4442_v29, %v802_v23 }
 0x166   : > { %v2466_v12 = vadd.f32 %v2465_v51, %v2416_v31  ;;  %v4687_v39 = vadd.f32 %v1617_v25, %v4444_v62 }
 0x167   : > { %v834_v29 = vmul.f32 %v4679_v58, %v4679_v58 }
 0x168   : > { %v4676_v44 = vadd.f32 %v2514_v9, %v2466_v12 }
 0x169   : > { %2553 = vadd.xlane.f32.xlu1 %v2552_v43  ;;  %851 = vadd.xlane.f32.xlu2 %v850_v35  ;;  %v2516_v51 = vpop.f32.mrf.mxu0  ;;  %v856_v12 = vsel %vm750_vm0, %v834_v29, 0.0  ;;  %v1659_v43 = vsel %vm750_vm0, %v4687_v39, 0.0 }
 0x16a   : > { %v2555_v24 = vsel %vm750_vm0, %v4676_v44, 0.0  ;;  %v765_v13 = vpop.xlane.xlu2 %764 }
 0x16b   : > { %2556 = vadd.xlane.f32.xlu0 %v2555_v24  ;;  %v2418_v10 = vpop.f32.mrf.mxu2  ;;  %v803_v49 = vmul.f32 0.020408163, %v765_v13 }
 0x16d   : > { %v2467_v31 = vpop.f32.mrf.mxu3  ;;  %v1620_v23 = vpop.f32.mrf.mxu1 }
 0x16e   : > { %v4692_v9 = vadd.f32 %v1620_v23, %v4459_v4  ;;  %v2468_v37 = vadd.f32 %v2467_v31, %v2418_v10 }
 0x170   : > { %v1662_v35 = vsel %vm750_vm0, %v4692_v9, 0.0  ;;  %v4699_v6 = vadd.f32 %v2516_v51, %v2468_v37 }
 0x171   : > { %857 = vadd.xlane.f32.xlu1 %v856_v12  ;;  %1660 = vadd.xlane.f32.xlu2 %v1659_v43  ;;  %v2519_v60 = vpop.f32.mrf.mxu0  ;;  %v4710_v43 = vsub.f32 %v4457_v2, %v803_v49 }
 0x172   : > { %v768_v62 = vpop.xlane.xlu2 %767  ;;  %v2558_v51 = vsel %vm750_vm0, %v4699_v6, 0.0 }
 0x173   : > { %1663 = vadd.xlane.f32.xlu0 %v1662_v35  ;;  %v804_v25 = vmul.f32 0.020408163, %v768_v62  ;;  %v2421_v24 = vpop.f32.mrf.mxu2  ;;  %5959 = vst [vmem:[#allocation40_spill] sm:$0xff] %v4710_v43  ;;  %v835_v2 = vmul.f32 %v4710_v43, %v4710_v43 }
 0x175   : > { %v2470_v4 = vpop.f32.mrf.mxu3  ;;  %v4702_v10 = vsub.f32 %v4474_v45, %v804_v25  ;;  %v1622_v31 = vpop.f32.mrf.mxu1 }
 0x176   : > { %v2471_v29 = vadd.f32 %v2470_v4, %v2421_v24  ;;  %v4705_v23 = vadd.f32 %v1622_v31, %v4476_v32 }
 0x177   : > { %v836_v12 = vmul.f32 %v4702_v10, %v4702_v10 }
 0x178   : > { %v1665_v13 = vsel %vm750_vm0, %v4705_v23, 0.0  ;;  %v4717_v37 = vadd.f32 %v2519_v60, %v2471_v29  ;;  %v859_v60 = vsel %vm750_vm0, %v835_v2, 0.0 }
 0x179   : > { %1666 = vadd.xlane.f32.xlu1 %v1665_v13  ;;  %2559 = vadd.xlane.f32.xlu2 %v2558_v51  ;;  %v862_v45 = vsel %vm750_vm0, %v836_v12, 0.0  ;;  %v2521_v62 = vpop.f32.mrf.mxu0 }
 0x17a   : > { %v771_v32 = vpop.xlane.xlu0 %770  ;;  %v2561_v31 = vsel %vm750_vm0, %v4717_v37, 0.0 }
 0x17b   : > { %863 = vadd.xlane.f32.xlu0 %v862_v45  ;;  %v2423_v35 = vpop.f32.mrf.mxu2  ;;  %v805_v25 = vmul.f32 0.020408163, %v771_v32 }
 0x17d   : > { %v2472_v24 = vpop.f32.mrf.mxu3  ;;  %v1625_v4 = vpop.f32.mrf.mxu1  ;;  %v4726_v12 = vsub.f32 %v4487_v17, %v805_v25 }
 0x17e   : > { %v2473_v49 = vadd.f32 %v2472_v24, %v2423_v35  ;;  %v4732_v32 = vadd.f32 %v1625_v4, %v4489_v15 }
 0x17f   : > { %5960 = vst [vmem:[#allocation41_spill] sm:$0xff] %v4726_v12 }
 0x180   : > { %v4723_v13 = vadd.f32 %v2521_v62, %v2473_v49  ;;  %v837_v62 = vmul.f32 %v4726_v12, %v4726_v12  ;;  %v1668_v2 = vsel %vm750_vm0, %v4732_v32, 0.0 }
 0x181   : > { %2562 = vadd.xlane.f32.xlu1 %v2561_v31  ;;  %860 = vadd.xlane.f32.xlu2 %v859_v60  ;;  %v2524_v45 = vpop.f32.mrf.mxu0 }
 0x182   : > { %v2564_v29 = vsel %vm750_vm0, %v4723_v13, 0.0  ;;  %v865_v49 = vsel %vm750_vm0, %v837_v62, 0.0  ;;  %v774_v60 = vpop.xlane.xlu1 %773 }
 0x183   : > { %2565 = vadd.xlane.f32.xlu0 %v2564_v29  ;;  %v2426_v51 = vpop.f32.mrf.mxu2 }
 0x185   : > { %v2475_v35 = vpop.f32.mrf.mxu3  ;;  %v1627_v24 = vpop.f32.mrf.mxu1 }
 0x186   : > { %v2476_v17 = vadd.f32 %v2475_v35, %v2426_v51  ;;  %v4737_v25 = vadd.f32 %v1627_v24, %v4508_v3  ;;  %v806_v3 = vmul.f32 0.020408163, %v774_v60 }
 0x188   : > { %v1671_v31 = vsel %vm750_vm0, %v4737_v25, 0.0  ;;  %v4744_v15 = vadd.f32 %v2524_v45, %v2476_v17  ;;  %v4757_v17 = vsub.f32 %v4506_v41, %v806_v3 }
 0x189   : > { %1669 = vadd.xlane.f32.xlu2 %v1668_v2  ;;  %866 = vadd.xlane.f32.xlu1 %v865_v49  ;;  %v2526_v35 = vpop.f32.mrf.mxu0 }
 0x18a   : > { %v777_v4 = vpop.xlane.xlu2 %776  ;;  %v2567_v2 = vsel %vm750_vm0, %v4744_v15, 0.0  ;;  %v838_v41 = vmul.f32 %v4757_v17, %v4757_v17 }
 0x18b   : > { %1672 = vadd.xlane.f32.xlu0 %v1671_v31  ;;  %v807_v29 = vmul.f32 0.020408163, %v777_v4  ;;  %v2428_v51 = vpop.f32.mrf.mxu2 }
 0x18d   : > { %v2477_v24 = vpop.f32.mrf.mxu3  ;;  %v4747_v8 = vsub.f32 %v4519_v57, %v807_v29  ;;  %v1630_v30 = vpop.f32.mrf.mxu1 }
 0x18e   : > { %v4750_v62 = vadd.f32 %v1630_v30, %v4521_v14  ;;  %v2478_v49 = vadd.f32 %v2477_v24, %v2428_v51 }
 0x18f   : > { %v839_v45 = vmul.f32 %v4747_v8, %v4747_v8 }
 0x190   : > { %v1674_v31 = vsel %vm750_vm0, %v4750_v62, 0.0  ;;  %v4762_v4 = vadd.f32 %v2526_v35, %v2478_v49 }
 0x191   : > { %2568 = vadd.xlane.f32.xlu2 %v2567_v2  ;;  %1675 = vadd.xlane.f32.xlu1 %v1674_v31  ;;  %v871_v57 = vsel %vm750_vm0, %v839_v45, 0.0  ;;  %v2529_v60 = vpop.f32.mrf.mxu0  ;;  %v868_v45 = vsel %vm750_vm0, %v838_v41, 0.0 }
 0x192   : > { %v780_v30 = vpop.xlane.xlu0 %779  ;;  %v2570_v31 = vsel %vm750_vm0, %v4762_v4, 0.0 }
 0x193   : > { %872 = vadd.xlane.f32.xlu0 %v871_v57  ;;  %v2431_v14 = vpop.f32.mrf.mxu2  ;;  %v808_v29 = vmul.f32 0.020408163, %v780_v30 }
 0x195   : > { %v2480_v12 = vpop.f32.mrf.mxu3  ;;  %v1632_v51 = vpop.f32.mrf.mxu1  ;;  %v4769_v2 = vsub.f32 %v4538_v48, %v808_v29 }
 0x196   : > { %v2481_v3 = vadd.f32 %v2480_v12, %v2431_v14  ;;  %v4777_v12 = vadd.f32 %v1632_v51, %v4540_v54 }
 0x197   : > { %5961 = vst [vmem:[#allocation42_spill] sm:$0xff] %v4769_v2  ;;  %v840_v48 = vmul.f32 %v4769_v2, %v4769_v2 }
 0x198   : > { %v4766_v24 = vadd.f32 %v2529_v60, %v2481_v3  ;;  %v1677_v41 = vsel %vm750_vm0, %v4777_v12, 0.0 }
 0x199   : > { %869 = vadd.xlane.f32.xlu2 %v868_v45  ;;  %2571 = vadd.xlane.f32.xlu1 %v2570_v31  ;;  %v2531_v57 = vpop.f32.mrf.mxu0  ;;  %v874_v3 = vsel %vm750_vm0, %v840_v48, 0.0 }
 0x19a   : > { %v2573_v35 = vsel %vm750_vm0, %v4766_v24, 0.0  ;;  %v783_v31 = vpop.xlane.xlu1 %782 }
 0x19b   : > { %2574 = vadd.xlane.f32.xlu0 %v2573_v35  ;;  %v2433_v49 = vpop.f32.mrf.mxu2  ;;  %v809_v61 = vmul.f32 0.020408163, %v783_v31 }
 0x19d   : > { %v2482_v30 = vpop.f32.mrf.mxu3  ;;  %v1635_v14 = vpop.f32.mrf.mxu1 }
 0x19e   : > { %v4782_v60 = vadd.f32 %v1635_v14, %v4553_v55  ;;  %v2483_v29 = vadd.f32 %v2482_v30, %v2433_v49 }
 0x1a0   : > { %v1680_v45 = vsel %vm750_vm0, %v4782_v60, 0.0  ;;  %v4789_v55 = vadd.f32 %v2531_v57, %v2483_v29 }
 0x1a1   : > { %1678 = vadd.xlane.f32.xlu2 %v1677_v41  ;;  %875 = vadd.xlane.f32.xlu1 %v874_v3  ;;  %v2534_v2 = vpop.f32.mrf.mxu0  ;;  %v4800_v3 = vsub.f32 %v4551_v22, %v809_v61 }
 0x1a2   : > { %v786_v54 = vpop.xlane.xlu2 %785 }
 0x1a3   : > { %1681 = vadd.xlane.f32.xlu0 %v1680_v45  ;;  %v810_v51 = vmul.f32 0.020408163, %v786_v54  ;;  %v2436_v35 = vpop.f32.mrf.mxu2  ;;  %5964 = vst [vmem:[#allocation45_spill] sm:$0xff] %v4800_v3  ;;  %v2576_v45 = vsel %vm750_vm0, %v4789_v55, 0.0  ;;  %v841_v61 = vmul.f32 %v4800_v3, %v4800_v3 }
 0x1a5   : > { %v2485_v49 = vpop.f32.mrf.mxu3  ;;  %v4792_v30 = vsub.f32 %v4568_v19, %v810_v51  ;;  %v1637_v14 = vpop.f32.mrf.mxu1 }
 0x1a6   : > { %v2486_v48 = vadd.f32 %v2485_v49, %v2436_v35  ;;  %v4795_v53 = vadd.f32 %v1637_v14, %v4570_v40 }
 0x1a7   : > { %5962 = vst [vmem:[#allocation43_spill] sm:$0xff] %v4792_v30  ;;  %v842_v41 = vmul.f32 %v4792_v30, %v4792_v30 }
 0x1a8   : > { %5963 = vst [vmem:[#allocation44_spill] sm:$0xff] %v4795_v53  ;;  %v1683_v57 = vsel %vm750_vm0, %v4795_v53, 0.0  ;;  %v4807_v29 = vadd.f32 %v2534_v2, %v2486_v48  ;;  %v877_v2 = vsel %vm750_vm0, %v841_v61, 0.0 }
 0x1a9   : > { %2577 = vadd.xlane.f32.xlu2 %v2576_v45  ;;  %1684 = vadd.xlane.f32.xlu1 %v1683_v57  ;;  %v880_v19 = vsel %vm750_vm0, %v842_v41, 0.0  ;;  %v2536_v54 = vpop.f32.mrf.mxu0 }
 0x1aa   : > { %v789_v40 = vpop.xlane.xlu0 %788  ;;  %v2579_v14 = vsel %vm750_vm0, %v4807_v29, 0.0 }
 0x1ab   : > { %881 = vadd.xlane.f32.xlu0 %v880_v19  ;;  %v2438_v31 = vpop.f32.mrf.mxu2  ;;  %v811_v51 = vmul.f32 0.020408163, %v789_v40 }
 0x1ad   : > { %v2487_v35 = vpop.f32.mrf.mxu3  ;;  %v1640_v49 = vpop.f32.mrf.mxu1  ;;  %v4816_v41 = vsub.f32 %v4583_v52, %v811_v51 }
 0x1ae   : > { %v2488_v22 = vadd.f32 %v2487_v35, %v2438_v31  ;;  %v4822_v40 = vadd.f32 %v1640_v49, %v4585_v38 }
 0x1af   : > { %5966 = vst [vmem:[#allocation47_spill] sm:$0xff] %v4816_v41 }
 0x1b0   : > { %v4813_v45 = vadd.f32 %v2536_v54, %v2488_v22  ;;  %v843_v54 = vmul.f32 %v4816_v41, %v4816_v41  ;;  %v1686_v61 = vsel %vm750_vm0, %v4822_v40, 0.0 }
 0x1b1   : > { %878 = vadd.xlane.f32.xlu2 %v877_v2  ;;  %2580 = vadd.xlane.f32.xlu1 %v2579_v14  ;;  %v2539_v19 = vpop.f32.mrf.mxu0 }
 0x1b2   : > { %5965 = vst [vmem:[#allocation46_spill] sm:$0xff] %v4813_v45  ;;  %v2582_v48 = vsel %vm750_vm0, %v4813_v45, 0.0  ;;  %v883_v22 = vsel %vm750_vm0, %v843_v54, 0.0  ;;  %v792_v2 = vpop.xlane.xlu1 %791 }
 0x1b3   : > { %2583 = vadd.xlane.f32.xlu0 %v2582_v48  ;;  %v2441_v57 = vpop.f32.mrf.mxu2 }
 0x1b5   : > { %v2490_v31 = vpop.f32.mrf.mxu3  ;;  %v1642_v35 = vpop.f32.mrf.mxu1 }
 0x1b6   : > { %v2491_v52 = vadd.f32 %v2490_v31, %v2441_v57  ;;  %v4827_v51 = vadd.f32 %v1642_v35, %v4602_v33  ;;  %v812_v33 = vmul.f32 0.020408163, %v792_v2 }
 0x1b8   : > { %v1689_v14 = vsel %vm750_vm0, %v4827_v51, 0.0  ;;  %v4834_v38 = vadd.f32 %v2539_v19, %v2491_v52  ;;  %v4847_v52 = vsub.f32 %v4600_v46, %v812_v33 }
 0x1b9   : > { %1687 = vadd.xlane.f32.xlu2 %v1686_v61  ;;  %884 = vadd.xlane.f32.xlu1 %v883_v22  ;;  %v2541_v31 = vpop.f32.mrf.mxu0 }
 0x1ba   : > { %v795_v49 = vpop.xlane.xlu2 %794  ;;  %v2585_v61 = vsel %vm750_vm0, %v4834_v38, 0.0  ;;  %5969 = vst [vmem:[#allocation50_spill] sm:$0xff] %v4847_v52  ;;  %v844_v46 = vmul.f32 %v4847_v52, %v4847_v52 }
 0x1bb   : > { %1690 = vadd.xlane.f32.xlu0 %v1689_v14  ;;  %v813_v48 = vmul.f32 0.020408163, %v795_v49  ;;  %v2443_v57 = vpop.f32.mrf.mxu2 }
 0x1bd   : > { %v2492_v35 = vpop.f32.mrf.mxu3  ;;  %v4837_v41 = vsub.f32 %v4615_v11, %v813_v48  ;;  %v1645_v45 = vpop.f32.mrf.mxu1 }
 0x1be   : > { %v4840_v54 = vadd.f32 %v1645_v45, %v4617_v34  ;;  %v2493_v22 = vadd.f32 %v2492_v35, %v2443_v57 }
 0x1bf   : > { %5967 = vst [vmem:[#allocation48_spill] sm:$0xff] %v4837_v41  ;;  %v845_v19 = vmul.f32 %v4837_v41, %v4837_v41  ;;  %v1088_v41 = vld [vmem:[%s4939_s29 + $0x8] sm:$0xff] }
 0x1c0   : > { %5968 = vst [vmem:[#allocation49_spill] sm:$0xff] %v4840_v54  ;;  %v1692_v14 = vsel %vm750_vm0, %v4840_v54, 0.0  ;;  %v4852_v2 = vadd.f32 %v2541_v31, %v2493_v22 }
 0x1c1   : > { %2586 = vadd.xlane.f32.xlu2 %v2585_v61  ;;  %1693 = vadd.xlane.f32.xlu1 %v1692_v14  ;;  %v889_v11 = vsel %vm750_vm0, %v845_v19, 0.0  ;;  %v2544_v3 = vpop.f32.mrf.mxu0  ;;  %v886_v61 = vsel %vm750_vm0, %v844_v46, 0.0 }
 0x1c2   : > { %v798_v34 = vpop.xlane.xlu0 %797  ;;  %v2588_v19 = vsel %vm750_vm0, %v4852_v2, 0.0 }
 0x1c3   : > { %890 = vadd.xlane.f32.xlu0 %v889_v11  ;;  %v2446_v45 = vpop.f32.mrf.mxu2  ;;  %v814_v49 = vmul.f32 0.020408163, %v798_v34 }
 0x1c5   : > { %v2495_v48 = vpop.f32.mrf.mxu3  ;;  %v4859_v35 = vsub.f32 %v4624_v0, %v814_v49  ;;  %v1647_v14 = vpop.f32.mrf.mxu1 }
 0x1c6   : > { %v2496_v33 = vadd.f32 %v2495_v48, %v2446_v45  ;;  %v849_v34 = vpop.xlane.xlu1 %848 }
 0x1c7   : > { %5971 = vst [vmem:[#allocation52_spill] sm:$0xff] %v4859_v35  ;;  %v846_v45 = vmul.f32 %v4859_v35, %v4859_v35 }
 0x1c8   : > { %v4856_v57 = vadd.f32 %v2544_v3, %v2496_v33  ;;  %v4867_v3 = vadd.f32 %v1647_v14, %v4629_v18 }
 0x1c9   : > { %887 = vadd.xlane.f32.xlu2 %v886_v61  ;;  %2589 = vadd.xlane.f32.xlu1 %v2588_v19  ;;  %v895_v61 = vmul.f32 0.020408163, %v849_v34  ;;  %v892_v14 = vsel %vm750_vm0, %v846_v45, 0.0  ;;  %v2546_v35 = vpop.f32.mrf.mxu0 }
 0x1ca   : > { %5970 = vst [vmem:[#allocation51_spill] sm:$0xff] %v4856_v57  ;;  %v2591_v31 = vsel %vm750_vm0, %v4856_v57, 0.0  ;;  %v1652_v22 = vpop.xlane.xlu0 %1651  ;;  %v1695_v18 = vsel %vm750_vm0, %v4867_v3, 0.0 }
 0x1cb   : > { %2592 = vadd.xlane.f32.xlu0 %v2591_v31  ;;  %v1698_v11 = vmul.f32 0.020408163, %v1652_v22  ;;  %v2448_v48 = vpop.f32.mrf.mxu2 }
 0x1cc   : > { %v1655_v0 = vpop.xlane.xlu2 %1654 }
 0x1cd   : > { %v4872_v49 = vsub.f32 %v4641_v63, %v1698_v11  ;;  %v2497_v46 = vpop.f32.mrf.mxu3  ;;  %v1699_v33 = vmul.f32 0.020408163, %v1655_v0  ;;  %v4883_v11 = vadd.f32 0.001, %v895_v61 }
 0x1ce   : > { %v2498_v31 = vadd.f32 %v2497_v46, %v2448_v48 }
 0x1cf   : > { %5972 = vst [vmem:[#allocation53_spill] sm:$0xff] %v4872_v49  ;;  %v1730_v19 = vmul.f32 %v4872_v49, %v4872_v49  ;;  %v4877_v22 = vsub.f32 %v4644_v20, %v1699_v33  ;;  %3629 = vrsqrt.f32 %v4883_v11  ;;  %vm933_vm2 = vweird.f32 %v4883_v11 }
 0x1d0   : > { %v4885_v34 = vadd.f32 %v2546_v35, %v2498_v31 }
 0x1d1   : > { %5973 = vst [vmem:[#allocation54_spill] sm:$0xff] %v4877_v22  ;;  %1696 = vadd.xlane.f32.xlu2 %v1695_v18  ;;  %893 = vadd.xlane.f32.xlu1 %v892_v14  ;;  %v1746_v63 = vsel %vm750_vm0, %v1730_v19, 0.0  ;;  %v1731_v20 = vmul.f32 %v4877_v22, %v4877_v22 }
 0x1d2   : > { %5974 = vst [vmem:[#allocation55_spill] sm:$0xff] %v4885_v34  ;;  %v2594_v35 = vsel %vm750_vm0, %v4885_v34, 0.0 }
 0x1d3   : > { %1747 = vadd.xlane.f32.xlu0 %v1746_v63  ;;  %v1749_v61 = vsel %vm750_vm0, %v1731_v20, 0.0 }
 0x1d4   : > { %v2551_v0 = vpop.xlane.xlu2 %2550  ;;  %v1658_v48 = vpop.xlane.xlu1 %1657 }
 0x1d5   : > { %v2597_v46 = vmul.f32 0.020408163, %v2551_v0  ;;  %v1700_v33 = vmul.f32 0.020408163, %v1658_v48  ;;  %v855_v49 = vpop.xlane.xlu0 %854 }
 0x1d7   : > { %v4891_v45 = vsub.f32 %v4652_v26, %v2597_v46  ;;  %v4894_v19 = vsub.f32 %v4658_v42, %v1700_v33  ;;  %v3630_v26 = vpop.eup %3629 }
 0x1d8   : > { %v928_v20 = vmul.f32 %v3630_v26, %v4883_v11  ;;  %vm934_vm1 = vweird.f32 %v3630_v26 }
 0x1d9   : > { %5975 = vst [vmem:[#allocation56_spill] sm:$0xff] %v4891_v45  ;;  %2595 = vadd.xlane.f32.xlu2 %v2594_v35  ;;  %1750 = vadd.xlane.f32.xlu1 %v1749_v61  ;;  %v1732_v14 = vmul.f32 %v4894_v19, %v4894_v19  ;;  %v2629_v63 = vmul.f32 %v4891_v45, %v4891_v45  ;;  %vm935_vm3 = vmor %vm933_vm2, %vm934_vm1 }
 0x1da   : > { %5976 = vst [vmem:[#allocation57_spill] sm:$0xff] %v4894_v19 }
 0x1db   : > { %v1752_v35 = vsel %vm750_vm0, %v1732_v14, 0.0  ;;  %v2645_v61 = vsel %vm750_vm0, %v2629_v63, 0.0 }
 0x1dc   : > { %v2554_v31 = vpop.xlane.xlu1 %2553  ;;  %v852_v18 = vpop.xlane.xlu2 %851 }
 0x1dd   : > { %v2598_v0 = vmul.f32 0.020408163, %v2554_v31  ;;  %v896_v48 = vmul.f32 0.020408163, %v852_v18  ;;  %v929_v31 = vmul.f32 %v3630_v26, %v928_v20  ;;  %v897_v18 = vmul.f32 0.020408163, %v855_v49 }
 0x1de   : > { %v4903_v42 = vpop.xlane.xlu0 %2556 }
 0x1df   : > { %v4906_v46 = vsub.f32 %v4672_v50, %v2598_v0  ;;  %v912_v33 = vadd.f32 0.001, %v896_v48 }
 0x1e1   : > { %5977 = vst [vmem:[#allocation58_spill] sm:$0xff] %v4906_v46  ;;  %3631 = vrsqrt.f32 %v912_v33  ;;  %1753 = vadd.xlane.f32.xlu2 %v1752_v35  ;;  %2646 = vadd.xlane.f32.xlu1 %v2645_v61  ;;  %v2630_v22 = vmul.f32 %v4906_v46, %v4906_v46  ;;  %v930_v35 = vmul.f32 0.5, %v929_v31  ;;  %v913_v61 = vadd.f32 0.001, %v897_v18 }
 0x1e2   : > { %vm943_vm5 = vweird.f32 %v912_v33 }
 0x1e3   : > { %v2648_v50 = vsel %vm750_vm0, %v2630_v22, 0.0  ;;  %v931_v20 = vsub.f32 1.5, %v930_v35  ;;  %3633 = vrsqrt.f32 %v913_v61  ;;  %vm953_vm8 = vweird.f32 %v913_v61 }
 0x1e4   : > { %v4913_v57 = vpop.xlane.xlu1 %857  ;;  %v1661_v52 = vpop.xlane.xlu2 %1660  ;;  %2649 = vadd.xlane.f32.xlu0 %v2648_v50 }
 0x1e5   : > { %v1701_v0 = vmul.f32 0.020408163, %v1661_v52 }
 0x1e6   : > { %v1664_v48 = vpop.xlane.xlu0 %1663 }
 0x1e7   : > { %v1702_v19 = vmul.f32 0.020408163, %v1664_v48  ;;  %v3632_v14 = vpop.eup %3631  ;;  %v4917_v63 = vsub.f32 %v4687_v39, %v1701_v0 }
 0x1e8   : > { %v938_v45 = vmul.f32 %v3632_v14, %v912_v33  ;;  %vm944_vm4 = vweird.f32 %v3632_v14 }
 0x1e9   : > { %5978 = vst [vmem:[#allocation59_spill] sm:$0xff] %v4917_v63  ;;  %v4920_v46 = vsub.f32 %v4692_v9, %v1702_v19  ;;  %v1733_v49 = vmul.f32 %v4917_v63, %v4917_v63  ;;  %v932_v63 = vmul.f32 %v3630_v26, %v931_v20  ;;  %vm945_vm6 = vmor %vm943_vm5, %vm944_vm4 }
 0x1ea   : > { %v939_v50 = vmul.f32 %v3632_v14, %v938_v45  ;;  %v3634_v45 = vpop.eup %3633 }
 0x1eb   : > { %5979 = vst [vmem:[#allocation60_spill] sm:$0xff] %v4920_v46  ;;  %v1734_v22 = vmul.f32 %v4920_v46, %v4920_v46  ;;  %v1755_v52 = vsel %vm750_vm0, %v1733_v49, 0.0  ;;  %v936_v20 = vsel %vm935_vm3, %v3630_v26, %v932_v63  ;;  %vm954_vm7 = vweird.f32 %v3634_v45 }
 0x1ec   : > { %v1667_v39 = vpop.xlane.xlu1 %1666  ;;  %v2560_v0 = vpop.xlane.xlu2 %2559  ;;  %1756 = vadd.xlane.f32.xlu0 %v1755_v52  ;;  %v940_v48 = vmul.f32 0.5, %v939_v50  ;;  %v1087_v50 = vld [vmem:[%s4939_s29] sm:$0xff]  ;;  %vm955_vm9 = vmor %vm953_vm8, %vm954_vm7 }
 0x1ed   : > { %v1758_v31 = vsel %vm750_vm0, %v1734_v22, 0.0  ;;  %v2600_v18 = vmul.f32 0.020408163, %v2560_v0  ;;  %v948_v0 = vmul.f32 %v3634_v45, %v913_v61 }
 0x1ee   : > { %1759 = vadd.xlane.f32.xlu1 %v1758_v31  ;;  %v4928_v9 = vpop.xlane.xlu0 %863 }
 0x1ef   : > { %v4931_v19 = vsub.f32 %v4699_v6, %v2600_v18  ;;  %v941_v6 = vsub.f32 1.5, %v940_v48  ;;  %v1103_v18 = vmul.f32 %v1087_v50, %v936_v20  ;;  %v949_v46 = vmul.f32 %v3634_v45, %v948_v0  ;;  %v1089_v50 = vld [vmem:[%s4939_s29 + $0x10] sm:$0xff] }
 0x1f1   : > { %5980 = vst [vmem:[#allocation61_spill] sm:$0xff] %v4931_v19  ;;  %v2632_v35 = vmul.f32 %v4931_v19, %v4931_v19  ;;  %v942_v19 = vmul.f32 %v3632_v14, %v941_v6  ;;  %v950_v54 = vmul.f32 0.5, %v949_v46 }
 0x1f3   : > { %v2654_v49 = vsel %vm750_vm0, %v2632_v35, 0.0  ;;  %v946_v48 = vsel %vm945_vm6, %v3632_v14, %v942_v19  ;;  %v951_v34 = vsub.f32 1.5, %v950_v54  ;;  %v898_v19 = vmul.f32 0.020408163, %v4913_v57 }
 0x1f4   : > { %v2563_v22 = vpop.xlane.xlu1 %2562  ;;  %v4943_v52 = vpop.xlane.xlu2 %860  ;;  %v1104_v63 = vmul.f32 %v1088_v41, %v946_v48  ;;  %v2599_v41 = vmul.f32 0.020408163, %v4903_v42  ;;  %v1703_v48 = vmul.f32 0.020408163, %v1667_v39 }
 0x1f5   : > { %v952_v6 = vmul.f32 %v3634_v45, %v951_v34  ;;  %v4963_v61 = vadd.f32 0.001, %v898_v19 }
 0x1f6   : > { %2655 = vadd.xlane.f32.xlu1 %v2654_v49  ;;  %v4946_v31 = vpop.xlane.xlu0 %2565  ;;  %v4961_v34 = vsub.f32 %v4676_v44, %v2599_v41  ;;  %v4975_v57 = vsub.f32 %v4705_v23, %v1703_v48 }
 0x1f7   : > { %v956_v20 = vsel %vm955_vm9, %v3634_v45, %v952_v6  ;;  %v2601_v6 = vmul.f32 0.020408163, %v2563_v22  ;;  %3635 = vrsqrt.f32 %v4963_v61  ;;  %vm963_vm11 = vweird.f32 %v4963_v61 }
 0x1f8   : > { %v1105_v53 = vmul.f32 %v1089_v50, %v956_v20  ;;  %5981 = vst [vmem:[#allocation62_spill] sm:$0xff] %v4961_v34  ;;  %v1735_v50 = vmul.f32 %v4975_v57, %v4975_v57 }
 0x1f9   : > { %1121 = vperm.xlu2 %3628, %v1103_v18   ;;  %5983 = vst [vmem:[#allocation64_spill] sm:$0xff] %v4975_v57  ;;  %v4979_v20 = vsub.f32 %v4717_v37, %v2601_v6 }
 0x1fa   : > { %v1761_v48 = vsel %vm750_vm0, %v1735_v50, 0.0  ;;  %v900_v50 = vmul.f32 0.020408163, %v4928_v9 }
 0x1fb   : > { %5984 = vst [vmem:[#allocation65_spill] sm:$0xff] %v4979_v20  ;;  %v2633_v19 = vmul.f32 %v4979_v20, %v4979_v20 }
 0x1fc   : > { %v1670_v11 = vpop.xlane.xlu2 %1669  ;;  %v4948_v35 = vpop.xlane.xlu1 %866 }
 0x1fd   : > { %v3636_v41 = vpop.eup %3635  ;;  %v1704_v22 = vmul.f32 0.020408163, %v1670_v11  ;;  %v2657_v6 = vsel %vm750_vm0, %v2633_v19, 0.0 }
 0x1fe   : > { %v1673_v26 = vpop.xlane.xlu0 %1672  ;;  %v958_v23 = vmul.f32 %v3636_v41, %v4963_v61  ;;  %vm964_vm10 = vweird.f32 %v3636_v41 }
 0x1ff   : > { %v4992_v37 = vsub.f32 %v4732_v32, %v1704_v22  ;;  %vm965_vm12 = vmor %vm963_vm11, %vm964_vm10 }
 0x200   : > { %1126 = vperm.xlu0 %3627, %v1104_v63   ;;  %v959_v57 = vmul.f32 %v3636_v41, %v958_v23 }
 0x201   : > { %5985 = vst [vmem:[#allocation66_spill] sm:$0xff] %v4992_v37 }
 0x202   : > { %v960_v22 = vmul.f32 0.5, %v959_v57 }
 0x204   : > { %v2569_v49 = vpop.xlane.xlu2 %2568  ;;  %v4951_v30 = vpop.xlane.xlu1 %1675  ;;  %v961_v57 = vsub.f32 1.5, %v960_v22 }
 0x206   : > { %v873_v33 = vpop.xlane.xlu0 %872 }
 0x207   : > { %v903_v20 = vmul.f32 0.020408163, %v873_v33  ;;  %v5013_v33 = vadd.f32 0.001, %v900_v50 }
 0x209   : > { %v5005_v43 = vadd.f32 0.001, %v903_v20  ;;  %vm983_vm2 = vweird.f32 %v5013_v33 }
 0x20b   : > { %3637 = vrsqrt.f32 %v5005_v43  ;;  %vm1013_vm15 = vweird.f32 %v5005_v43 }
 0x20c   : > { %v870_v0 = vpop.xlane.xlu2 %869  ;;  %v2572_v18 = vpop.xlane.xlu1 %2571  ;;  %3639 = vrsqrt.f32 %v5013_v33 }
 0x20d   : > { %v2604_v56 = vmul.f32 0.020408163, %v2572_v18  ;;  %v2603_v18 = vmul.f32 0.020408163, %v2569_v49  ;;  %v902_v49 = vmul.f32 0.020408163, %v870_v0 }
 0x20e   : > { %v4954_v14 = vpop.xlane.xlu0 %2574 }
 0x20f   : > { %1131 = vperm.xlu1 %3626, %v1105_v53   ;;  %v2631_v53 = vmul.f32 %v4961_v34, %v4961_v34  ;;  %v918_v22 = vadd.f32 0.001, %v902_v49 }
 0x211   : > { %v2651_v44 = vsel %vm750_vm0, %v2631_v53, 0.0  ;;  %v3638_v50 = vpop.eup %3637  ;;  %3641 = vrsqrt.f32 %v918_v22  ;;  %vm1003_vm5 = vweird.f32 %v918_v22 }
 0x212   : > { %vm1014_vm13 = vweird.f32 %v3638_v50 }
 0x213   : > { %vm1015_vm1 = vmor %vm1013_vm15, %vm1014_vm13 }
 0x214   : > { %v1679_v46 = vpop.xlane.xlu2 %1678  ;;  %v4957_v54 = vpop.xlane.xlu1 %875 }
 0x215   : > { %v1707_v20 = vmul.f32 0.020408163, %v1679_v46 }
 0x216   : > { %v4967_v63 = vpop.xlane.xlu0 %1681 }
 0x21c   : > { %v4965_v45 = vpop.xlane.xlu2 %2577  ;;  %v4972_v42 = vpop.xlane.xlu1 %1684 }
 0x21d   : > { %5982 = vst [vmem:[#allocation63_spill] sm:$0xff] %v4972_v42  ;;  %v1736_v42 = vmul.f32 %v4992_v37, %v4992_v37 }
 0x21e   : > { %v4987_v34 = vpop.xlane.xlu0 %881 }
 0x21f   : > { %v1764_v23 = vsel %vm750_vm0, %v1736_v42, 0.0 }
 0x222   : > { %2652 = vadd.xlane.f32.xlu2 %v2651_v44  ;;  %v1705_v44 = vmul.f32 0.020408163, %v1673_v26  ;;  %v5010_v26 = vsub.f32 %v4762_v4, %v2604_v56  ;;  %v5026_v4 = vsub.f32 %v4744_v15, %v2603_v18  ;;  %v3640_v18 = vpop.eup %3639 }
 0x223   : > { %v978_v49 = vmul.f32 %v3640_v18, %v5013_v33  ;;  %vm984_vm14 = vweird.f32 %v3640_v18 }
 0x224   : > { %v4981_v39 = vpop.xlane.xlu2 %878  ;;  %v4994_v53 = vpop.xlane.xlu1 %2580  ;;  %v5003_v32 = vsub.f32 %v4737_v25, %v1705_v44  ;;  %5987 = vst [vmem:[#allocation68_spill] sm:$0xff] %v5010_v26  ;;  %v2636_v56 = vmul.f32 %v5010_v26, %v5010_v26  ;;  %v5030_v44 = vsub.f32 %v4777_v12, %v1707_v20  ;;  %v2635_v15 = vmul.f32 %v5026_v4, %v5026_v4  ;;  %vm985_vm3 = vmor %vm983_vm2, %vm984_vm14 }
 0x225   : > { %5989 = vst [vmem:[#allocation70_spill] sm:$0xff] %v5026_v4  ;;  %v1008_v12 = vmul.f32 %v3638_v50, %v5005_v43  ;;  %v3642_v4 = vpop.eup %3641 }
 0x226   : > { %5986 = vst [vmem:[#allocation67_spill] sm:$0xff] %v5003_v32  ;;  %v5007_v19 = vpop.xlane.xlu0 %2583  ;;  %v1737_v9 = vmul.f32 %v5003_v32, %v5003_v32  ;;  %v2666_v46 = vsel %vm750_vm0, %v2636_v56, 0.0  ;;  %v1739_v61 = vmul.f32 %v5030_v44, %v5030_v44  ;;  %v2663_v56 = vsel %vm750_vm0, %v2635_v15, 0.0 }
 0x227   : > { %5990 = vst [vmem:[#allocation71_spill] sm:$0xff] %v5030_v44  ;;  %vm1004_vm4 = vweird.f32 %v3642_v4 }
 0x228   : > { %v1767_v42 = vsel %vm750_vm0, %v1737_v9, 0.0  ;;  %v1773_v26 = vsel %vm750_vm0, %v1739_v61, 0.0  ;;  %vm1005_vm6 = vmor %vm1003_vm5, %vm1004_vm4 }
 0x22a   : > { %1762 = vadd.xlane.f32.xlu2 %v1761_v48  ;;  %2658 = vadd.xlane.f32.xlu0 %v2657_v6  ;;  %v962_v6 = vmul.f32 %v3636_v41, %v961_v57  ;;  %v1090_v57 = vld [vmem:[%s4939_s29 + $0x18] sm:$0xff] }
 0x22c   : > { %v4997_v11 = vpop.xlane.xlu2 %1687  ;;  %v5017_v48 = vpop.xlane.xlu1 %884  ;;  %v966_v9 = vsel %vm965_vm12, %v3636_v41, %v962_v6  ;;  %v979_v41 = vmul.f32 %v3640_v18, %v978_v49 }
 0x22d   : > { %5988 = vst [vmem:[#allocation69_spill] sm:$0xff] %v5017_v48 }
 0x22e   : > { %v980_v44 = vmul.f32 0.5, %v979_v41 }
 0x232   : > { %1765 = vadd.xlane.f32.xlu0 %v1764_v23  ;;  %v5034_v23 = vpop.xlane.xlu0 %1690 }
 0x234   : > { %v5019_v25 = vpop.xlane.xlu2 %2586  ;;  %v5042_v20 = vpop.xlane.xlu1 %1693 }
 0x235   : > { %5991 = vst [vmem:[#allocation72_spill] sm:$0xff] %v5042_v20  ;;  %v998_v20 = vmul.f32 %v3642_v4, %v918_v22 }
 0x239   : > { %1768 = vadd.xlane.f32.xlu1 %v1767_v42  ;;  %v1106_v42 = vmul.f32 %v1090_v57, %v966_v9  ;;  %v999_v9 = vmul.f32 %v3642_v4, %v998_v20 }
 0x23a   : > { %2667 = vadd.xlane.f32.xlu0 %v2666_v46  ;;  %v1009_v46 = vmul.f32 %v3638_v50, %v1008_v12  ;;  %v5051_v37 = vpop.xlane.xlu0 %890 }
 0x23b   : > { %v1000_v61 = vmul.f32 0.5, %v999_v9  ;;  %v899_v9 = vmul.f32 0.020408163, %v4943_v52  ;;  %v2602_v52 = vmul.f32 0.020408163, %v4946_v31 }
 0x23c   : > { %v5038_v0 = vpop.xlane.xlu2 %887  ;;  %v1010_v32 = vmul.f32 0.5, %v1009_v46  ;;  %v5053_v48 = vpop.xlane.xlu1 %2589 }
 0x23d   : > { %v1001_v20 = vsub.f32 1.5, %v1000_v61 }
 0x23e   : > { %v1011_v15 = vsub.f32 1.5, %v1010_v32 }
 0x241   : > { %2664 = vadd.xlane.f32.xlu1 %v2663_v56  ;;  %v981_v56 = vsub.f32 1.5, %v980_v44  ;;  %v1095_v44 = vld [vmem:[%s4939_s29 + $0x40] sm:$0xff] }
 0x242   : > { %1136 = vperm.xlu2 %3628, %v1106_v42   ;;  %1774 = vadd.xlane.f32.xlu0 %v1773_v26  ;;  %v1012_v26 = vmul.f32 %v3638_v50, %v1011_v15  ;;  %v5057_v12 = vpop.xlane.xlu0 %2592  ;;  %v1092_v15 = vld [vmem:[%s4939_s29 + $0x28] sm:$0xff] }
 0x243   : > { %5992 = vst [vmem:[#allocation73_spill] sm:$0xff] %v5057_v12  ;;  %v982_v49 = vmul.f32 %v3640_v18, %v981_v56  ;;  %v1002_v56 = vmul.f32 %v3642_v4, %v1001_v20 }
 0x244   : > { %v5049_v6 = vpop.xlane.xlu2 %1696  ;;  %v5061_v42 = vpop.xlane.xlu1 %893  ;;  %v1016_v32 = vsel %vm1015_vm1, %v3638_v50, %v1012_v26 }
 0x245   : > { %5993 = vst [vmem:[#allocation74_spill] sm:$0xff] %v5061_v42  ;;  %v986_v41 = vsel %vm985_vm3, %v3640_v18, %v982_v49  ;;  %v1111_v12 = vmul.f32 %v1095_v44, %v1016_v32  ;;  %v1006_v61 = vsel %vm1005_vm6, %v3642_v4, %v1002_v56  ;;  %v1094_v42 = vld [vmem:[%s4939_s29 + $0x38] sm:$0xff]  ;;  %v915_v18 = vadd.f32 0.001, %v899_v9 }
 0x246   : > { %v1108_v43 = vmul.f32 %v1092_v15, %v986_v41  ;;  %v1110_v22 = vmul.f32 %v1094_v42, %v1006_v61  ;;  %v5087_v4 = vsub.f32 %v4723_v13, %v2602_v52  ;;  %v906_v13 = vmul.f32 0.020408163, %v4987_v34 }
 0x247   : > { %3643 = vrsqrt.f32 %v915_v18  ;;  %v2607_v9 = vmul.f32 0.020408163, %v4994_v53  ;;  %vm973_vm8 = vweird.f32 %v915_v18  ;;  %v1710_v34 = vmul.f32 0.020408163, %v4997_v11 }
 0x248   : > { %v2634_v44 = vmul.f32 %v5087_v4, %v5087_v4  ;;  %v922_v52 = vadd.f32 0.001, %v906_v13 }
 0x24a   : > { %v5068_v33 = vpop.xlane.xlu0 %1747  ;;  %3645 = vrsqrt.f32 %v922_v52  ;;  %vm1043_vm11 = vweird.f32 %v922_v52 }
 0x24c   : > { %v5055_v57 = vpop.xlane.xlu2 %2595  ;;  %v5070_v50 = vpop.xlane.xlu1 %1750 }
 0x24d   : > { %v3644_v20 = vpop.eup %3643 }
 0x24e   : > { %v968_v41 = vmul.f32 %v3644_v20, %v915_v18  ;;  %vm974_vm7 = vweird.f32 %v3644_v20 }
 0x24f   : > { %vm975_vm9 = vmor %vm973_vm8, %vm974_vm7 }
 0x250   : > { %v969_v42 = vmul.f32 %v3644_v20, %v968_v41  ;;  %v5115_v41 = vsub.f32 %v4822_v40, %v1710_v34 }
 0x252   : > { %v1742_v40 = vmul.f32 %v5115_v41, %v5115_v41 }
 0x254   : > { %v5064_v46 = vpop.xlane.xlu2 %1753 }
 0x256   : > { %1161 = vperm.xlu0 %3627, %v1111_v12  }
 0x257   : > { %v5082_v32 = vpop.xlane.xlu0 %2649 }
 0x25a   : > { %1146 = vperm.xlu1 %3626, %v1108_v43   ;;  %v970_v43 = vmul.f32 0.5, %v969_v42 }
 0x25c   : > { %v1122_v26 = vpop.permute.xlu2 %1121  ;;  %v971_v61 = vsub.f32 1.5, %v970_v43  ;;  %v3646_v43 = vpop.eup %3645 }
 0x25d   : > { %v1199_v49 = vmul.f32 %v1122_v26, %v4627_v5  ;;  %v5089_v5 = vpop.xlane.xlu1 %2646  ;;  %vm1044_vm10 = vweird.f32 %v3646_v43 }
 0x25e   : > { %vm1045_vm12 = vmor %vm1043_vm11, %vm1044_vm10 }
 0x25f   : > { %v1311_v12 = vadd.f32 %v4372_v1, %v1199_v49  ;;  %v2660_v1 = vsel %vm750_vm0, %v2634_v44, 0.0  ;;  %v5094_v31 = vpop.xlane.xlu0 %1756  ;;  %v972_v44 = vmul.f32 %v3644_v20, %v971_v61 }
 0x261   : > { %1327 = vst.msk [vmem:[%s5078_s7] sm:$0xff] %vm750_vm0, %v1311_v12  ;;  %v5103_v12 = vsub.f32 %v4807_v29, %v2607_v9  ;;  %v976_v53 = vsel %vm975_vm9, %v3644_v20, %v972_v44  ;;  %v1091_v29 = vld [vmem:[%s4939_s29 + $0x20] sm:$0xff]  ;;  %v1038_v20 = vmul.f32 %v3646_v43, %v922_v52  ;;  %v2606_v9 = vmul.f32 0.020408163, %v4965_v45 }
 0x262   : > { %1156 = vperm.xlu1 %3626, %v1110_v22   ;;  %v1107_v11 = vmul.f32 %v1091_v29, %v976_v53 }
 0x263   : > { %v1039_v61 = vmul.f32 %v3646_v43, %v1038_v20 }
 0x265   : > { %v5096_v15 = vpop.xlane.xlu1 %1759 }
 0x26b   : > { %2661 = vadd.xlane.f32.xlu2 %v2660_v1 }
 0x26d   : > { %v5105_v22 = vpop.xlane.xlu1 %2655 }
 0x272   : > { %v1127_v56 = vpop.permute.xlu0 %1126 }
 0x273   : > { %v1200_v26 = vmul.f32 %v1127_v56, %v4665_v47  ;;  %v2639_v47 = vmul.f32 %v5103_v12, %v5103_v12  ;;  %v905_v56 = vmul.f32 0.020408163, %v4981_v39  ;;  %v5133_v39 = vsub.f32 %v4789_v55, %v2606_v9 }
 0x275   : > { %v1312_v49 = vadd.f32 %v4346_v36, %v1200_v26  ;;  %v1708_v36 = vmul.f32 0.020408163, %v4967_v63  ;;  %v2675_v42 = vsel %vm750_vm0, %v2639_v47, 0.0  ;;  %v921_v26 = vadd.f32 0.001, %v905_v56 }
 0x276   : > { %v2638_v45 = vmul.f32 %v5133_v39, %v5133_v39 }
 0x277   : > { %1328 = vst.msk [vmem:[%s5078_s7 + $0x8] sm:$0xff] %vm750_vm0, %v1312_v49  ;;  %v5120_v13 = vsub.f32 %v4782_v60, %v1708_v36  ;;  %v1782_v60 = vsel %vm750_vm0, %v1742_v40, 0.0  ;;  %3647 = vrsqrt.f32 %v921_v26  ;;  %v1040_v49 = vmul.f32 0.5, %v1039_v61 }
 0x278   : > { %v2672_v47 = vsel %vm750_vm0, %v2638_v45, 0.0  ;;  %v1706_v40 = vmul.f32 0.020408163, %v4951_v30  ;;  %vm1033_vm14 = vweird.f32 %v921_v26  ;;  %v1097_v30 = vld [vmem:[%s4939_s29 + $0x50] sm:$0xff] }
 0x279   : > { %v1041_v34 = vsub.f32 1.5, %v1040_v49 }
 0x27a   : > { %v5147_v52 = vsub.f32 %v4750_v62, %v1706_v40  ;;  %v1093_v40 = vld [vmem:[%s4939_s29 + $0x30] sm:$0xff] }
 0x27b   : > { %v1042_v53 = vmul.f32 %v3646_v43, %v1041_v34 }
 0x27d   : > { %v3648_v44 = vpop.eup %3647 }
 0x27e   : > { %v1028_v36 = vmul.f32 %v3648_v44, %v921_v26  ;;  %vm1034_vm13 = vweird.f32 %v3648_v44 }
 0x27f   : > { %vm1035_vm15 = vmor %vm1033_vm14, %vm1034_vm13 }
 0x280   : > { %2676 = vadd.xlane.f32.xlu0 %v2675_v42  ;;  %v1029_v55 = vmul.f32 %v3648_v44, %v1028_v36  ;;  %v1098_v42 = vld [vmem:[%s4939_s29 + $0x58] sm:$0xff] }
 0x281   : > { %v1132_v1 = vpop.permute.xlu1 %1131 }
 0x282   : > { %v1201_v18 = vmul.f32 %v1132_v1, %v4655_v27  ;;  %v1740_v27 = vmul.f32 %v5120_v13, %v5120_v13  ;;  %v1046_v1 = vsel %vm1045_vm12, %v3646_v43, %v1042_v53 }
 0x283   : > { %1141 = vperm.xlu2 %3628, %v1107_v11   ;;  %v1030_v11 = vmul.f32 0.5, %v1029_v55  ;;  %v1114_v56 = vmul.f32 %v1098_v42, %v1046_v1 }
 0x284   : > { %v1313_v63 = vadd.f32 %v4398_v16, %v1201_v18  ;;  %v1776_v16 = vsel %vm750_vm0, %v1740_v27, 0.0  ;;  %v901_v18 = vmul.f32 0.020408163, %v4948_v35 }
 0x285   : > { %v1031_v9 = vsub.f32 1.5, %v1030_v11 }
 0x286   : > { %1329 = vst.msk [vmem:[%s5078_s7 + $0x10] sm:$0xff] %vm750_vm0, %v1313_v63  ;;  %v917_v20 = vadd.f32 0.001, %v901_v18 }
 0x287   : > { %v1032_v27 = vmul.f32 %v3648_v44, %v1031_v9  ;;  %v2693_v9 = vmul.f32 0.020408163, %v5089_v5  ;;  %v1796_v5 = vmul.f32 0.020408163, %v5064_v46 }
 0x288   : > { %1783 = vadd.xlane.f32.xlu0 %v1782_v60  ;;  %3649 = vrsqrt.f32 %v917_v20  ;;  %v1738_v60 = vmul.f32 %v5147_v52, %v5147_v52  ;;  %vm993_vm2 = vweird.f32 %v917_v20 }
 0x28c   : > { %1777 = vadd.xlane.f32.xlu1 %v1776_v16  ;;  %v1036_v16 = vsel %vm1035_vm15, %v3648_v44, %v1032_v27  ;;  %v909_v44 = vmul.f32 0.020408163, %v5051_v37  ;;  %v1713_v27 = vmul.f32 0.020408163, %v5049_v6  ;;  %v1711_v6 = vmul.f32 0.020408163, %v5034_v23 }
 0x28d   : > { %v1113_v62 = vmul.f32 %v1097_v30, %v1036_v16 }
 0x28e   : > { %v3650_v49 = vpop.eup %3649  ;;  %v5167_v18 = vadd.f32 0.001, %v909_v44  ;;  %v5202_v46 = vsub.f32 %v4827_v51, %v1711_v6 }
 0x28f   : > { %v988_v34 = vmul.f32 %v3650_v49, %v917_v20  ;;  %vm994_vm1 = vweird.f32 %v3650_v49 }
 0x290   : > { %vm995_vm3 = vmor %vm993_vm2, %vm994_vm1  ;;  %3651 = vrsqrt.f32 %v5167_v18  ;;  %v1743_v51 = vmul.f32 %v5202_v46, %v5202_v46  ;;  %vm1073_vm5 = vweird.f32 %v5167_v18 }
 0x294   : > { %2673 = vadd.xlane.f32.xlu1 %v2672_v47  ;;  %v1770_v47 = vsel %vm750_vm0, %v1738_v60, 0.0 }
 0x295   : > { %v5139_v29 = vpop.xlane.xlu2 %2652 }
 0x296   : > { %v5188_v16 = vpop.eup %3651 }
 0x297   : > { %vm1074_vm4 = vweird.f32 %v5188_v16 }
 0x298   : > { %vm1075_vm6 = vmor %vm1073_vm5, %vm1074_vm4 }
 0x29c   : > { %1176 = vperm.xlu0 %3627, %v1114_v56  }
 0x29d   : > { %v5143_v63 = vpop.xlane.xlu2 %1762  ;;  %v5149_v43 = vpop.xlane.xlu0 %2658 }
 0x2a5   : > { %v1137_v35 = vpop.permute.xlu2 %1136  ;;  %v5159_v26 = vpop.xlane.xlu0 %1765 }
 0x2a6   : > { %v1202_v61 = vmul.f32 %v1137_v35, %v4679_v58  ;;  %v989_v58 = vmul.f32 %v3650_v49, %v988_v34 }
 0x2a8   : > { %v1314_v45 = vadd.f32 %v4390_v21, %v1202_v61  ;;  %v990_v36 = vmul.f32 0.5, %v989_v58  ;;  %v2610_v21 = vmul.f32 0.020408163, %v5053_v48  ;;  %v5182_v61 = vadd.f32 0.001, %v2693_v9 }
 0x2a9   : > { %v5204_v58 = vadd.f32 0.001, %v1796_v5  ;;  %v1785_v9 = vsel %vm750_vm0, %v1743_v51, 0.0  ;;  %v904_v51 = vmul.f32 0.020408163, %v4957_v54 }
 0x2aa   : > { %1330 = vst.msk [vmem:[%s5078_s7 + $0x18] sm:$0xff] %vm750_vm0, %v1314_v45  ;;  %v991_v53 = vsub.f32 1.5, %v990_v36  ;;  %v5170_v11 = vsub.f32 %v4852_v2, %v2610_v21  ;;  %v5185_v2 = vsub.f32 %v4867_v3, %v1713_v27  ;;  %3653 = vrsqrt.f32 %v5182_v61 }
 0x2ab   : > { %3655 = vrsqrt.f32 %v5204_v58  ;;  %vm2731_vm8 = vweird.f32 %v5182_v61  ;;  %vm1852_vm11 = vweird.f32 %v5204_v58 }
 0x2ac   : > { %1771 = vadd.xlane.f32.xlu2 %v1770_v47  ;;  %v5164_v1 = vpop.xlane.xlu1 %1768  ;;  %v992_v42 = vmul.f32 %v3650_v49, %v991_v53  ;;  %v2642_v20 = vmul.f32 %v5170_v11, %v5170_v11  ;;  %v1745_v45 = vmul.f32 %v5185_v2, %v5185_v2 }
 0x2ad   : > { %1171 = vperm.xlu1 %3626, %v1113_v62   ;;  %v5161_v55 = vpop.xlane.xlu0 %2667  ;;  %v908_v62 = vmul.f32 0.020408163, %v5038_v0 }
 0x2ae   : > { %v996_v56 = vsel %vm995_vm3, %v3650_v49, %v992_v42  ;;  %v2684_v60 = vsel %vm750_vm0, %v2642_v20, 0.0  ;;  %v1068_v49 = vmul.f32 %v5188_v16, %v5167_v18  ;;  %v1791_v53 = vsel %vm750_vm0, %v1745_v45, 0.0 }
 0x2af   : > { %v1109_v48 = vmul.f32 %v1093_v40, %v996_v56  ;;  %v5213_v0 = vadd.f32 0.001, %v908_v62  ;;  %v2605_v18 = vmul.f32 0.020408163, %v4954_v14 }
 0x2b0   : > { %v1069_v36 = vmul.f32 %v5188_v16, %v1068_v49  ;;  %v5211_v44 = vpop.eup %3653 }
 0x2b1   : > { %v2726_v21 = vmul.f32 %v5211_v44, %v5182_v61  ;;  %3657 = vrsqrt.f32 %v5213_v0  ;;  %v5234_v20 = vpop.eup %3655  ;;  %vm2732_vm7 = vweird.f32 %v5211_v44  ;;  %v5268_v14 = vsub.f32 %v4766_v24, %v2605_v18  ;;  %v5996_v61 = vld [vmem:[#allocation40_spill] sm:$0xff] }
 0x2b2   : > { %vm5271_vm9 = vmor %vm2731_vm8, %vm2732_vm7  ;;  %vm1853_vm10 = vweird.f32 %v5234_v20  ;;  %vm1063_vm14 = vweird.f32 %v5213_v0 }
 0x2b3   : > { %v2727_v27 = vmul.f32 %v5211_v44, %v2726_v21  ;;  %vm1854_vm13 = vmor %vm1852_vm11, %vm1853_vm10 }
 0x2b4   : > { %v5180_v35 = vpop.xlane.xlu1 %2664 }
 0x2b5   : > { %v5175_v37 = vpop.xlane.xlu0 %1774  ;;  %v2728_v5 = vmul.f32 0.5, %v2727_v27  ;;  %v2885_v27 = vld [vmem:[%s4939_s29 + $0x100] sm:$0xff] }
 0x2b7   : > { %v2729_v45 = vsub.f32 1.5, %v2728_v5  ;;  %v2637_v5 = vmul.f32 %v5268_v14, %v5268_v14 }
 0x2b9   : > { %v2669_v18 = vsel %vm750_vm0, %v2637_v5, 0.0 }
 0x2c4   : > { %1151 = vperm.xlu2 %3628, %v1109_v48  }
 0x2c6   : > { %2685 = vadd.xlane.f32.xlu0 %v2684_v60  ;;  %v5238_v60 = vpop.eup %3657 }
 0x2c7   : > { %vm1064_vm12 = vweird.f32 %v5238_v60 }
 0x2c8   : > { %v1162_v30 = vpop.permute.xlu0 %1161  ;;  %vm5313_vm15 = vmor %vm1063_vm14, %vm1064_vm12 }
 0x2c9   : > { %v1207_v3 = vmul.f32 %v1162_v30, %v4747_v8  ;;  %v1058_v30 = vmul.f32 %v5238_v60, %v5213_v0 }
 0x2cb   : > { %v1319_v47 = vadd.f32 %v4437_v28, %v1207_v3  ;;  %v2609_v28 = vmul.f32 0.020408163, %v5019_v25 }
 0x2cc   : > { %v1147_v34 = vpop.permute.xlu1 %1146 }
 0x2cd   : > { %v1204_v23 = vmul.f32 %v1147_v34, %v4702_v10  ;;  %1335 = vst.msk [vmem:[%s5078_s7 + $0x40] sm:$0xff] %vm750_vm0, %v1319_v47  ;;  %v1798_v10 = vmul.f32 0.020408163, %v5096_v15  ;;  %v5227_v40 = vsub.f32 %v4834_v38, %v2609_v28  ;;  %v1101_v47 = vld [vmem:[%s4939_s29 + $0x70] sm:$0xff] }
 0x2ce   : > { %1792 = vadd.xlane.f32.xlu0 %v1791_v53 }
 0x2cf   : > { %v1316_v8 = vadd.f32 %v4420_v59, %v1204_v23  ;;  %v1070_v59 = vmul.f32 0.5, %v1069_v36  ;;  %v5229_v25 = vadd.f32 0.001, %v1798_v10  ;;  %v2641_v38 = vmul.f32 %v5227_v40, %v5227_v40 }
 0x2d0   : > { %v1059_v36 = vmul.f32 %v5238_v60, %v1058_v30  ;;  %v2730_v10 = vmul.f32 %v5211_v44, %v2729_v45  ;;  %v1801_v30 = vmul.f32 0.020408163, %v5164_v1  ;;  %v5999_v1 = vld [vmem:[#allocation44_spill] sm:$0xff] }
 0x2d1   : > { %1332 = vst.msk [vmem:[%s5078_s7 + $0x28] sm:$0xff] %vm750_vm0, %v1316_v8  ;;  %v1071_v15 = vsub.f32 1.5, %v1070_v59  ;;  %3659 = vrsqrt.f32 %v5229_v25  ;;  %vm1872_vm2 = vweird.f32 %v5229_v25 }
 0x2d2   : > { %v1060_v59 = vmul.f32 0.5, %v1059_v36  ;;  %v2734_v54 = vsel %vm5271_vm9, %v5211_v44, %v2730_v10 }
 0x2d3   : > { %v1072_v6 = vmul.f32 %v5188_v16, %v1071_v15 }
 0x2d4   : > { %v1157_v42 = vpop.permute.xlu1 %1156 }
 0x2d5   : > { %v1206_v56 = vmul.f32 %v1157_v42, %v4757_v17  ;;  %v2696_v17 = vmul.f32 0.020408163, %v5105_v22  ;;  %v2681_v22 = vsel %vm750_vm0, %v2641_v38, 0.0  ;;  %v1076_v34 = vsel %vm1075_vm6, %v5188_v16, %v1072_v6  ;;  %v5997_v38 = vld [vmem:[#allocation63_spill] sm:$0xff] }
 0x2d6   : > { %v1117_v53 = vmul.f32 %v1101_v47, %v1076_v34  ;;  %v1709_v6 = vmul.f32 0.020408163, %v5997_v38 }
 0x2d7   : > { %v1318_v48 = vadd.f32 %v4378_v7, %v1206_v56  ;;  %1786 = vadd.xlane.f32.xlu1 %v1785_v9  ;;  %v1847_v7 = vmul.f32 %v5234_v20, %v5204_v58  ;;  %v5251_v49 = vadd.f32 0.001, %v2696_v17  ;;  %v5257_v23 = vpop.eup %3659 }
 0x2d8   : > { %v1867_v16 = vmul.f32 %v5257_v23, %v5229_v25  ;;  %v5301_v47 = vsub.f32 %v5999_v1, %v1709_v6  ;;  %vm1873_vm1 = vweird.f32 %v5257_v23 }
 0x2d9   : > { %1334 = vst.msk [vmem:[%s5078_s7 + $0x38] sm:$0xff] %vm750_vm0, %v1318_v48  ;;  %v1848_v3 = vmul.f32 %v5234_v20, %v1847_v7  ;;  %3661 = vrsqrt.f32 %v5251_v49  ;;  %v5284_v48 = vadd.f32 0.001, %v904_v51  ;;  %v1061_v7 = vsub.f32 1.5, %v1060_v59  ;;  %vm1874_vm3 = vmor %vm1872_vm2, %vm1873_vm1 }
 0x2da   : > { %v1868_v9 = vmul.f32 %v5257_v23, %v1867_v16  ;;  %v1988_v16 = vld [vmem:[%s4939_s29 + $0x90] sm:$0xff]  ;;  %v1741_v59 = vmul.f32 %v5301_v47, %v5301_v47  ;;  %vm2761_vm5 = vweird.f32 %v5251_v49 }
 0x2db   : > { %v1849_v28 = vmul.f32 0.5, %v1848_v3  ;;  %v2901_v3 = vmul.f32 %v2885_v27, %v2734_v54  ;;  %v1062_v36 = vmul.f32 %v5238_v60, %v1061_v7  ;;  %v1100_v54 = vld [vmem:[%s4939_s29 + $0x68] sm:$0xff]  ;;  %v1990_v7 = vld [vmem:[%s4939_s29 + $0xa0] sm:$0xff]  ;;  %vm1023_vm11 = vweird.f32 %v5284_v48 }
 0x2dd   : > { %v1850_v56 = vsub.f32 1.5, %v1849_v28 }
 0x2de   : > { %v2662_v62 = vpop.xlane.xlu2 %2661 }
 0x2df   : > { %2682 = vadd.xlane.f32.xlu1 %v2681_v22  ;;  %v2698_v8 = vmul.f32 0.020408163, %v2662_v62  ;;  %v5282_v24 = vpop.eup %3661  ;;  %v5998_v22 = vld [vmem:[#allocation2_spill] sm:$0xff]  ;;  %v1851_v45 = vmul.f32 %v5234_v20, %v1850_v56  ;;  %v1869_v62 = vmul.f32 0.5, %v1868_v9  ;;  %v1066_v9 = vsel %vm5313_vm15, %v5238_v60, %v1062_v36 }
 0x2e0   : > { %v2756_v34 = vmul.f32 %v5282_v24, %v5251_v49  ;;  %vm2762_vm4 = vweird.f32 %v5282_v24 }
 0x2e1   : > { %v5275_v42 = vadd.f32 0.001, %v2698_v8  ;;  %v5307_v8 = vadd.f32 0.001, %v1801_v30  ;;  %v1855_v10 = vsel %vm1854_vm13, %v5234_v20, %v1851_v45  ;;  %vm2763_vm6 = vmor %vm2761_vm5, %vm2762_vm4 }
 0x2e2   : > { %1191 = vperm.xlu0 %3627, %v1117_v53   ;;  %v1870_v53 = vsub.f32 1.5, %v1869_v62  ;;  %v2757_v28 = vmul.f32 %v5282_v24, %v2756_v34  ;;  %v2004_v56 = vmul.f32 %v1988_v16, %v1855_v10 }
 0x2e3   : > { %3663 = vrsqrt.f32 %v5275_v42  ;;  %vm2781_vm9 = vweird.f32 %v5275_v42  ;;  %vm1902_vm14 = vweird.f32 %v5307_v8 }
 0x2e4   : > { %3665 = vrsqrt.f32 %v5284_v48  ;;  %v1871_v20 = vmul.f32 %v5257_v23, %v1870_v53  ;;  %v2758_v0 = vmul.f32 0.5, %v2757_v28 }
 0x2e5   : > { %3667 = vrsqrt.f32 %v5307_v8 }
 0x2e6   : > { %v1142_v15 = vpop.permute.xlu2 %1141  ;;  %v2759_v60 = vsub.f32 1.5, %v2758_v0  ;;  %v1875_v6 = vsel %vm1874_vm3, %v5257_v23, %v1871_v20 }
 0x2e7   : > { %v1203_v17 = vmul.f32 %v1142_v15, %v5996_v61  ;;  %v1779_v61 = vsel %vm750_vm0, %v1741_v59, 0.0  ;;  %v2890_v59 = vld [vmem:[%s4939_s29 + $0x128] sm:$0xff] }
 0x2e9   : > { %v1315_v44 = vadd.f32 %v5998_v22, %v1203_v17  ;;  %v3664_v51 = vpop.eup %3663  ;;  %v1116_v17 = vmul.f32 %v1100_v54, %v1066_v9  ;;  %v2006_v22 = vmul.f32 %v1990_v7, %v1875_v6  ;;  %v1096_v9 = vld [vmem:[%s4939_s29 + $0x48] sm:$0xff]  ;;  %v2612_v7 = vmul.f32 0.020408163, %v5055_v57 }
 0x2ea   : > { %2919 = vperm.xlu0 %3627, %v2901_v3   ;;  %v3666_v21 = vpop.eup %3665  ;;  %v2776_v15 = vmul.f32 %v3664_v51, %v5275_v42  ;;  %vm2782_vm7 = vweird.f32 %v3664_v51 }
 0x2eb   : > { %1331 = vst.msk [vmem:[%s5078_s7 + $0x20] sm:$0xff] %vm750_vm0, %v1315_v44  ;;  %v1018_v27 = vmul.f32 %v3666_v21, %v5284_v48  ;;  %v3668_v5 = vpop.eup %3667  ;;  %v2760_v44 = vmul.f32 %v5282_v24, %v2759_v60  ;;  %vm1024_vm8 = vweird.f32 %v3666_v21  ;;  %vm2783_vm10 = vmor %vm2781_vm9, %vm2782_vm7  ;;  %v6003_v60 = vld [vmem:[#allocation10_spill] sm:$0xff] }
 0x2ec   : > { %v2777_v38 = vmul.f32 %v3664_v51, %v2776_v15  ;;  %v1897_v25 = vmul.f32 %v3668_v5, %v5307_v8  ;;  %vm1025_vm12 = vmor %vm1023_vm11, %vm1024_vm8  ;;  %vm1903_vm13 = vweird.f32 %v3668_v5 }
 0x2ed   : > { %2670 = vadd.xlane.f32.xlu2 %v2669_v18  ;;  %v1019_v30 = vmul.f32 %v3666_v21, %v1018_v27  ;;  %v2764_v1 = vsel %vm2763_vm6, %v5282_v24, %v2760_v44  ;;  %v2888_v18 = vld [vmem:[%s4939_s29 + $0x118] sm:$0xff]  ;;  %vm1904_vm15 = vmor %vm1902_vm14, %vm1903_vm13  ;;  %v1794_v27 = vmul.f32 0.020408163, %v5068_v33  ;;  %v1797_v33 = vmul.f32 0.020408163, %v5094_v31 }
 0x2ee   : > { %v2778_v3 = vmul.f32 0.5, %v2777_v38  ;;  %v1898_v23 = vmul.f32 %v3668_v5, %v1897_v25  ;;  %v2904_v53 = vmul.f32 %v2888_v18, %v2764_v1 }
 0x2ef   : > { %v1020_v45 = vmul.f32 0.5, %v1019_v30  ;;  %v1810_v6 = vadd.f32 0.001, %v1794_v27 }
 0x2f0   : > { %v2779_v34 = vsub.f32 1.5, %v2778_v3  ;;  %v1899_v28 = vmul.f32 0.5, %v1898_v23 }
 0x2f1   : > { %v1021_v36 = vsub.f32 1.5, %v1020_v45  ;;  %3669 = vrsqrt.f32 %v1810_v6  ;;  %v6005_v45 = vld [vmem:[#allocation45_spill] sm:$0xff]  ;;  %vm1832_vm2 = vweird.f32 %v1810_v6 }
 0x2f2   : > { %2030 = vperm.xlu0 %3627, %v2004_v56   ;;  %v2780_v10 = vmul.f32 %v3664_v51, %v2779_v34  ;;  %v1900_v16 = vsub.f32 1.5, %v1899_v28  ;;  %v2695_v34 = vmul.f32 0.020408163, %v5139_v29  ;;  %v1800_v29 = vmul.f32 0.020408163, %v5159_v26 }
 0x2f3   : > { %v5336_v62 = vpop.xlane.xlu0 %2676  ;;  %v1022_v49 = vmul.f32 %v3666_v21, %v1021_v36  ;;  %v6006_v36 = vld [vmem:[#allocation3_spill] sm:$0xff] }
 0x2f4   : > { %v2784_v58 = vsel %vm2783_vm10, %v3664_v51, %v2780_v10  ;;  %v1901_v0 = vmul.f32 %v3668_v5, %v1900_v16  ;;  %v1993_v51 = vld [vmem:[%s4939_s29 + $0xb8] sm:$0xff]  ;;  %v2608_v16 = vmul.f32 0.020408163, %v5007_v19  ;;  %v5387_v27 = vadd.f32 0.001, %v1800_v29 }
 0x2f5   : > { %1780 = vadd.xlane.f32.xlu2 %v1779_v61  ;;  %v1026_v56 = vsel %vm1025_vm12, %v3666_v21, %v1022_v49  ;;  %v2906_v20 = vmul.f32 %v2890_v59, %v2784_v58  ;;  %v6002_v61 = vld [vmem:[#allocation43_spill] sm:$0xff]  ;;  %v6007_v58 = vld [vmem:[#allocation41_spill] sm:$0xff] }
 0x2f6   : > { %v1112_v15 = vmul.f32 %v1096_v9, %v1026_v56  ;;  %v1905_v48 = vsel %vm1904_vm15, %v3668_v5, %v1901_v0  ;;  %v6004_v5 = vld [vmem:[#allocation55_spill] sm:$0xff]  ;;  %vm1892_vm11 = vweird.f32 %v5387_v27 }
 0x2f7   : > { %v5359_v30 = vsub.f32 %v6004_v5, %v2612_v7  ;;  %v3670_v25 = vpop.eup %3669 }
 0x2f8   : > { %1186 = vperm.xlu1 %3626, %v1116_v17   ;;  %v2009_v17 = vmul.f32 %v1993_v51, %v1905_v48  ;;  %v1827_v18 = vmul.f32 %v3670_v25, %v1810_v6  ;;  %v6010_v51 = vld [vmem:[#allocation46_spill] sm:$0xff]  ;;  %vm1833_vm1 = vweird.f32 %v3670_v25  ;;  %v1803_v6 = vmul.f32 0.020408163, %v5175_v37 }
 0x2f9   : > { %v2644_v44 = vmul.f32 %v5359_v30, %v5359_v30  ;;  %vm1834_vm3 = vmor %vm1832_vm2, %vm1833_vm1 }
 0x2fa   : > { %2040 = vperm.xlu0 %3627, %v2006_v22   ;;  %v5362_v22 = vadd.f32 0.001, %v1797_v33  ;;  %v1828_v28 = vmul.f32 %v3670_v25, %v1827_v18  ;;  %v5424_v37 = vadd.f32 0.001, %v1803_v6 }
 0x2fb   : > { %v5343_v24 = vpop.xlane.xlu0 %1783  ;;  %v2690_v1 = vsel %vm750_vm0, %v2644_v44, 0.0 }
 0x2fc   : > { %3671 = vrsqrt.f32 %v5362_v22  ;;  %v1829_v56 = vmul.f32 0.5, %v1828_v28  ;;  %vm1862_vm5 = vweird.f32 %v5362_v22 }
 0x2fe   : > { %v1830_v19 = vsub.f32 1.5, %v1829_v56 }
 0x2ff   : > { %v5347_v42 = vpop.xlane.xlu1 %1777 }
 0x300   : > { %v1831_v5 = vmul.f32 %v3670_v25, %v1830_v19 }
 0x302   : > { %2934 = vperm.xlu0 %3627, %v2904_v53   ;;  %v5375_v53 = vadd.f32 0.001, %v2695_v34  ;;  %v3672_v10 = vpop.eup %3671  ;;  %v1835_v18 = vsel %vm1834_vm3, %v3670_v25, %v1831_v5 }
 0x303   : > { %v1857_v9 = vmul.f32 %v3672_v10, %v5362_v22  ;;  %vm1863_vm4 = vweird.f32 %v3672_v10 }
 0x304   : > { %3673 = vrsqrt.f32 %v5375_v53  ;;  %vm1864_vm6 = vmor %vm1862_vm5, %vm1863_vm4  ;;  %vm2751_vm8 = vweird.f32 %v5375_v53  ;;  %vm1922_vm5 = vweird.f32 %v5424_v37 }
 0x305   : > { %3675 = vrsqrt.f32 %v5387_v27 }
 0x307   : > { %v5356_v8 = vpop.xlane.xlu1 %2673 }
 0x308   : > { %v2702_v22 = vmul.f32 0.020408163, %v5356_v8 }
 0x30a   : > { %2944 = vperm.xlu0 %3627, %v2906_v20   ;;  %v6008_v20 = vld [vmem:[#allocation4_spill] sm:$0xff] }
 0x30d   : > { %1166 = vperm.xlu2 %3628, %v1112_v15   ;;  %v6009_v15 = vld [vmem:[#allocation69_spill] sm:$0xff] }
 0x30e   : > { %v1177_v54 = vpop.permute.xlu0 %1176  ;;  %v907_v48 = vmul.f32 0.020408163, %v6009_v15 }
 0x30f   : > { %v1210_v21 = vmul.f32 %v1177_v54, %v6002_v61  ;;  %v5385_v54 = vsub.f32 %v6010_v51, %v2608_v16  ;;  %v1858_v61 = vmul.f32 %v3672_v10, %v1857_v9 }
 0x310   : > { %v5393_v26 = vadd.f32 0.001, %v907_v48  ;;  %v1989_v48 = vld [vmem:[%s4939_s29 + $0x98] sm:$0xff] }
 0x311   : > { %v1322_v38 = vadd.f32 %v6003_v60, %v1210_v21  ;;  %v5391_v21 = vpop.eup %3673  ;;  %v6011_v60 = vld [vmem:[#allocation72_spill] sm:$0xff]  ;;  %v2640_v7 = vmul.f32 %v5385_v54, %v5385_v54  ;;  %v1859_v33 = vmul.f32 0.5, %v1858_v61 }
 0x312   : > { %2055 = vperm.xlu0 %3627, %v2009_v17   ;;  %v2699_v17 = vmul.f32 0.020408163, %v5180_v35  ;;  %v2746_v44 = vmul.f32 %v5391_v21, %v5375_v53  ;;  %3677 = vrsqrt.f32 %v5393_v26  ;;  %v6012_v35 = vld [vmem:[#allocation49_spill] sm:$0xff]  ;;  %vm2752_vm7 = vweird.f32 %v5391_v21 }
 0x313   : > { %1338 = vst.msk [vmem:[%s5078_s7 + $0x58] sm:$0xff] %vm750_vm0, %v1322_v38  ;;  %v1712_v38 = vmul.f32 0.020408163, %v6011_v60  ;;  %vm2753_vm9 = vmor %vm2751_vm8, %vm2752_vm7  ;;  %vm1053_vm14 = vweird.f32 %v5393_v26 }
 0x314   : > { %v2747_v34 = vmul.f32 %v5391_v21, %v2746_v44  ;;  %v2887_v44 = vld [vmem:[%s4939_s29 + $0x110] sm:$0xff] }
 0x31f   : > { %v1172_v3 = vpop.permute.xlu1 %1171  ;;  %v5367_v23 = vpop.xlane.xlu2 %1771 }
 0x320   : > { %v1209_v57 = vmul.f32 %v1172_v3, %v6005_v45  ;;  %v5403_v3 = vadd.f32 0.001, %v2699_v17  ;;  %v5406_v45 = vsub.f32 %v6012_v35, %v1712_v38 }
 0x322   : > { %v1321_v31 = vadd.f32 %v6006_v36, %v1209_v57  ;;  %2691 = vadd.xlane.f32.xlu1 %v2690_v1  ;;  %v1860_v57 = vsub.f32 1.5, %v1859_v33  ;;  %v2678_v1 = vsel %vm750_vm0, %v2640_v7, 0.0  ;;  %v1986_v36 = vld [vmem:[%s4939_s29 + $0x80] sm:$0xff]  ;;  %3679 = vrsqrt.f32 %v5403_v3 }
 0x323   : > { %v2002_v28 = vmul.f32 %v1986_v36, %v1835_v18  ;;  %3681 = vrsqrt.f32 %v5424_v37  ;;  %v5442_v7 = vadd.f32 0.001, %v2702_v22  ;;  %vm2791_vm2 = vweird.f32 %v5403_v3 }
 0x324   : > { %1337 = vst.msk [vmem:[%s5078_s7 + $0x50] sm:$0xff] %vm750_vm0, %v1321_v31  ;;  %v5411_v31 = vpop.eup %3675  ;;  %v1861_v29 = vmul.f32 %v3672_v10, %v1860_v57  ;;  %v1806_v57 = vmul.f32 0.020408163, %v5343_v24 }
 0x325   : > { %v5417_v16 = vpop.eup %3677  ;;  %v1887_v25 = vmul.f32 %v5411_v31, %v5387_v27  ;;  %3683 = vrsqrt.f32 %v5442_v7  ;;  %vm1893_vm10 = vweird.f32 %v5411_v31  ;;  %vm2821_vm8 = vweird.f32 %v5442_v7 }
 0x326   : > { %v1865_v15 = vsel %vm1864_vm6, %v3672_v10, %v1861_v29  ;;  %vm1894_vm12 = vmor %vm1892_vm11, %vm1893_vm10  ;;  %vm1054_vm13 = vweird.f32 %v5417_v16 }
 0x327   : > { %v1152_v49 = vpop.permute.xlu2 %1151  ;;  %v2005_v19 = vmul.f32 %v1989_v48, %v1865_v15  ;;  %vm1055_vm15 = vmor %vm1053_vm14, %vm1054_vm13  ;;  %v1099_v48 = vld [vmem:[%s4939_s29 + $0x60] sm:$0xff] }
 0x328   : > { %v1205_v59 = vmul.f32 %v1152_v49, %v6007_v58  ;;  %v1744_v49 = vmul.f32 %v5406_v45, %v5406_v45  ;;  %v2748_v58 = vmul.f32 0.5, %v2747_v34  ;;  %v5426_v56 = vpop.eup %3679 }
 0x329   : > { %v2786_v51 = vmul.f32 %v5426_v56, %v5403_v3  ;;  %v5446_v35 = vpop.eup %3681  ;;  %vm2792_vm1 = vweird.f32 %v5426_v56  ;;  %v1804_v3 = vmul.f32 0.020408163, %v5347_v42 }
 0x32a   : > { %v1317_v0 = vadd.f32 %v6008_v20, %v1205_v59  ;;  %v1048_v59 = vmul.f32 %v5417_v16, %v5393_v26  ;;  %v2749_v9 = vsub.f32 1.5, %v2748_v58  ;;  %v1888_v20 = vmul.f32 %v5411_v31, %v1887_v25  ;;  %v1992_v25 = vld [vmem:[%s4939_s29 + $0xb0] sm:$0xff]  ;;  %vm2793_vm3 = vmor %vm2791_vm2, %vm2792_vm1 }
 0x32b   : > { %v2787_v38 = vmul.f32 %v5426_v56, %v2786_v51  ;;  %v1917_v36 = vmul.f32 %v5446_v35, %v5424_v37  ;;  %vm1923_vm4 = vweird.f32 %v5446_v35  ;;  %v5493_v42 = vadd.f32 0.001, %v1804_v3 }
 0x32c   : > { %1333 = vst.msk [vmem:[%s5078_s7 + $0x30] sm:$0xff] %vm750_vm0, %v1317_v0  ;;  %v1788_v0 = vsel %vm750_vm0, %v1744_v49, 0.0  ;;  %v1049_v61 = vmul.f32 %v5417_v16, %v1048_v59  ;;  %v2750_v17 = vmul.f32 %v5391_v21, %v2749_v9  ;;  %v1889_v60 = vmul.f32 0.5, %v1888_v20  ;;  %v5464_v59 = vpop.eup %3683  ;;  %vm1924_vm6 = vmor %vm1922_vm5, %vm1923_vm4 }
 0x32d   : > { %v2788_v34 = vmul.f32 0.5, %v2787_v38  ;;  %v1918_v49 = vmul.f32 %v5446_v35, %v1917_v36  ;;  %vm2822_vm7 = vweird.f32 %v5464_v59 }
 0x32e   : > { %v1050_v5 = vmul.f32 0.5, %v1049_v61  ;;  %v1890_v8 = vsub.f32 1.5, %v1889_v60  ;;  %v2754_v33 = vsel %vm2753_vm9, %v5391_v21, %v2750_v17  ;;  %v5457_v21 = vadd.f32 0.001, %v1806_v57  ;;  %v2891_v61 = vld [vmem:[%s4939_s29 + $0x130] sm:$0xff]  ;;  %vm2823_vm9 = vmor %vm2821_vm8, %vm2822_vm7 }
 0x32f   : > { %v2903_v53 = vmul.f32 %v2887_v44, %v2754_v33  ;;  %v2789_v24 = vsub.f32 1.5, %v2788_v34  ;;  %v1919_v20 = vmul.f32 0.5, %v1918_v49 }
 0x330   : > { %v1891_v18 = vmul.f32 %v5411_v31, %v1890_v8  ;;  %3685 = vrsqrt.f32 %v5457_v21  ;;  %vm1952_vm11 = vweird.f32 %v5457_v21 }
 0x331   : > { %v2790_v27 = vmul.f32 %v5426_v56, %v2789_v24  ;;  %v1920_v60 = vsub.f32 1.5, %v1919_v20 }
 0x332   : > { %v1895_v58 = vsel %vm1894_vm12, %v5411_v31, %v1891_v18 }
 0x333   : > { %v2008_v9 = vmul.f32 %v1992_v25, %v1895_v58  ;;  %v6015_v25 = vld [vmem:[#allocation56_spill] sm:$0xff] }
 0x336   : > { %2679 = vadd.xlane.f32.xlu2 %v2678_v1  ;;  %v1051_v1 = vsub.f32 1.5, %v1050_v5  ;;  %v5479_v17 = vpop.eup %3685 }
 0x337   : > { %v1947_v44 = vmul.f32 %v5479_v17, %v5457_v21  ;;  %vm1953_vm10 = vweird.f32 %v5479_v17 }
 0x338   : > { %vm5538_vm12 = vmor %vm1952_vm11, %vm1953_vm10 }
 0x339   : > { %v5439_v10 = vpop.xlane.xlu0 %2685  ;;  %v1948_v18 = vmul.f32 %v5479_v17, %v1947_v44 }
 0x33b   : > { %2020 = vperm.xlu1 %3626, %v2002_v28   ;;  %v1052_v28 = vmul.f32 %v5417_v16, %v1051_v1  ;;  %v1949_v37 = vmul.f32 0.5, %v1948_v18  ;;  %v6019_v18 = vld [vmem:[#allocation50_spill] sm:$0xff] }
 0x33d   : > { %v1056_v31 = vsel %vm1055_vm15, %v5417_v16, %v1052_v28  ;;  %v6013_v16 = vld [vmem:[#allocation48_spill] sm:$0xff] }
 0x33e   : > { %1789 = vadd.xlane.f32.xlu2 %v1788_v0  ;;  %v2816_v0 = vmul.f32 %v5464_v59, %v5442_v7  ;;  %v1115_v22 = vmul.f32 %v1099_v48, %v1056_v31 }
 0x340   : > { %v2817_v38 = vmul.f32 %v5464_v59, %v2816_v0 }
 0x341   : > { %v1793_v29 = vpop.xlane.xlu0 %1792 }
 0x342   : > { %v1809_v57 = vmul.f32 0.020408163, %v1793_v29  ;;  %v2818_v1 = vmul.f32 0.5, %v2817_v38  ;;  %v1995_v29 = vld [vmem:[%s4939_s29 + $0xc8] sm:$0xff] }
 0x343   : > { %2035 = vperm.xlu1 %3626, %v2005_v19   ;;  %v2794_v19 = vsel %vm2793_vm3, %v5426_v56, %v2790_v27  ;;  %v6014_v56 = vld [vmem:[#allocation13_spill] sm:$0xff] }
 0x344   : > { %v2907_v33 = vmul.f32 %v2891_v61, %v2794_v19  ;;  %v5496_v36 = vadd.f32 0.001, %v1809_v57  ;;  %v2819_v24 = vsub.f32 1.5, %v2818_v1  ;;  %v1950_v19 = vsub.f32 1.5, %v1949_v37 }
 0x346   : > { %v2820_v31 = vmul.f32 %v5464_v59, %v2819_v24  ;;  %vm1982_vm8 = vweird.f32 %v5496_v36 }
 0x348   : > { %v2824_v38 = vsel %vm2823_vm9, %v5464_v59, %v2820_v31 }
 0x34a   : > { %v5454_v6 = vpop.xlane.xlu1 %1786 }
 0x34b   : > { %2929 = vperm.xlu1 %3626, %v2903_v53   ;;  %v1921_v53 = vmul.f32 %v5446_v35, %v1920_v60 }
 0x34d   : > { %v1925_v49 = vsel %vm1924_vm6, %v5446_v35, %v1921_v53  ;;  %vm1932_vm6 = vweird.f32 %v5493_v42 }
 0x352   : > { %v2683_v15 = vpop.xlane.xlu1 %2682 }
 0x353   : > { %v2705_v26 = vmul.f32 0.020408163, %v2683_v15  ;;  %2050 = vperm.xlu1 %3626, %v2008_v9   ;;  %v6016_v9 = vld [vmem:[#allocation31_spill] sm:$0xff]  ;;  %v2011_v15 = vmul.f32 %v1995_v29, %v1925_v49  ;;  %v6020_v49 = vld [vmem:[#allocation74_spill] sm:$0xff] }
 0x354   : > { %v1192_v5 = vpop.permute.xlu0 %1191  ;;  %v910_v29 = vmul.f32 0.020408163, %v6020_v49 }
 0x355   : > { %v5475_v51 = vadd.f32 0.001, %v2705_v26  ;;  %v1213_v8 = vmul.f32 %v1192_v5, %v6013_v16  ;;  %v2894_v5 = vld [vmem:[%s4939_s29 + $0x148] sm:$0xff] }
 0x356   : > { %1181 = vperm.xlu2 %3628, %v1115_v22  }
 0x357   : > { %3687 = vrsqrt.f32 %v5475_v51  ;;  %v1325_v34 = vadd.f32 %v6014_v56, %v1213_v8  ;;  %v6017_v8 = vld [vmem:[#allocation57_spill] sm:$0xff]  ;;  %v2910_v56 = vmul.f32 %v2894_v5, %v2824_v38  ;;  %vm2851_vm15 = vweird.f32 %v5475_v51 }
 0x358   : > { %3689 = vrsqrt.f32 %v5493_v42 }
 0x359   : > { %1341 = vst.msk [vmem:[%s5078_s7 + $0x70] sm:$0xff] %vm750_vm0, %v1325_v34  ;;  %3691 = vrsqrt.f32 %v5496_v36  ;;  %v1951_v34 = vmul.f32 %v5479_v17, %v1950_v19  ;;  %v6024_v19 = vld [vmem:[#allocation60_spill] sm:$0xff] }
 0x35b   : > { %2949 = vperm.xlu1 %3626, %v2907_v33   ;;  %v6018_v33 = vld [vmem:[#allocation14_spill] sm:$0xff] }
 0x35c   : > { %v2920_v28 = vpop.permute.xlu0 %2919 }
 0x35d   : > { %v5500_v58 = vpop.eup %3687  ;;  %v2997_v27 = vmul.f32 %v2920_v28, %v6015_v25 }
 0x35e   : > { %v2846_v35 = vmul.f32 %v5500_v58, %v5475_v51  ;;  %v5515_v22 = vpop.eup %3689  ;;  %vm2852_vm13 = vweird.f32 %v5500_v58 }
 0x35f   : > { %v3109_v20 = vadd.f32 %v6016_v9, %v2997_v27  ;;  %v5521_v16 = vpop.eup %3691  ;;  %v1927_v7 = vmul.f32 %v5515_v22, %v5493_v42  ;;  %v6023_v9 = vld [vmem:[#allocation5_spill] sm:$0xff]  ;;  %vm5564_vm1 = vmor %vm2851_vm15, %vm2852_vm13  ;;  %vm1933_vm4 = vweird.f32 %v5515_v22 }
 0x360   : > { %v2671_v0 = vpop.xlane.xlu2 %2670  ;;  %v2847_v61 = vmul.f32 %v5500_v58, %v2846_v35  ;;  %v1977_v59 = vmul.f32 %v5521_v16, %v5496_v36  ;;  %v1955_v35 = vsel %vm5538_vm12, %v5479_v17, %v1951_v34  ;;  %v6026_v17 = vld [vmem:[#allocation42_spill] sm:$0xff]  ;;  %vm1983_vm5 = vweird.f32 %v5521_v16  ;;  %vm1934_vm7 = vmor %vm1932_vm6, %vm1933_vm4 }
 0x361   : > { %v2701_v48 = vmul.f32 0.020408163, %v2671_v0  ;;  %3125 = vst.msk [vmem:[%s5078_s7 + $0x100] sm:$0xff] %vm750_vm0, %v3109_v20  ;;  %v1928_v27 = vmul.f32 %v5515_v22, %v1927_v7  ;;  %vm1984_vm9 = vmor %vm1982_vm8, %vm1983_vm5 }
 0x362   : > { %v2848_v53 = vmul.f32 0.5, %v2847_v61  ;;  %v1978_v0 = vmul.f32 %v5521_v16, %v1977_v59  ;;  %v6027_v59 = vld [vmem:[#allocation73_spill] sm:$0xff] }
 0x363   : > { %2065 = vperm.xlu1 %3626, %v2011_v15   ;;  %v5513_v26 = vadd.f32 0.001, %v2701_v48  ;;  %v1998_v48 = vld [vmem:[%s4939_s29 + $0xe0] sm:$0xff]  ;;  %v1929_v38 = vmul.f32 0.5, %v1928_v27 }
 0x364   : > { %v2031_v60 = vpop.permute.xlu0 %2030  ;;  %v2849_v15 = vsub.f32 1.5, %v2848_v53  ;;  %v2611_v53 = vmul.f32 0.020408163, %v6027_v59  ;;  %v2893_v27 = vld [vmem:[%s4939_s29 + $0x140] sm:$0xff] }
 0x365   : > { %3693 = vrsqrt.f32 %v5513_v26  ;;  %v2100_v3 = vmul.f32 %v2031_v60, %v6017_v8  ;;  %v5553_v60 = vadd.f32 0.001, %v910_v29  ;;  %v6025_v8 = vld [vmem:[#allocation19_spill] sm:$0xff]  ;;  %v1930_v49 = vsub.f32 1.5, %v1929_v38 }
 0x366   : > { %vm2811_vm2 = vweird.f32 %v5513_v26 }
 0x367   : > { %v2212_v44 = vadd.f32 %v6018_v33, %v2100_v3  ;;  %v2014_v33 = vmul.f32 %v1998_v48, %v1955_v35  ;;  %3695 = vrsqrt.f32 %v5553_v60  ;;  %vm1083_vm11 = vweird.f32 %v5553_v60 }
 0x368   : > { %v5527_v57 = vpop.xlane.xlu2 %1780 }
 0x369   : > { %2228 = vst.msk [vmem:[%s5078_s7 + $0x90] sm:$0xff] %vm750_vm0, %v2212_v44  ;;  %v1979_v44 = vmul.f32 0.5, %v1978_v0  ;;  %v2897_v0 = vld [vmem:[%s4939_s29 + $0x160] sm:$0xff] }
 0x36a   : > { %v1187_v1 = vpop.permute.xlu1 %1186 }
 0x36b   : > { %v1212_v24 = vmul.f32 %v1187_v1, %v6019_v18  ;;  %2964 = vperm.xlu1 %3626, %v2910_v56   ;;  %v3694_v28 = vpop.eup %3693  ;;  %v2850_v56 = vmul.f32 %v5500_v58, %v2849_v15  ;;  %v6028_v18 = vld [vmem:[#allocation6_spill] sm:$0xff]  ;;  %v6031_v15 = vld [vmem:[#allocation51_spill] sm:$0xff] }
 0x36c   : > { %v2806_v37 = vmul.f32 %v3694_v28, %v5513_v26  ;;  %v2041_v31 = vpop.permute.xlu0 %2040  ;;  %vm2812_vm14 = vweird.f32 %v3694_v28  ;;  %v6032_v26 = vld [vmem:[#allocation61_spill] sm:$0xff] }
 0x36d   : > { %v1324_v20 = vadd.f32 %v6023_v9, %v1212_v24  ;;  %v2102_v61 = vmul.f32 %v2041_v31, %v6024_v19  ;;  %v1980_v9 = vsub.f32 1.5, %v1979_v44  ;;  %vm2813_vm3 = vmor %vm2811_vm2, %vm2812_vm14  ;;  %v5579_v31 = vsub.f32 %v6031_v15, %v2611_v53  ;;  %v6033_v19 = vld [vmem:[#allocation34_spill] sm:$0xff]  ;;  %v6034_v53 = vld [vmem:[#allocation32_spill] sm:$0xff] }
 0x36e   : > { %v2807_v21 = vmul.f32 %v3694_v28, %v2806_v37  ;;  %v1795_v37 = vmul.f32 0.020408163, %v5070_v50  ;;  %v1931_v50 = vmul.f32 %v5515_v22, %v1930_v49 }
 0x36f   : > { %1340 = vst.msk [vmem:[%s5078_s7 + $0x68] sm:$0xff] %vm750_vm0, %v1324_v20  ;;  %v2214_v3 = vadd.f32 %v6025_v8, %v2102_v61  ;;  %v2854_v20 = vsel %vm5564_vm1, %v5500_v58, %v2850_v56  ;;  %v1981_v58 = vmul.f32 %v5521_v16, %v1980_v9  ;;  %v3696_v8 = vpop.eup %3695  ;;  %v2001_v56 = vld [vmem:[%s4939_s29 + $0xf8] sm:$0xff] }
 0x370   : > { %v2808_v5 = vmul.f32 0.5, %v2807_v21  ;;  %v1167_v7 = vpop.permute.xlu2 %1166  ;;  %v2913_v38 = vmul.f32 %v2897_v0, %v2854_v20  ;;  %vm1084_vm10 = vweird.f32 %v3696_v8 }
 0x371   : > { %v1208_v34 = vmul.f32 %v1167_v7, %v6026_v17  ;;  %2230 = vst.msk [vmem:[%s5078_s7 + $0xa0] sm:$0xff] %vm750_vm0, %v2214_v3  ;;  %v2694_v3 = vmul.f32 0.020408163, %v5082_v32  ;;  %v1935_v7 = vsel %vm1934_vm7, %v5515_v22, %v1931_v50  ;;  %v1985_v44 = vsel %vm1984_vm9, %v5521_v16, %v1981_v58  ;;  %vm1085_vm12 = vmor %vm1083_vm11, %vm1084_vm10 }
 0x372   : > { %v2809_v1 = vsub.f32 1.5, %v2808_v5  ;;  %v5585_v5 = vadd.f32 0.001, %v1795_v37  ;;  %v1078_v17 = vmul.f32 %v3696_v8, %v5553_v60  ;;  %v6036_v37 = vld [vmem:[#allocation22_spill] sm:$0xff] }
 0x373   : > { %2080 = vperm.xlu1 %3626, %v2014_v33   ;;  %v1320_v24 = vadd.f32 %v6028_v18, %v1208_v34  ;;  %v1996_v33 = vld [vmem:[%s4939_s29 + $0xd0] sm:$0xff]  ;;  %v5604_v32 = vadd.f32 0.001, %v2694_v3 }
 0x374   : > { %v2810_v25 = vmul.f32 %v3694_v28, %v2809_v1  ;;  %v2935_v51 = vpop.permute.xlu0 %2934  ;;  %3697 = vrsqrt.f32 %v5585_v5  ;;  %v2012_v36 = vmul.f32 %v1996_v33, %v1935_v7  ;;  %v2017_v1 = vmul.f32 %v2001_v56, %v1985_v44 }
 0x375   : > { %1336 = vst.msk [vmem:[%s5078_s7 + $0x48] sm:$0xff] %vm750_vm0, %v1320_v24  ;;  %v3000_v35 = vmul.f32 %v2935_v51, %v6032_v26  ;;  %v1079_v18 = vmul.f32 %v3696_v8, %v1078_v17  ;;  %3699 = vrsqrt.f32 %v5604_v32  ;;  %v2697_v26 = vmul.f32 0.020408163, %v5149_v43 }
 0x376   : > { %v2814_v48 = vsel %vm2813_vm3, %v3694_v28, %v2810_v25  ;;  %v2643_v28 = vmul.f32 %v5579_v31, %v5579_v31  ;;  %v6035_v25 = vld [vmem:[#allocation67_spill] sm:$0xff]  ;;  %v1802_v43 = vmul.f32 0.020408163, %v5367_v23  ;;  %vm1842_vm14 = vweird.f32 %v5585_v5 }
 0x377   : > { %v2909_v21 = vmul.f32 %v2893_v27, %v2814_v48  ;;  %v3112_v61 = vadd.f32 %v6033_v19, %v3000_v35  ;;  %v1080_v49 = vmul.f32 0.5, %v1079_v18  ;;  %vm2741_vm2 = vweird.f32 %v5604_v32 }
 0x378   : > { %v2687_v59 = vsel %vm750_vm0, %v2643_v28, 0.0 }
 0x379   : > { %2959 = vperm.xlu0 %3627, %v2909_v21   ;;  %3128 = vst.msk [vmem:[%s5078_s7 + $0x118] sm:$0xff] %vm750_vm0, %v3112_v61  ;;  %v1081_v0 = vsub.f32 1.5, %v1080_v49  ;;  %v5621_v21 = vadd.f32 0.001, %v2697_v26 }
 0x37a   : > { %v3698_v16 = vpop.eup %3697 }
 0x37b   : > { %2979 = vperm.xlu1 %3626, %v2913_v38   ;;  %v1837_v29 = vmul.f32 %v3698_v16, %v5585_v5  ;;  %v3700_v20 = vpop.eup %3699  ;;  %v1082_v35 = vmul.f32 %v3696_v8, %v1081_v0  ;;  %v1102_v38 = vld [vmem:[%s4939_s29 + $0x78] sm:$0xff]  ;;  %vm1843_vm13 = vweird.f32 %v3698_v16  ;;  %v2700_v5 = vmul.f32 0.020408163, %v5161_v55 }
 0x37c   : > { %v2945_v42 = vpop.permute.xlu0 %2944  ;;  %vm1844_vm15 = vmor %vm1842_vm14, %vm1843_vm13  ;;  %vm2742_vm1 = vweird.f32 %v3700_v20  ;;  %vm2771_vm11 = vweird.f32 %v5621_v21 }
 0x37d   : > { %v3002_v34 = vmul.f32 %v2945_v42, %v5087_v4  ;;  %v1799_v4 = vmul.f32 0.020408163, %v5143_v63  ;;  %v1838_v15 = vmul.f32 %v3698_v16, %v1837_v29  ;;  %v2736_v63 = vmul.f32 %v3700_v20, %v5604_v32  ;;  %vm2743_vm3 = vmor %vm2741_vm2, %vm2742_vm1 }
 0x37e   : > { %v1086_v61 = vsel %vm1085_vm12, %v3696_v8, %v1082_v35  ;;  %v5632_v8 = vadd.f32 0.001, %v1802_v43  ;;  %v5645_v49 = vadd.f32 0.001, %v2700_v5 }
 0x37f   : > { %2688 = vadd.xlane.f32.xlu2 %v2687_v59  ;;  %v3114_v22 = vadd.f32 %v6034_v53, %v3002_v34  ;;  %v5614_v51 = vadd.f32 0.001, %v1799_v4  ;;  %v1839_v48 = vmul.f32 0.5, %v1838_v15  ;;  %v2737_v50 = vmul.f32 %v3700_v20, %v2736_v63  ;;  %v1987_v59 = vld [vmem:[%s4939_s29 + $0x88] sm:$0xff] }
 0x380   : > { %v1118_v33 = vmul.f32 %v1102_v38, %v1086_v61  ;;  %v1807_v4 = vmul.f32 0.020408163, %v5454_v6  ;;  %vm1912_vm14 = vweird.f32 %v5632_v8 }
 0x381   : > { %2070 = vperm.xlu0 %3627, %v2012_v36   ;;  %3130 = vst.msk [vmem:[%s5078_s7 + $0x128] sm:$0xff] %vm750_vm0, %v3114_v22  ;;  %3701 = vrsqrt.f32 %v5614_v51  ;;  %v1840_v19 = vsub.f32 1.5, %v1839_v48  ;;  %v2738_v3 = vmul.f32 0.5, %v2737_v50  ;;  %vm1882_vm6 = vweird.f32 %v5614_v51 }
 0x382   : > { %3703 = vrsqrt.f32 %v5621_v21 }
 0x383   : > { %2095 = vperm.xlu1 %3626, %v2017_v1   ;;  %v1841_v42 = vmul.f32 %v3698_v16, %v1840_v19  ;;  %v2739_v23 = vsub.f32 1.5, %v2738_v3  ;;  %v2900_v19 = vld [vmem:[%s4939_s29 + $0x178] sm:$0xff]  ;;  %v1991_v3 = vld [vmem:[%s4939_s29 + $0xa8] sm:$0xff] }
 0x384   : > { %v2056_v24 = vpop.permute.xlu0 %2055 }
 0x385   : > { %v2105_v27 = vmul.f32 %v2056_v24, %v6035_v25  ;;  %v1845_v34 = vsel %vm1844_vm15, %v3698_v16, %v1841_v42  ;;  %v2740_v53 = vmul.f32 %v3700_v20, %v2739_v23  ;;  %v2886_v25 = vld [vmem:[%s4939_s29 + $0x108] sm:$0xff] }
 0x386   : > { %v2003_v22 = vmul.f32 %v1987_v59, %v1845_v34 }
 0x387   : > { %v2217_v9 = vadd.f32 %v6036_v37, %v2105_v27  ;;  %v5625_v58 = vpop.eup %3701  ;;  %v2744_v29 = vsel %vm2743_vm3, %v3700_v20, %v2740_v53  ;;  %v1805_v20 = vmul.f32 0.020408163, %v5527_v57 }
 0x388   : > { %v1877_v60 = vmul.f32 %v5625_v58, %v5614_v51  ;;  %v5634_v56 = vpop.eup %3703  ;;  %v2902_v32 = vmul.f32 %v2886_v25, %v2744_v29  ;;  %vm1883_vm4 = vweird.f32 %v5625_v58  ;;  %v3027_v25 = vld [vmem:[%s3827_s27 + $0x170] sm:$0xff] }
 0x389   : > { %2233 = vst.msk [vmem:[%s5078_s7 + $0xb8] sm:$0xff] %vm750_vm0, %v2217_v9  ;;  %v2766_v36 = vmul.f32 %v5634_v56, %v5621_v21  ;;  %v5650_v9 = vadd.f32 0.001, %v1807_v4  ;;  %vm5660_vm7 = vmor %vm1882_vm6, %vm1883_vm4  ;;  %v5666_v61 = vadd.f32 0.001, %v1805_v20  ;;  %vm2772_vm10 = vweird.f32 %v5634_v56 }
 0x38a   : > { %v1878_v17 = vmul.f32 %v5625_v58, %v1877_v60  ;;  %v2703_v60 = vmul.f32 0.020408163, %v5336_v62  ;;  %v6040_v62 = vld [vmem:[#allocation7_spill] sm:$0xff]  ;;  %vm5690_vm12 = vmor %vm2771_vm11, %vm2772_vm10 }
 0x38b   : > { %v2767_v16 = vmul.f32 %v5634_v56, %v2766_v36  ;;  %vm1942_vm11 = vweird.f32 %v5666_v61 }
 0x38c   : > { %v1879_v1 = vmul.f32 0.5, %v1878_v17 }
 0x38d   : > { %v2768_v0 = vmul.f32 0.5, %v2767_v16 }
 0x38e   : > { %v1880_v37 = vsub.f32 1.5, %v1879_v1  ;;  %v5694_v1 = vadd.f32 0.001, %v2703_v60 }
 0x38f   : > { %v2769_v48 = vsub.f32 1.5, %v2768_v0 }
 0x390   : > { %v1881_v26 = vmul.f32 %v5625_v58, %v1880_v37 }
 0x391   : > { %v2770_v42 = vmul.f32 %v5634_v56, %v2769_v48 }
 0x392   : > { %v1885_v51 = vsel %vm5660_vm7, %v5625_v58, %v1881_v26  ;;  %v6039_v58 = vld [vmem:[#allocation53_spill] sm:$0xff]  ;;  %v6043_v26 = vld [vmem:[#allocation59_spill] sm:$0xff] }
 0x393   : > { %v2007_v36 = vmul.f32 %v1991_v3, %v1885_v51  ;;  %v2774_v21 = vsel %vm5690_vm12, %v5634_v56, %v2770_v42 }
 0x395   : > { %v2692_v28 = vpop.xlane.xlu1 %2691 }
 0x396   : > { %v2708_v7 = vmul.f32 0.020408163, %v2692_v28 }
 0x397   : > { %1196 = vperm.xlu2 %3628, %v1118_v33  }
 0x398   : > { %v2724_v44 = vadd.f32 0.001, %v2708_v7 }
 0x39a   : > { %3705 = vrsqrt.f32 %v2724_v44  ;;  %vm2881_vm8 = vweird.f32 %v2724_v44 }
 0x39b   : > { %3707 = vrsqrt.f32 %v5632_v8 }
 0x39c   : > { %3709 = vrsqrt.f32 %v5645_v49 }
 0x39d   : > { %3711 = vrsqrt.f32 %v5650_v9 }
 0x39e   : > { %3713 = vrsqrt.f32 %v5666_v61 }
 0x39f   : > { %2025 = vperm.xlu2 %3628, %v2003_v22  }
 0x3a0   : > { %v3706_v18 = vpop.eup %3705 }
 0x3a1   : > { %v2876_v24 = vmul.f32 %v3706_v18, %v2724_v44  ;;  %v5648_v27 = vpop.eup %3707  ;;  %vm2882_vm5 = vweird.f32 %v3706_v18 }
 0x3a2   : > { %v1907_v6 = vmul.f32 %v5648_v27, %v5632_v8  ;;  %vm2883_vm9 = vmor %vm2881_vm8, %vm2882_vm5  ;;  %v5672_v7 = vpop.eup %3709  ;;  %vm1913_vm13 = vweird.f32 %v5648_v27  ;;  %vm2801_vm5 = vweird.f32 %v5645_v49  ;;  %vm1962_vm8 = vweird.f32 %v5650_v9 }
 0x3a3   : > { %v2877_v55 = vmul.f32 %v3706_v18, %v2876_v24  ;;  %v5679_v17 = vpop.eup %3711  ;;  %v2796_v53 = vmul.f32 %v5672_v7, %v5645_v49  ;;  %v2889_v24 = vld [vmem:[%s4939_s29 + $0x120] sm:$0xff]  ;;  %vm5720_vm15 = vmor %vm1912_vm14, %vm1913_vm13  ;;  %vm2802_vm3 = vweird.f32 %v5672_v7  ;;  %vm2831_vm14 = vweird.f32 %v5694_v1 }
 0x3a4   : > { %v1908_v57 = vmul.f32 %v5648_v27, %v1907_v6  ;;  %v5706_v37 = vpop.eup %3713  ;;  %vm5751_vm6 = vmor %vm2801_vm5, %vm2802_vm3  ;;  %vm1963_vm7 = vweird.f32 %v5679_v17 }
 0x3a5   : > { %v2878_v15 = vmul.f32 0.5, %v2877_v55  ;;  %v2797_v29 = vmul.f32 %v5672_v7, %v2796_v53  ;;  %v1937_v48 = vmul.f32 %v5706_v37, %v5666_v61  ;;  %vm1943_vm10 = vweird.f32 %v5706_v37 }
 0x3a6   : > { %v1909_v34 = vmul.f32 0.5, %v1908_v57  ;;  %vm1944_vm12 = vmor %vm1942_vm11, %vm1943_vm10 }
 0x3a7   : > { %v2879_v63 = vsub.f32 1.5, %v2878_v15  ;;  %2924 = vperm.xlu2 %3628, %v2902_v32   ;;  %v2905_v32 = vmul.f32 %v2889_v24, %v2774_v21  ;;  %v2798_v35 = vmul.f32 0.5, %v2797_v29  ;;  %v2896_v21 = vld [vmem:[%s4939_s29 + $0x158] sm:$0xff] }
 0x3a8   : > { %v1910_v4 = vsub.f32 1.5, %v1909_v34  ;;  %v6047_v34 = vld [vmem:[#allocation47_spill] sm:$0xff] }
 0x3a9   : > { %v2880_v50 = vmul.f32 %v3706_v18, %v2879_v63  ;;  %v2680_v38 = vpop.xlane.xlu2 %2679  ;;  %v2799_v60 = vsub.f32 1.5, %v2798_v35 }
 0x3aa   : > { %v2704_v43 = vmul.f32 0.020408163, %v2680_v38  ;;  %v1911_v6 = vmul.f32 %v5648_v27, %v1910_v4  ;;  %v6049_v4 = vld [vmem:[#allocation62_spill] sm:$0xff]  ;;  %v1999_v38 = vld [vmem:[%s4939_s29 + $0xe8] sm:$0xff] }
 0x3ab   : > { %v2884_v28 = vsel %vm2883_vm9, %v3706_v18, %v2880_v50  ;;  %v1957_v18 = vmul.f32 %v5679_v17, %v5650_v9  ;;  %v2800_v24 = vmul.f32 %v5672_v7, %v2799_v60  ;;  %vm1964_vm9 = vmor %vm1962_vm8, %vm1963_vm7  ;;  %v6054_v9 = vld [vmem:[#allocation12_spill] sm:$0xff] }
 0x3ac   : > { %v2916_v33 = vmul.f32 %v2900_v19, %v2884_v28  ;;  %v5677_v44 = vadd.f32 0.001, %v2704_v43  ;;  %v6044_v19 = vld [vmem:[#allocation9_spill] sm:$0xff]  ;;  %v1915_v8 = vsel %vm5720_vm15, %v5648_v27, %v1911_v6 }
 0x3ad   : > { %v2021_v23 = vpop.permute.xlu1 %2020  ;;  %v1958_v0 = vmul.f32 %v5679_v17, %v1957_v18  ;;  %v2804_v49 = vsel %vm5751_vm6, %v5672_v7, %v2800_v24  ;;  %v6057_v24 = vld [vmem:[#allocation71_spill] sm:$0xff] }
 0x3ae   : > { %v2098_v59 = vmul.f32 %v2021_v23, %v6039_v58  ;;  %2994 = vperm.xlu1 %3626, %v2916_v33   ;;  %3715 = vrsqrt.f32 %v5677_v44  ;;  %v1994_v33 = vld [vmem:[%s4939_s29 + $0xc0] sm:$0xff]  ;;  %v1938_v23 = vmul.f32 %v5706_v37, %v1937_v48  ;;  %vm2841_vm2 = vweird.f32 %v5677_v44 }
 0x3af   : > { %2045 = vperm.xlu2 %3628, %v2007_v36   ;;  %3717 = vrsqrt.f32 %v5694_v1  ;;  %v1959_v43 = vmul.f32 0.5, %v1958_v0  ;;  %v2706_v36 = vmul.f32 0.020408163, %v5439_v10  ;;  %v2010_v18 = vmul.f32 %v1994_v33, %v1915_v8  ;;  %v6053_v48 = vld [vmem:[#allocation66_spill] sm:$0xff] }
 0x3b0   : > { %v2210_v5 = vadd.f32 %v6040_v62, %v2098_v59  ;;  %v6048_v62 = vld [vmem:[#allocation8_spill] sm:$0xff]  ;;  %v1939_v29 = vmul.f32 0.5, %v1938_v23  ;;  %v1997_v23 = vld [vmem:[%s4939_s29 + $0xd8] sm:$0xff] }
 0x3b1   : > { %v1790_v16 = vpop.xlane.xlu2 %1789  ;;  %v1960_v53 = vsub.f32 1.5, %v1959_v43  ;;  %v5755_v6 = vadd.f32 0.001, %v2706_v36 }
 0x3b2   : > { %2226 = vst.msk [vmem:[%s5078_s7 + $0x80] sm:$0xff] %vm750_vm0, %v2210_v5  ;;  %v1808_v20 = vmul.f32 0.020408163, %v1790_v16 }
 0x3b3   : > { %vm2861_vm5 = vweird.f32 %v5755_v6 }
 0x3b4   : > { %v3716_v55 = vpop.eup %3715  ;;  %v5724_v51 = vadd.f32 0.001, %v1808_v20 }
 0x3b5   : > { %v2036_v15 = vpop.permute.xlu1 %2035  ;;  %v2836_v56 = vmul.f32 %v3716_v55, %v5677_v44  ;;  %v5732_v42 = vpop.eup %3717  ;;  %vm2842_vm1 = vweird.f32 %v3716_v55  ;;  %v6050_v44 = vld [vmem:[#allocation29_spill] sm:$0xff] }
 0x3b6   : > { %v2101_v63 = vmul.f32 %v2036_v15, %v6043_v26  ;;  %3101 = vperm.xlu1 %3626, %v3027_v25   ;;  %3719 = vrsqrt.f32 %v5724_v51  ;;  %v2826_v10 = vmul.f32 %v5732_v42, %v5694_v1  ;;  %vm2843_vm4 = vmor %vm2841_vm2, %vm2842_vm1  ;;  %v1940_v26 = vsub.f32 1.5, %v1939_v29 }
 0x3b7   : > { %v2837_v50 = vmul.f32 %v3716_v55, %v2836_v56  ;;  %2939 = vperm.xlu2 %3628, %v2905_v32   ;;  %v1961_v56 = vmul.f32 %v5679_v17, %v1960_v53  ;;  %3721 = vrsqrt.f32 %v5755_v6  ;;  %vm2832_vm13 = vweird.f32 %v5732_v42  ;;  %v2000_v32 = vld [vmem:[%s4939_s29 + $0xf0] sm:$0xff] }
 0x3b8   : > { %v2213_v57 = vadd.f32 %v6044_v19, %v2101_v63  ;;  %v2827_v20 = vmul.f32 %v5732_v42, %v2826_v10  ;;  %vm2833_vm15 = vmor %vm2831_vm14, %vm2832_vm13  ;;  %vm1972_vm2 = vweird.f32 %v5724_v51 }
 0x3b9   : > { %v2838_v28 = vmul.f32 0.5, %v2837_v50  ;;  %v1182_v3 = vpop.permute.xlu2 %1181 }
 0x3ba   : > { %2229 = vst.msk [vmem:[%s5078_s7 + $0x98] sm:$0xff] %vm750_vm0, %v2213_v57  ;;  %v1211_v58 = vmul.f32 %v1182_v3, %v6047_v34  ;;  %v1965_v57 = vsel %vm1964_vm9, %v5679_v17, %v1961_v56  ;;  %v2828_v43 = vmul.f32 0.5, %v2827_v20 }
 0x3bb   : > { %v2839_v59 = vsub.f32 1.5, %v2838_v28  ;;  %v1941_v28 = vmul.f32 %v5706_v37, %v1940_v26  ;;  %v2015_v8 = vmul.f32 %v1999_v38, %v1965_v57 }
 0x3bc   : > { %v1323_v5 = vadd.f32 %v6048_v62, %v1211_v58  ;;  %v3720_v63 = vpop.eup %3719  ;;  %v2829_v33 = vsub.f32 1.5, %v2828_v43 }
 0x3bd   : > { %v2930_v22 = vpop.permute.xlu1 %2929  ;;  %v2840_v27 = vmul.f32 %v3716_v55, %v2839_v59  ;;  %v1967_v7 = vmul.f32 %v3720_v63, %v5724_v51  ;;  %v1945_v60 = vsel %vm1944_vm12, %v5706_v37, %v1941_v28  ;;  %v3722_v34 = vpop.eup %3721  ;;  %v6055_v59 = vld [vmem:[#allocation70_spill] sm:$0xff]  ;;  %vm1973_vm1 = vweird.f32 %v3720_v63  ;;  %v3028_v28 = vld [vmem:[%s3827_s27 + $0x178] sm:$0xff] }
 0x3be   : > { %v2999_v16 = vmul.f32 %v2930_v22, %v6049_v4  ;;  %1339 = vst.msk [vmem:[%s5078_s7 + $0x60] sm:$0xff] %vm750_vm0, %v1323_v5  ;;  %v2013_v53 = vmul.f32 %v1997_v23, %v1945_v60  ;;  %v2830_v62 = vmul.f32 %v5732_v42, %v2829_v33  ;;  %v2856_v61 = vmul.f32 %v3722_v34, %v5755_v6  ;;  %v6056_v22 = vld [vmem:[#allocation36_spill] sm:$0xff]  ;;  %vm1974_vm3 = vmor %vm1972_vm2, %vm1973_vm1 }
 0x3bf   : > { %2060 = vperm.xlu2 %3628, %v2010_v18   ;;  %v2844_v0 = vsel %vm2843_vm4, %v3716_v55, %v2840_v27  ;;  %v2892_v55 = vld [vmem:[%s4939_s29 + $0x138] sm:$0xff]  ;;  %v1968_v17 = vmul.f32 %v3720_v63, %v1967_v7  ;;  %vm2862_vm4 = vweird.f32 %v3722_v34 }
 0x3c0   : > { %v3111_v25 = vadd.f32 %v6050_v44, %v2999_v16  ;;  %v2912_v15 = vmul.f32 %v2896_v21, %v2844_v0  ;;  %v2908_v19 = vmul.f32 %v2892_v55, %v2804_v49  ;;  %v2857_v37 = vmul.f32 %v3722_v34, %v2856_v61  ;;  %v2895_v16 = vld [vmem:[%s4939_s29 + $0x150] sm:$0xff]  ;;  %v6058_v0 = vld [vmem:[#allocation15_spill] sm:$0xff]  ;;  %v6059_v55 = vld [vmem:[#allocation38_spill] sm:$0xff] }
 0x3c1   : > { %v1969_v5 = vmul.f32 0.5, %v1968_v17  ;;  %v2834_v4 = vsel %vm2833_vm15, %v5732_v42, %v2830_v62  ;;  %vm2863_vm6 = vmor %vm2861_vm5, %vm2862_vm4  ;;  %v6065_v61 = vld [vmem:[#allocation52_spill] sm:$0xff] }
 0x3c2   : > { %3127 = vst.msk [vmem:[%s5078_s7 + $0x110] sm:$0xff] %vm750_vm0, %v3111_v25  ;;  %2974 = vperm.xlu0 %3627, %v2912_v15   ;;  %v2911_v29 = vmul.f32 %v2895_v16, %v2834_v4  ;;  %v2858_v44 = vmul.f32 0.5, %v2857_v37  ;;  %v6067_v16 = vld [vmem:[#allocation54_spill] sm:$0xff] }
 0x3c3   : > { %v1970_v27 = vsub.f32 1.5, %v1969_v5 }
 0x3c4   : > { %v2859_v1 = vsub.f32 1.5, %v2858_v44 }
 0x3c5   : > { %v2051_v35 = vpop.permute.xlu1 %2050  ;;  %v1971_v25 = vmul.f32 %v3720_v63, %v1970_v27 }
 0x3c6   : > { %v2104_v50 = vmul.f32 %v2051_v35, %v6053_v48  ;;  %v2860_v49 = vmul.f32 %v3722_v34, %v2859_v1 }
 0x3c7   : > { %2954 = vperm.xlu2 %3628, %v2908_v19   ;;  %v1975_v42 = vsel %vm1974_vm3, %v3720_v63, %v1971_v25  ;;  %v2898_v63 = vld [vmem:[%s4939_s29 + $0x168] sm:$0xff]  ;;  %v6060_v19 = vld [vmem:[#allocation18_spill] sm:$0xff]  ;;  %v2899_v25 = vld [vmem:[%s4939_s29 + $0x170] sm:$0xff] }
 0x3c8   : > { %v2216_v3 = vadd.f32 %v6054_v9, %v2104_v50  ;;  %v2016_v26 = vmul.f32 %v2000_v32, %v1975_v42  ;;  %v2864_v51 = vsel %vm2863_vm6, %v3722_v34, %v2860_v49  ;;  %v6061_v9 = vld [vmem:[#allocation35_spill] sm:$0xff]  ;;  %v6069_v42 = vld [vmem:[#allocation58_spill] sm:$0xff] }
 0x3c9   : > { %v2914_v50 = vmul.f32 %v2898_v63, %v2864_v51  ;;  %v6072_v51 = vld [vmem:[#allocation17_spill] sm:$0xff] }
 0x3ca   : > { %2232 = vst.msk [vmem:[%s5078_s7 + $0xb0] sm:$0xff] %vm750_vm0, %v2216_v3  ;;  %2085 = vperm.xlu0 %3627, %v2015_v8   ;;  %v6062_v8 = vld [vmem:[#allocation39_spill] sm:$0xff] }
 0x3cd   : > { %v2950_v58 = vpop.permute.xlu1 %2949 }
 0x3ce   : > { %v3003_v36 = vmul.f32 %v2950_v58, %v6055_v59  ;;  %v6063_v58 = vld [vmem:[#allocation25_spill] sm:$0xff] }
 0x3cf   : > { %2075 = vperm.xlu2 %3628, %v2013_v53  }
 0x3d0   : > { %v3115_v18 = vadd.f32 %v6056_v22, %v3003_v36  ;;  %v6064_v36 = vld [vmem:[#allocation21_spill] sm:$0xff] }
 0x3d2   : > { %3131 = vst.msk [vmem:[%s5078_s7 + $0x130] sm:$0xff] %vm750_vm0, %v3115_v18 }
 0x3d5   : > { %v2066_v21 = vpop.permute.xlu1 %2065 }
 0x3d6   : > { %v2107_v10 = vmul.f32 %v2066_v21, %v6057_v24 }
 0x3d7   : > { %2969 = vperm.xlu2 %3628, %v2911_v29  }
 0x3d8   : > { %v2219_v15 = vadd.f32 %v6058_v0, %v2107_v10  ;;  %v6068_v10 = vld [vmem:[#allocation16_spill] sm:$0xff] }
 0x3da   : > { %2235 = vst.msk [vmem:[%s5078_s7 + $0xc8] sm:$0xff] %vm750_vm0, %v2219_v15 }
 0x3dd   : > { %v2965_v56 = vpop.permute.xlu1 %2964 }
 0x3de   : > { %v3006_v20 = vmul.f32 %v2965_v56, %v5133_v39  ;;  %v6070_v56 = vld [vmem:[#allocation24_spill] sm:$0xff] }
 0x3df   : > { %2090 = vperm.xlu2 %3628, %v2016_v26   ;;  %v3026_v26 = vld [vmem:[%s3827_s27 + $0x168] sm:$0xff] }
 0x3e0   : > { %v3118_v35 = vadd.f32 %v6059_v55, %v3006_v20  ;;  %v6071_v55 = vld [vmem:[#allocation64_spill] sm:$0xff] }
 0x3e2   : > { %3134 = vst.msk [vmem:[%s5078_s7 + $0x148] sm:$0xff] %vm750_vm0, %v3118_v35 }
 0x3e5   : > { %v2081_v48 = vpop.permute.xlu1 %2080 }
 0x3e6   : > { %v2110_v39 = vmul.f32 %v2081_v48, %v5115_v41 }
 0x3e7   : > { %2984 = vperm.xlu2 %3628, %v2914_v50  }
 0x3e8   : > { %v2222_v57 = vadd.f32 %v6060_v19, %v2110_v39  ;;  %v6073_v39 = vld [vmem:[#allocation65_spill] sm:$0xff]  ;;  %v6074_v19 = vld [vmem:[#allocation27_spill] sm:$0xff] }
 0x3ea   : > { %2238 = vst.msk [vmem:[%s5078_s7 + $0xe0] sm:$0xff] %vm750_vm0, %v2222_v57 }
 0x3eb   : > { %v2960_v38 = vpop.permute.xlu0 %2959 }
 0x3ec   : > { %v3005_v43 = vmul.f32 %v2960_v38, %v5268_v14 }
 0x3ed   : > { %v2980_v6 = vpop.permute.xlu1 %2979 }
 0x3ee   : > { %v3009_v7 = vmul.f32 %v2980_v6, %v5227_v40  ;;  %v3117_v3 = vadd.f32 %v6061_v9, %v3005_v43  ;;  %v6075_v6 = vld [vmem:[#allocation20_spill] sm:$0xff] }
 0x3ef   : > { %3106 = vperm.xlu2 %3628, %v3028_v28   ;;  %v6076_v9 = vld [vmem:[#allocation68_spill] sm:$0xff] }
 0x3f0   : > { %v3121_v33 = vadd.f32 %v6062_v8, %v3009_v7  ;;  %3133 = vst.msk [vmem:[%s5078_s7 + $0x140] sm:$0xff] %vm750_vm0, %v3117_v3  ;;  %v6077_v8 = vld [vmem:[#allocation30_spill] sm:$0xff] }
 0x3f2   : > { %3137 = vst.msk [vmem:[%s5078_s7 + $0x160] sm:$0xff] %vm750_vm0, %v3121_v33  ;;  %v2689_v41 = vpop.xlane.xlu2 %2688 }
 0x3f3   : > { %v2707_v17 = vmul.f32 0.020408163, %v2689_v41  ;;  %v2071_v60 = vpop.permute.xlu0 %2070 }
 0x3f4   : > { %v2108_v14 = vmul.f32 %v2071_v60, %v5120_v13  ;;  %v6066_v13 = vld [vmem:[#allocation11_spill] sm:$0xff] }
 0x3f5   : > { %v2096_v23 = vpop.permute.xlu1 %2095  ;;  %v2723_v34 = vadd.f32 0.001, %v2707_v17 }
 0x3f6   : > { %v2113_v40 = vmul.f32 %v2096_v23, %v5185_v2  ;;  %v2220_v59 = vadd.f32 %v6063_v58, %v2108_v14  ;;  %v6078_v14 = vld [vmem:[#allocation23_spill] sm:$0xff] }
 0x3f7   : > { %3723 = vrsqrt.f32 %v2723_v34  ;;  %vm2871_vm8 = vweird.f32 %v2723_v34 }
 0x3f8   : > { %v2225_v53 = vadd.f32 %v6064_v36, %v2113_v40  ;;  %2236 = vst.msk [vmem:[%s5078_s7 + $0xd0] sm:$0xff] %vm750_vm0, %v2220_v59 }
 0x3fa   : > { %2241 = vst.msk [vmem:[%s5078_s7 + $0xf8] sm:$0xff] %vm750_vm0, %v2225_v53  ;;  %v1197_v62 = vpop.permute.xlu2 %1196  ;;  %v6080_v53 = vld [vmem:[#allocation33_spill] sm:$0xff] }
 0x3fb   : > { %v1214_v5 = vmul.f32 %v1197_v62, %v6065_v61  ;;  %v6081_v61 = vld [vmem:[#allocation28_spill] sm:$0xff] }
 0x3fd   : > { %v3724_v22 = vpop.eup %3723  ;;  %v1326_v18 = vadd.f32 %v6066_v13, %v1214_v5  ;;  %v6082_v13 = vld [vmem:[#allocation26_spill] sm:$0xff] }
 0x3fe   : > { %v2866_v37 = vmul.f32 %v3724_v22, %v2723_v34  ;;  %vm2872_vm7 = vweird.f32 %v3724_v22  ;;  %v6079_v34 = vld [vmem:[#allocation37_spill] sm:$0xff] }
 0x3ff   : > { %1342 = vst.msk [vmem:[%s5078_s7 + $0x78] sm:$0xff] %vm750_vm0, %v1326_v18  ;;  %vm2873_vm9 = vmor %vm2871_vm8, %vm2872_vm7 }
 0x400   : > { %v2867_v2 = vmul.f32 %v3724_v22, %v2866_v37 }
 0x402   : > { %v2868_v27 = vmul.f32 0.5, %v2867_v2  ;;  %v2026_v4 = vpop.permute.xlu2 %2025 }
 0x403   : > { %v2099_v21 = vmul.f32 %v2026_v4, %v6067_v16 }
 0x404   : > { %v2869_v24 = vsub.f32 1.5, %v2868_v27 }
 0x405   : > { %v2211_v29 = vadd.f32 %v6068_v10, %v2099_v21 }
 0x406   : > { %v2870_v44 = vmul.f32 %v3724_v22, %v2869_v24 }
 0x407   : > { %2227 = vst.msk [vmem:[%s5078_s7 + $0x88] sm:$0xff] %vm750_vm0, %v2211_v29 }
 0x408   : > { %v2874_v0 = vsel %vm2873_vm9, %v3724_v22, %v2870_v44 }
 0x409   : > { %v2915_v15 = vmul.f32 %v2899_v25, %v2874_v0 }
 0x40a   : > { %v2925_v1 = vpop.permute.xlu2 %2924 }
 0x40b   : > { %v2998_v32 = vmul.f32 %v2925_v1, %v6069_v42  ;;  %2989 = vperm.xlu0 %3627, %v2915_v15  }
 0x40d   : > { %v3110_v20 = vadd.f32 %v6070_v56, %v2998_v32 }
 0x40f   : > { %3126 = vst.msk [vmem:[%s5078_s7 + $0x108] sm:$0xff] %vm750_vm0, %v3110_v20 }
 0x412   : > { %v2046_v49 = vpop.permute.xlu2 %2045 }
 0x413   : > { %v2103_v35 = vmul.f32 %v2046_v49, %v6071_v55  ;;  %3096 = vperm.xlu0 %3627, %v3026_v26  }
 0x415   : > { %v2215_v63 = vadd.f32 %v6072_v51, %v2103_v35 }
 0x417   : > { %2231 = vst.msk [vmem:[%s5078_s7 + $0xa8] sm:$0xff] %vm750_vm0, %v2215_v63 }
 0x41a   : > { %v2940_v48 = vpop.permute.xlu2 %2939 }
 0x41b   : > { %v3001_v50 = vmul.f32 %v2940_v48, %v6073_v39 }
 0x41d   : > { %v3113_v57 = vadd.f32 %v6074_v19, %v3001_v50 }
 0x41f   : > { %3129 = vst.msk [vmem:[%s5078_s7 + $0x120] sm:$0xff] %vm750_vm0, %v3113_v57 }
 0x420   : > { %v2995_v37 = vpop.permute.xlu1 %2994 }
 0x421   : > { %v3012_v2 = vmul.f32 %v2995_v37, %v5359_v30 }
 0x422   : > { %v2061_v38 = vpop.permute.xlu2 %2060 }
 0x423   : > { %v2106_v43 = vmul.f32 %v2061_v38, %v5147_v52 }
 0x425   : > { %v2218_v28 = vadd.f32 %v6075_v6, %v2106_v43 }
 0x427   : > { %2234 = vst.msk [vmem:[%s5078_s7 + $0xc0] sm:$0xff] %vm750_vm0, %v2218_v28 }
 0x428   : > { %v3102_v21 = vpop.permute.xlu1 %3101 }
 0x42a   : > { %v2955_v7 = vpop.permute.xlu2 %2954 }
 0x42b   : > { %v3004_v3 = vmul.f32 %v2955_v7, %v6076_v9 }
 0x42d   : > { %v3116_v33 = vadd.f32 %v6077_v8, %v3004_v3 }
 0x42f   : > { %3132 = vst.msk [vmem:[%s5078_s7 + $0x138] sm:$0xff] %vm750_vm0, %v3116_v33 }
 0x432   : > { %v2076_v41 = vpop.permute.xlu2 %2075 }
 0x433   : > { %v2109_v17 = vmul.f32 %v2076_v41, %v5301_v47 }
 0x434   : > { %v2975_v60 = vpop.permute.xlu0 %2974 }
 0x435   : > { %v2221_v23 = vadd.f32 %v6078_v14, %v2109_v17  ;;  %v3008_v52 = vmul.f32 %v2975_v60, %v5385_v54 }
 0x437   : > { %2237 = vst.msk [vmem:[%s5078_s7 + $0xd8] sm:$0xff] %vm750_vm0, %v2221_v23  ;;  %v3120_v40 = vadd.f32 %v6079_v34, %v3008_v52 }
 0x439   : > { %3136 = vst.msk [vmem:[%s5078_s7 + $0x158] sm:$0xff] %vm750_vm0, %v3120_v40 }
 0x43a   : > { %v2970_v58 = vpop.permute.xlu2 %2969 }
 0x43b   : > { %v3007_v59 = vmul.f32 %v2970_v58, %v5103_v12 }
 0x43c   : > { %v2086_v36 = vpop.permute.xlu0 %2085 }
 0x43d   : > { %v3119_v62 = vadd.f32 %v6080_v53, %v3007_v59  ;;  %v2111_v47 = vmul.f32 %v2086_v36, %v5202_v46 }
 0x43f   : > { %3135 = vst.msk [vmem:[%s5078_s7 + $0x150] sm:$0xff] %vm750_vm0, %v3119_v62  ;;  %v2223_v5 = vadd.f32 %v6081_v61, %v2111_v47 }
 0x441   : > { %2239 = vst.msk [vmem:[%s5078_s7 + $0xe8] sm:$0xff] %vm750_vm0, %v2223_v5 }
 0x442   : > { %v2091_v54 = vpop.permute.xlu2 %2090 }
 0x443   : > { %v2112_v22 = vmul.f32 %v2091_v54, %v5406_v45 }
 0x445   : > { %v2224_v18 = vadd.f32 %v6082_v13, %v2112_v22 }
 0x447   : > { %2240 = vst.msk [vmem:[%s5078_s7 + $0xf0] sm:$0xff] %vm750_vm0, %v2224_v18 }
 0x44a   : > { %v2985_v12 = vpop.permute.xlu2 %2984 }
 0x44b   : > { %v3010_v45 = vmul.f32 %v2985_v12, %v5170_v11 }
 0x452   : > { %v3107_v46 = vpop.permute.xlu2 %3106 }
 0x453   : > { %v3124_v27 = vadd.f32 %v3107_v46, %v3012_v2 }
 0x455   : > { %3140 = vst.msk [vmem:[%s5078_s7 + $0x178] sm:$0xff] %vm750_vm0, %v3124_v27 }
 0x47d   : > { %v2990_v4 = vpop.permute.xlu0 %2989 }
 0x47e   : > { %v3011_v16 = vmul.f32 %v2990_v4, %v5579_v31 }
 0x480   : > { %v3123_v24 = vadd.f32 %v3102_v21, %v3011_v16 }
 0x482   : > { %3139 = vst.msk [vmem:[%s5078_s7 + $0x170] sm:$0xff] %vm750_vm0, %v3123_v24 }
 0x485   : > { %v3097_v10 = vpop.permute.xlu0 %3096 }
 0x486   : > { %v3122_v29 = vadd.f32 %v3097_v10, %v3010_v45 }
 0x488   : > { %3138 = vst.msk [vmem:[%s5078_s7 + $0x168] sm:$0xff] %vm750_vm0, %v3122_v29 }
 0x489 PF: > { %s15_s18 = sadd.s32 1, %s3731_s18  }
 0x48a   : > { %p12_p4 = scmp.ge.s32.totalorder %s15_s18, 8  }
 0x48c   :  { %14 = sbr.rel (!%p12_p4) target bundleno = 1 (0x1), region = 76 }

</bundles_post_ra>
